<compile_context>
chip_gen: v7x
topology: tpu7x:2x2x1
jax: 0.10.0
libtpu: 0.0.40
codegen_flags: <defaults>
</compile_context>

<pallas_src>
import functools

import jax
import jax.numpy as jnp
from jax.experimental import pallas as pl
from jax.experimental.pallas import tpu as pltpu

_LANE = 128
_SUBLANE = 16            # bf16 packed sublane tile (also a multiple of f32's 8)
_COMPUTE_DTYPE = jnp.bfloat16  # matmul input dtype; use jnp.float32 for exact f32
_MAX_TILE_G = 512        # conv-stage rows per grid step (fits VMEM w/ 2x buffering)
_MAX_TILE_N = 256        # classifier rows per grid step

_PARALLEL_1D = pltpu.CompilerParams(dimension_semantics=("parallel",))


def _round_up(x, m):
    return (x + m - 1) // m * m


def _pad2d(a, rows, cols):
    r, c = a.shape
    return jnp.pad(a, ((0, rows - r), (0, cols - c)))


# ----------------------------------------------------------------------------
# Pallas kernels
# ----------------------------------------------------------------------------
def _conv_sig_pool_kernel(p_ref, w_ref, b_ref, o_ref):
    """One G-tile of: im2col-conv matmul + bias + sigmoid + 2x2 average pool.

    p_ref: (4, TG, Kp)  patches, pool-quadrant-blocked: p[q, g, :] is the patch
                        of pool group g for pool offset q = 2*dy + dx.
    w_ref: (Kp, Cp)     conv weights (constant index_map -> resident in VMEM).
    b_ref: (1, Cp)      bias (f32, zero-padded lanes).
    o_ref: (TG, Cp)     pooled activation tile, lane-dense (128 wide).
    """
    tg = o_ref.shape[0]
    kp = p_ref.shape[2]
    # Merge the four pool quadrants into one tall matmul; the reshape is a
    # layout no-op because TG is a multiple of the bf16 sublane tile (16).
    p = p_ref[...].reshape(4 * tg, kp)
    y = jnp.dot(p, w_ref[...], preferred_element_type=jnp.float32) + b_ref[...]
    # sigmoid(y) = 0.5*tanh(0.5*y) + 0.5 -- one EUP op; mul/add ride the VPU.
    y = 0.5 * jnp.tanh(0.5 * y) + 0.5
    # 2x2 average pool = mean of the four quadrant slabs (static sublane slices).
    pooled = 0.25 * (y[0:tg] + y[tg:2 * tg] + y[2 * tg:3 * tg] + y[3 * tg:4 * tg])
    o_ref[...] = pooled.astype(o_ref.dtype)


def _linear_kernel(x_ref, w_ref, b_ref, o_ref):
    """One N-tile of the (pre-folded) classifier: x @ W + b."""
    o_ref[...] = (jnp.dot(x_ref[...], w_ref[...],
                          preferred_element_type=jnp.float32)
                  + b_ref[...]).astype(o_ref.dtype)


# ----------------------------------------------------------------------------
# Pallas wrappers
# ----------------------------------------------------------------------------
def conv_sigmoid_pool(x_nhwc, wm, bm, *, cout, k, padding):
    """Conv2d(k, stride=1, padding) + Sigmoid + AvgPool2d(2,2), channels-last.

    x_nhwc: (N, H, W, Cin); wm: (Kp, Cp) prepared weights; bm: (1, Cp) bias.
    Returns (N, Hp, Wp, cout), channels-last, pooled.
    """
    if padding:
        x_nhwc = jnp.pad(
            x_nhwc, ((0, 0), (padding, padding), (padding, padding), (0, 0)))
    N, H, W, Cin = x_nhwc.shape
    Ho, Wo = H - k + 1, W - k + 1
    Hp, Wp = Ho // 2, Wo // 2
    KK = Cin * k * k
    Kp, Cp = wm.shape
    G = N * Hp * Wp

    # im2col with (kh, kw, ci) column order, rows grouped by pool quadrant so
    # the kernel can pool with whole-slab adds while the result is in VMEM.
    # TODO(synk): build these patches in-kernel from a VMEM-resident image
    #             tile instead of materializing them in HBM from XLA.
    cols = []
    for kh in range(k):
        for kw in range(k):
            cols.append(x_nhwc[:, kh:kh + Ho, kw:kw + Wo, :])
    p = jnp.concatenate(cols, axis=-1)                      # (N, Ho, Wo, KK)
    p = p.reshape(N, Hp, 2, Wp, 2, KK).transpose(2, 4, 0, 1, 3, 5)
    p = p.reshape(4, G, KK)

    tile_g = min(_MAX_TILE_G, _round_up(G, _SUBLANE))
    g_pad = _round_up(G, tile_g)
    p = jnp.pad(p, ((0, 0), (0, g_pad - G), (0, Kp - KK))).astype(wm.dtype)

    out = pl.pallas_call(
        _conv_sig_pool_kernel,
        out_shape=jax.ShapeDtypeStruct((g_pad, Cp), wm.dtype),
        grid=(g_pad // tile_g,),
        in_specs=[
            pl.BlockSpec((4, tile_g, Kp), lambda g: (0, g, 0)),
            pl.BlockSpec((Kp, Cp), lambda g: (0, 0)),   # resident weights
            pl.BlockSpec((1, Cp), lambda g: (0, 0)),    # resident bias
        ],
        out_specs=pl.BlockSpec((tile_g, Cp), lambda g: (g, 0)),
        compiler_params=_PARALLEL_1D,
    )(p, wm, bm)
    return out[:G, :cout].reshape(N, Hp, Wp, cout)


def classifier_fused(x_feat, wm, bm):
    """Folded fc1->fc2->fc3 (Dropout = identity at inference): one matmul.

    x_feat: (N, 400) flattened in (H, W, C) order; wm: (512, 128); bm: (1, 128).
    """
    N, F = x_feat.shape
    Fp, Cp = wm.shape
    tile_n = min(_MAX_TILE_N, _round_up(N, _SUBLANE))
    n_pad = _round_up(N, tile_n)
    x = jnp.pad(x_feat, ((0, n_pad - N), (0, Fp - F))).astype(wm.dtype)

    out = pl.pallas_call(
        _linear_kernel,
        out_shape=jax.ShapeDtypeStruct((n_pad, Cp), jnp.float32),
        grid=(n_pad // tile_n,),
        in_specs=[
            pl.BlockSpec((tile_n, Fp), lambda i: (i, 0)),
            pl.BlockSpec((Fp, Cp), lambda i: (0, 0)),   # resident weights
            pl.BlockSpec((1, Cp), lambda i: (0, 0)),    # resident bias
        ],
        out_specs=pl.BlockSpec((tile_n, Cp), lambda i: (i, 0)),
        compiler_params=_PARALLEL_1D,
    )(x, wm, bm)
    return out[:N]


# ----------------------------------------------------------------------------
# Parameters
# ----------------------------------------------------------------------------
def init_params(key, num_classes=2):
    """Random parameters in the original PyTorch nn.Module layout."""
    ks = jax.random.split(key, 10)
    scale = 0.1
    return {
        "conv1_w": scale * jax.random.normal(ks[0], (6, 3, 5, 5), jnp.float32),
        "conv1_b": scale * jax.random.normal(ks[1], (6,), jnp.float32),
        "conv2_w": scale * jax.random.normal(ks[2], (16, 6, 5, 5), jnp.float32),
        "conv2_b": scale * jax.random.normal(ks[3], (16,), jnp.float32),
        "fc1_w": scale * jax.random.normal(ks[4], (120, 400), jnp.float32),
        "fc1_b": scale * jax.random.normal(ks[5], (120,), jnp.float32),
        "fc2_w": scale * jax.random.normal(ks[6], (84, 120), jnp.float32),
        "fc2_b": scale * jax.random.normal(ks[7], (84,), jnp.float32),
        "fc3_w": scale * jax.random.normal(ks[8], (num_classes, 84), jnp.float32),
        "fc3_b": scale * jax.random.normal(ks[9], (num_classes,), jnp.float32),
    }


def prepare_params(raw, compute_dtype=_COMPUTE_DTYPE):
    """One-time conversion of PyTorch-layout weights into kernel-ready layout:
    (in, out) transposes, channels-last column order, 128-padding (lane-dense
    outputs, 128-aligned K), classifier folding, and cast to the matmul
    compute dtype (biases stay f32)."""

    def conv_mats(w, b):
        cout, cin, k, _ = w.shape
        kk = cin * k * k
        wm = w.transpose(0, 2, 3, 1).reshape(cout, kk).T   # (kk, cout), (kh,kw,ci)
        wm = _pad2d(wm, _round_up(kk, _LANE), _round_up(cout, _LANE))
        bm = _pad2d(b.reshape(1, cout), 1, _round_up(cout, _LANE))
        return wm.astype(compute_dtype), bm.astype(jnp.float32)

    p = {}
    p["conv1_wm"], p["conv1_bm"] = conv_mats(raw["conv1_w"], raw["conv1_b"])
    p["conv2_wm"], p["conv2_bm"] = conv_mats(raw["conv2_w"], raw["conv2_b"])

    # PyTorch flattens conv2's output as (C,H,W); the channels-last path
    # flattens (H,W,C) -- permute fc1's weight columns once here.
    fc1_w_hwc = (raw["fc1_w"].reshape(-1, 16, 5, 5)
                 .transpose(0, 2, 3, 1).reshape(-1, 16 * 5 * 5))

    # Linear(400,120) -> Dropout -> Linear(120,84) -> Dropout -> Linear(84,C)
    # has no nonlinearity and Dropout is identity at inference, so fold the
    # chain into a single affine map (done once, in f32, at prep time).
    w_fold = fc1_w_hwc.T @ raw["fc2_w"].T @ raw["fc3_w"].T          # (400, C)
    b_fold = ((raw["fc1_b"] @ raw["fc2_w"].T + raw["fc2_b"])
              @ raw["fc3_w"].T + raw["fc3_b"])                      # (C,)
    num_classes = raw["fc3_w"].shape[0]
    p["fc_wm"] = _pad2d(w_fold, _round_up(w_fold.shape[0], _LANE),
                        _round_up(num_classes, _LANE)).astype(compute_dtype)
    p["fc_bm"] = _pad2d(b_fold.reshape(1, -1), 1,
                        _round_up(num_classes, _LANE)).astype(jnp.float32)
    return p


# ----------------------------------------------------------------------------
# LeNet forward (inference)
# ----------------------------------------------------------------------------
def lenet_forward(params, x, *, num_classes=2):
    """x: (N, 3, 28, 28) NCHW, like the PyTorch module. Returns (N, num_classes)."""
    # One-time layout change to channels-last; stays NHWC until the flatten.
    x = jnp.transpose(x, (0, 2, 3, 1)).astype(params["conv1_wm"].dtype)
    x = conv_sigmoid_pool(x, params["conv1_wm"], params["conv1_bm"],
                          cout=6, k=5, padding=2)            # (N, 14, 14, 6)
    x = conv_sigmoid_pool(x, params["conv2_wm"], params["conv2_bm"],
                          cout=16, k=5, padding=0)           # (N, 5, 5, 16)
    x = x.reshape(x.shape[0], -1)                            # (N, 400), (H,W,C)
    logits = classifier_fused(x, params["fc_wm"], params["fc_bm"])  # (N, 128)
    return logits[:, :num_classes]


if __name__ == "__main__":
    key = jax.random.PRNGKey(0)
    k_param, k_x = jax.random.split(key)
    raw_params = init_params(k_param, num_classes=2)
    params = prepare_params(raw_params)      # one-time transpose / fold / pad / cast
    # Input must be (N, 3, 28, 28) so the flattened feature size is 400 = 16*5*5.
    x = jax.random.normal(k_x, (2, 3, 28, 28), jnp.float32)

    fwd = jax.jit(functools.partial(lenet_forward, num_classes=2))
    out = jax.block_until_ready(fwd(params, x))
    assert out.shape == (2, 2), out.shape
    assert bool(jnp.isfinite(out).all()), "non-finite logits"
    print("KERNEL_OK")
</pallas_src>

<mosaic_0001>
module attributes {stable_mosaic.version = 11 : i64} {
  func.func @_conv_sig_pool_kernel(%arg0: i32, %arg1: memref<4x400x128xbf16, #tpu.memory_space<vmem>>, %arg2: memref<128x128xbf16, #tpu.memory_space<vmem>>, %arg3: memref<1x128xf32, #tpu.memory_space<vmem>>, %arg4: memref<400x128xbf16, #tpu.memory_space<vmem>>) attributes {dimension_semantics = [#tpu.dimension_semantics<parallel>], iteration_bounds = array<i64: 1>, scalar_prefetch = 0 : i64, scratch_operands = 0 : i64, tpu.core_type = #tpu.core_type<tc>, window_params = [{transform_indices = @transform_0, window_bounds = array<i64: 4, 400, 128>}, {pipeline_mode = #tpu.pipeline_mode<synchronous>, transform_indices = @transform_1, window_bounds = array<i64: 128, 128>}, {pipeline_mode = #tpu.pipeline_mode<synchronous>, transform_indices = @transform_2, window_bounds = array<i64: 1, 128>}, {transform_indices = @transform_3, window_bounds = array<i64: 400, 128>}]} {
    %c0 = arith.constant 0 : index
    %c0_0 = arith.constant 0 : index
    %c0_1 = arith.constant 0 : index
    %0 = vector.load %arg1[%c0, %c0_0, %c0_1] : memref<4x400x128xbf16, #tpu.memory_space<vmem>>, vector<4x400x128xbf16>
    %1 = vector.shape_cast %0 : vector<4x400x128xbf16> to vector<1600x128xbf16>
    %c0_2 = arith.constant 0 : index
    %c0_3 = arith.constant 0 : index
    %2 = vector.load %arg2[%c0_2, %c0_3] : memref<128x128xbf16, #tpu.memory_space<vmem>>, vector<128x128xbf16>
    %cst = arith.constant dense<0.000000e+00> : vector<1600x128xf32>
    %3 = tpu.matmul %1, %2, %cst {dimension_numbers = #tpu.dot_dimension_numbers<[1], [0], [0], [1], [0, 0, 1, 1], [], []>} : vector<1600x128xbf16>, vector<128x128xbf16>, vector<1600x128xf32> -> vector<1600x128xf32>
    %c0_4 = arith.constant 0 : index
    %c0_5 = arith.constant 0 : index
    %4 = vector.load %arg3[%c0_4, %c0_5] : memref<1x128xf32, #tpu.memory_space<vmem>>, vector<1x128xf32>
    %5 = vector.broadcast %4 : vector<1x128xf32> to vector<1600x128xf32>
    %6 = arith.addf %3, %5 : vector<1600x128xf32>
    %cst_6 = arith.constant 5.000000e-01 : f32
    %7 = vector.broadcast %cst_6 : f32 to vector<1600x128xf32>
    %8 = arith.mulf %7, %6 : vector<1600x128xf32>
    %9 = math.tanh %8 : vector<1600x128xf32>
    %cst_7 = arith.constant 5.000000e-01 : f32
    %10 = vector.broadcast %cst_7 : f32 to vector<1600x128xf32>
    %11 = arith.mulf %10, %9 : vector<1600x128xf32>
    %cst_8 = arith.constant 5.000000e-01 : f32
    %12 = vector.broadcast %cst_8 : f32 to vector<1600x128xf32>
    %13 = arith.addf %11, %12 : vector<1600x128xf32>
    %14 = vector.extract_strided_slice %13 {offsets = [0, 0], sizes = [400, 128], strides = [1, 1]} : vector<1600x128xf32> to vector<400x128xf32>
    %15 = vector.extract_strided_slice %13 {offsets = [400, 0], sizes = [400, 128], strides = [1, 1]} : vector<1600x128xf32> to vector<400x128xf32>
    %16 = arith.addf %14, %15 : vector<400x128xf32>
    %17 = vector.extract_strided_slice %13 {offsets = [800, 0], sizes = [400, 128], strides = [1, 1]} : vector<1600x128xf32> to vector<400x128xf32>
    %18 = arith.addf %16, %17 : vector<400x128xf32>
    %19 = vector.extract_strided_slice %13 {offsets = [1200, 0], sizes = [400, 128], strides = [1, 1]} : vector<1600x128xf32> to vector<400x128xf32>
    %20 = arith.addf %18, %19 : vector<400x128xf32>
    %cst_9 = arith.constant 2.500000e-01 : f32
    %21 = vector.broadcast %cst_9 : f32 to vector<400x128xf32>
    %22 = arith.mulf %21, %20 : vector<400x128xf32>
    %23 = arith.truncf %22 : vector<400x128xf32> to vector<400x128xbf16>
    %c0_10 = arith.constant 0 : index
    %c0_11 = arith.constant 0 : index
    %24 = vector.load %arg4[%c0_10, %c0_11] : memref<400x128xbf16, #tpu.memory_space<vmem>>, vector<400x128xbf16>
    tpu.vector_store %arg4[%c0_10, %c0_11], %23 {strides = array<i32>} : memref<400x128xbf16, #tpu.memory_space<vmem>>, vector<400x128xbf16>,
    return
  }
  func.func @transform_0(%arg0: i32) -> (i32, i32, i32) {
    %c0_i32 = arith.constant 0 : i32
    %c0_i32_0 = arith.constant 0 : i32
    %c0_i32_1 = arith.constant 0 : i32
    return %c0_i32, %arg0, %c0_i32_0 : i32, i32, i32
  }
  func.func @transform_1(%arg0: i32) -> (i32, i32) {
    %c0_i32 = arith.constant 0 : i32
    %c0_i32_0 = arith.constant 0 : i32
    %c0_i32_1 = arith.constant 0 : i32
    return %c0_i32, %c0_i32_0 : i32, i32
  }
  func.func @transform_2(%arg0: i32) -> (i32, i32) {
    %c0_i32 = arith.constant 0 : i32
    %c0_i32_0 = arith.constant 0 : i32
    %c0_i32_1 = arith.constant 0 : i32
    return %c0_i32, %c0_i32_0 : i32, i32
  }
  func.func @transform_3(%arg0: i32) -> (i32, i32) {
    %c0_i32 = arith.constant 0 : i32
    %c0_i32_0 = arith.constant 0 : i32
    return %arg0, %c0_i32 : i32, i32
  }
}

module attributes {stable_mosaic.version = 11 : i64} {
  func.func @_conv_sig_pool_kernel(%arg0: i32, %arg1: memref<4x64x256xbf16, #tpu.memory_space<vmem>>, %arg2: memref<256x128xbf16, #tpu.memory_space<vmem>>, %arg3: memref<1x128xf32, #tpu.memory_space<vmem>>, %arg4: memref<64x128xbf16, #tpu.memory_space<vmem>>) attributes {dimension_semantics = [#tpu.dimension_semantics<parallel>], iteration_bounds = array<i64: 1>, scalar_prefetch = 0 : i64, scratch_operands = 0 : i64, tpu.core_type = #tpu.core_type<tc>, window_params = [{transform_indices = @transform_0, window_bounds = array<i64: 4, 64, 256>}, {pipeline_mode = #tpu.pipeline_mode<synchronous>, transform_indices = @transform_1, window_bounds = array<i64: 256, 128>}, {pipeline_mode = #tpu.pipeline_mode<synchronous>, transform_indices = @transform_2, window_bounds = array<i64: 1, 128>}, {transform_indices = @transform_3, window_bounds = array<i64: 64, 128>}]} {
    %c0 = arith.constant 0 : index
    %c0_0 = arith.constant 0 : index
    %c0_1 = arith.constant 0 : index
    %0 = vector.load %arg1[%c0, %c0_0, %c0_1] : memref<4x64x256xbf16, #tpu.memory_space<vmem>>, vector<4x64x256xbf16>
    %1 = vector.shape_cast %0 : vector<4x64x256xbf16> to vector<256x256xbf16>
    %c0_2 = arith.constant 0 : index
    %c0_3 = arith.constant 0 : index
    %2 = vector.load %arg2[%c0_2, %c0_3] : memref<256x128xbf16, #tpu.memory_space<vmem>>, vector<256x128xbf16>
    %cst = arith.constant dense<0.000000e+00> : vector<256x128xf32>
    %3 = tpu.matmul %1, %2, %cst {dimension_numbers = #tpu.dot_dimension_numbers<[1], [0], [0], [1], [0, 0, 1, 1], [], []>} : vector<256x256xbf16>, vector<256x128xbf16>, vector<256x128xf32> -> vector<256x128xf32>
    %c0_4 = arith.constant 0 : index
    %c0_5 = arith.constant 0 : index
    %4 = vector.load %arg3[%c0_4, %c0_5] : memref<1x128xf32, #tpu.memory_space<vmem>>, vector<1x128xf32>
    %5 = vector.broadcast %4 : vector<1x128xf32> to vector<256x128xf32>
    %6 = arith.addf %3, %5 : vector<256x128xf32>
    %cst_6 = arith.constant 5.000000e-01 : f32
    %7 = vector.broadcast %cst_6 : f32 to vector<256x128xf32>
    %8 = arith.mulf %7, %6 : vector<256x128xf32>
    %9 = math.tanh %8 : vector<256x128xf32>
    %cst_7 = arith.constant 5.000000e-01 : f32
    %10 = vector.broadcast %cst_7 : f32 to vector<256x128xf32>
    %11 = arith.mulf %10, %9 : vector<256x128xf32>
    %cst_8 = arith.constant 5.000000e-01 : f32
    %12 = vector.broadcast %cst_8 : f32 to vector<256x128xf32>
    %13 = arith.addf %11, %12 : vector<256x128xf32>
    %14 = vector.extract_strided_slice %13 {offsets = [0, 0], sizes = [64, 128], strides = [1, 1]} : vector<256x128xf32> to vector<64x128xf32>
    %15 = vector.extract_strided_slice %13 {offsets = [64, 0], sizes = [64, 128], strides = [1, 1]} : vector<256x128xf32> to vector<64x128xf32>
    %16 = arith.addf %14, %15 : vector<64x128xf32>
    %17 = vector.extract_strided_slice %13 {offsets = [128, 0], sizes = [64, 128], strides = [1, 1]} : vector<256x128xf32> to vector<64x128xf32>
    %18 = arith.addf %16, %17 : vector<64x128xf32>
    %19 = vector.extract_strided_slice %13 {offsets = [192, 0], sizes = [64, 128], strides = [1, 1]} : vector<256x128xf32> to vector<64x128xf32>
    %20 = arith.addf %18, %19 : vector<64x128xf32>
    %cst_9 = arith.constant 2.500000e-01 : f32
    %21 = vector.broadcast %cst_9 : f32 to vector<64x128xf32>
    %22 = arith.mulf %21, %20 : vector<64x128xf32>
    %23 = arith.truncf %22 : vector<64x128xf32> to vector<64x128xbf16>
    %c0_10 = arith.constant 0 : index
    %c0_11 = arith.constant 0 : index
    %24 = vector.load %arg4[%c0_10, %c0_11] : memref<64x128xbf16, #tpu.memory_space<vmem>>, vector<64x128xbf16>
    tpu.vector_store %arg4[%c0_10, %c0_11], %23 {strides = array<i32>} : memref<64x128xbf16, #tpu.memory_space<vmem>>, vector<64x128xbf16>,
    return
  }
  func.func @transform_0(%arg0: i32) -> (i32, i32, i32) {
    %c0_i32 = arith.constant 0 : i32
    %c0_i32_0 = arith.constant 0 : i32
    %c0_i32_1 = arith.constant 0 : i32
    return %c0_i32, %arg0, %c0_i32_0 : i32, i32, i32
  }
  func.func @transform_1(%arg0: i32) -> (i32, i32) {
    %c0_i32 = arith.constant 0 : i32
    %c0_i32_0 = arith.constant 0 : i32
    %c0_i32_1 = arith.constant 0 : i32
    return %c0_i32, %c0_i32_0 : i32, i32
  }
  func.func @transform_2(%arg0: i32) -> (i32, i32) {
    %c0_i32 = arith.constant 0 : i32
    %c0_i32_0 = arith.constant 0 : i32
    %c0_i32_1 = arith.constant 0 : i32
    return %c0_i32, %c0_i32_0 : i32, i32
  }
  func.func @transform_3(%arg0: i32) -> (i32, i32) {
    %c0_i32 = arith.constant 0 : i32
    %c0_i32_0 = arith.constant 0 : i32
    return %arg0, %c0_i32 : i32, i32
  }
}

module attributes {stable_mosaic.version = 11 : i64} {
  func.func @_linear_kernel(%arg0: i32, %arg1: memref<16x512xbf16, #tpu.memory_space<vmem>>, %arg2: memref<512x128xbf16, #tpu.memory_space<vmem>>, %arg3: memref<1x128xf32, #tpu.memory_space<vmem>>, %arg4: memref<16x128xf32, #tpu.memory_space<vmem>>) attributes {dimension_semantics = [#tpu.dimension_semantics<parallel>], iteration_bounds = array<i64: 1>, scalar_prefetch = 0 : i64, scratch_operands = 0 : i64, tpu.core_type = #tpu.core_type<tc>, window_params = [{transform_indices = @transform_0, window_bounds = array<i64: 16, 512>}, {pipeline_mode = #tpu.pipeline_mode<synchronous>, transform_indices = @transform_1, window_bounds = array<i64: 512, 128>}, {pipeline_mode = #tpu.pipeline_mode<synchronous>, transform_indices = @transform_2, window_bounds = array<i64: 1, 128>}, {transform_indices = @transform_3, window_bounds = array<i64: 16, 128>}]} {
    %c0 = arith.constant 0 : index
    %c0_0 = arith.constant 0 : index
    %0 = vector.load %arg1[%c0, %c0_0] : memref<16x512xbf16, #tpu.memory_space<vmem>>, vector<16x512xbf16>
    %c0_1 = arith.constant 0 : index
    %c0_2 = arith.constant 0 : index
    %1 = vector.load %arg2[%c0_1, %c0_2] : memref<512x128xbf16, #tpu.memory_space<vmem>>, vector<512x128xbf16>
    %cst = arith.constant dense<0.000000e+00> : vector<16x128xf32>
    %2 = tpu.matmul %0, %1, %cst {dimension_numbers = #tpu.dot_dimension_numbers<[1], [0], [0], [1], [0, 0, 1, 1], [], []>} : vector<16x512xbf16>, vector<512x128xbf16>, vector<16x128xf32> -> vector<16x128xf32>
    %c0_3 = arith.constant 0 : index
    %c0_4 = arith.constant 0 : index
    %3 = vector.load %arg3[%c0_3, %c0_4] : memref<1x128xf32, #tpu.memory_space<vmem>>, vector<1x128xf32>
    %4 = vector.broadcast %3 : vector<1x128xf32> to vector<16x128xf32>
    %5 = arith.addf %2, %4 : vector<16x128xf32>
    %c0_5 = arith.constant 0 : index
    %c0_6 = arith.constant 0 : index
    %6 = vector.load %arg4[%c0_5, %c0_6] : memref<16x128xf32, #tpu.memory_space<vmem>>, vector<16x128xf32>
    tpu.vector_store %arg4[%c0_5, %c0_6], %5 {strides = array<i32>} : memref<16x128xf32, #tpu.memory_space<vmem>>, vector<16x128xf32>,
    return
  }
  func.func @transform_0(%arg0: i32) -> (i32, i32) {
    %c0_i32 = arith.constant 0 : i32
    %c0_i32_0 = arith.constant 0 : i32
    return %arg0, %c0_i32 : i32, i32
  }
  func.func @transform_1(%arg0: i32) -> (i32, i32) {
    %c0_i32 = arith.constant 0 : i32
    %c0_i32_0 = arith.constant 0 : i32
    %c0_i32_1 = arith.constant 0 : i32
    return %c0_i32, %c0_i32_0 : i32, i32
  }
  func.func @transform_2(%arg0: i32) -> (i32, i32) {
    %c0_i32 = arith.constant 0 : i32
    %c0_i32_0 = arith.constant 0 : i32
    %c0_i32_1 = arith.constant 0 : i32
    return %c0_i32, %c0_i32_0 : i32, i32
  }
  func.func @transform_3(%arg0: i32) -> (i32, i32) {
    %c0_i32 = arith.constant 0 : i32
    %c0_i32_0 = arith.constant 0 : i32
    return %arg0, %c0_i32 : i32, i32
  }
}

</mosaic_0001>

<bundles_post_ra>
// kernel: lenet_forward.3
= control target key start
LH: loop header
LB: loop body
LE: loop exit
PB: predicated region body
PF: predicated region fallthrough
CT: control target
= control target key end

     0   :  { %s5599_s1 = inlined_call_operand.vmem [shape: bf16[128,128], index: 1, kind: input, shape index: {}]   ;;  %s5600_s0 = inlined_call_operand.vmem [shape: bf16[4,400,128], index: 0, kind: input, shape index: {}]   ;;  %s5601_s2 = inlined_call_operand.vmem [shape: f32[1,128], index: 2, kind: input, shape index: {}]   ;;  %s5602_s3 = inlined_call_operand.vmem [shape: bf16[400,128], index: 3, kind: output, shape index: {}]  }
   0x1   :  { %v3671_v0 = vld [vmem:[%s5599_s1] sm:$0xff]   ;;  %v3672_v1 = vld [vmem:[%s5599_s1 + $0x8] sm:$0xff]   ;;  %v3673_v2 = vld [vmem:[%s5599_s1 + $0x10] sm:$0xff]  }
   0x2   :  { %3439 = vmatprep.subr.bf16.mxu0 %v3671_v0  ;;  %3655 = vmatprep.subr.bf16.mxu1 %v3671_v0  ;;  %v3674_v3 = vld [vmem:[%s5599_s1 + $0x18] sm:$0xff]   ;;  %v3679_v4 = vld [vmem:[%s5600_s0] sm:$0xff]   ;;  %v3681_v5 = vld [vmem:[%s5600_s0 + $0x190] sm:$0xff]  }
   0x3   :  { %3440 = vmatpush3.bf16.msra.mxu0 %v3671_v0  ;;  %3663 = vmatpush3.bf16.msra.mxu1 %v3671_v0  ;;  %v3675_v6 = vld [vmem:[%s5599_s1 + $0x20] sm:$0xff]   ;;  %v3676_v7 = vld [vmem:[%s5599_s1 + $0x28] sm:$0xff]   ;;  %v3677_v8 = vld [vmem:[%s5599_s1 + $0x30] sm:$0xff]  }
   0x4   :  { %3441 = vmatprep.subr.bf16.mxu0 %v3672_v1  ;;  %3656 = vmatprep.subr.bf16.mxu1 %v3672_v1  ;;  %v3678_v9 = vld [vmem:[%s5599_s1 + $0x38] sm:$0xff]   ;;  %v3680_v10 = vld [vmem:[%s5600_s0 + $0x8] sm:$0xff]   ;;  %v3683_v12 = vld [vmem:[%s5600_s0 + $0x10] sm:$0xff]  }
   0x5   :  { %3455 = vmatprep.mubr.bf16.mxu0 %v3679_v4  ;;  %3555 = vmatprep.mubr.bf16.mxu1 %v3681_v5  ;;  %v3682_v11 = vld [vmem:[%s5600_s0 + $0x198] sm:$0xff]   ;;  %v3685_v13 = vld [vmem:[%s5600_s0 + $0x1a0] sm:$0xff]   ;;  %v3686_v15 = vld [vmem:[%s5600_s0 + $0x1a8] sm:$0xff]  }
   0x6   :  { %v3684_v14 = vld [vmem:[%s5600_s0 + $0x18] sm:$0xff]   ;;  %v3687_v16 = vld [vmem:[%s5600_s0 + $0x20] sm:$0xff]   ;;  %v3689_v17 = vld [vmem:[%s5600_s0 + $0x1b0] sm:$0xff]  }
   0x7   :  { %3442 = vmatpush3.bf16.msra.mxu0 %v3672_v1  ;;  %3664 = vmatpush3.bf16.msra.mxu1 %v3672_v1  ;;  %v3688_v18 = vld [vmem:[%s5600_s0 + $0x28] sm:$0xff]   ;;  %v3690_v19 = vld [vmem:[%s5600_s0 + $0x1b8] sm:$0xff]   ;;  %v3691_v20 = vld [vmem:[%s5600_s0 + $0x30] sm:$0xff]  }
   0x8   :  { %3443 = vmatprep.subr.bf16.mxu0 %v3673_v2  ;;  %3657 = vmatprep.subr.bf16.mxu1 %v3673_v2  ;;  %v3693_v21 = vld [vmem:[%s5600_s0 + $0x1c0] sm:$0xff]   ;;  %v3692_v22 = vld [vmem:[%s5600_s0 + $0x38] sm:$0xff]   ;;  %v3694_v23 = vld [vmem:[%s5600_s0 + $0x1c8] sm:$0xff]  }
   0x9   :  { %v3695_v24 = vld [vmem:[%s5600_s0 + $0x40] sm:$0xff]   ;;  %v3697_v25 = vld [vmem:[%s5600_s0 + $0x1d0] sm:$0xff]   ;;  %v3696_v26 = vld [vmem:[%s5600_s0 + $0x48] sm:$0xff]  }
   0xa   :  { %v3698_v27 = vld [vmem:[%s5600_s0 + $0x1d8] sm:$0xff]   ;;  %v3699_v28 = vld [vmem:[%s5600_s0 + $0x50] sm:$0xff]   ;;  %v3701_v29 = vld [vmem:[%s5600_s0 + $0x1e0] sm:$0xff]  }
   0xb   :  { %3444 = vmatpush3.bf16.msra.mxu0 %v3673_v2  ;;  %3665 = vmatpush3.bf16.msra.mxu1 %v3673_v2  ;;  %v3700_v30 = vld [vmem:[%s5600_s0 + $0x58] sm:$0xff]   ;;  %v3702_v31 = vld [vmem:[%s5600_s0 + $0x1e8] sm:$0xff]   ;;  %v3703_v32 = vld [vmem:[%s5600_s0 + $0x60] sm:$0xff]  }
   0xc   :  { %3445 = vmatprep.subr.bf16.mxu0 %v3674_v3  ;;  %3658 = vmatprep.subr.bf16.mxu1 %v3674_v3  ;;  %v3705_v33 = vld [vmem:[%s5600_s0 + $0x1f0] sm:$0xff]   ;;  %v3704_v34 = vld [vmem:[%s5600_s0 + $0x68] sm:$0xff]   ;;  %v3706_v35 = vld [vmem:[%s5600_s0 + $0x1f8] sm:$0xff]  }
   0xd   :  { %v3707_v36 = vld [vmem:[%s5600_s0 + $0x70] sm:$0xff]   ;;  %v3709_v37 = vld [vmem:[%s5600_s0 + $0x200] sm:$0xff]   ;;  %v3708_v38 = vld [vmem:[%s5600_s0 + $0x78] sm:$0xff]  }
   0xe   :  { %v3710_v39 = vld [vmem:[%s5600_s0 + $0x208] sm:$0xff]   ;;  %v3711_v40 = vld [vmem:[%s5600_s0 + $0x80] sm:$0xff]   ;;  %v3713_v41 = vld [vmem:[%s5600_s0 + $0x210] sm:$0xff]  }
   0xf   :  { %3446 = vmatpush3.bf16.msra.mxu0 %v3674_v3  ;;  %3666 = vmatpush3.bf16.msra.mxu1 %v3674_v3  ;;  %v3712_v42 = vld [vmem:[%s5600_s0 + $0x88] sm:$0xff]   ;;  %v3714_v43 = vld [vmem:[%s5600_s0 + $0x218] sm:$0xff]   ;;  %v3715_v44 = vld [vmem:[%s5600_s0 + $0x90] sm:$0xff]  }
  0x10   :  { %3447 = vmatprep.subr.bf16.mxu0 %v3675_v6  ;;  %3659 = vmatprep.subr.bf16.mxu1 %v3675_v6  ;;  %v3717_v45 = vld [vmem:[%s5600_s0 + $0x220] sm:$0xff]   ;;  %v3716_v46 = vld [vmem:[%s5600_s0 + $0x98] sm:$0xff]   ;;  %v3718_v47 = vld [vmem:[%s5600_s0 + $0x228] sm:$0xff]  }
  0x11   :  { %v3719_v48 = vld [vmem:[%s5600_s0 + $0xa0] sm:$0xff]   ;;  %v3721_v49 = vld [vmem:[%s5600_s0 + $0x230] sm:$0xff]   ;;  %v3720_v50 = vld [vmem:[%s5600_s0 + $0xa8] sm:$0xff]  }
  0x12   :  { %v3722_v51 = vld [vmem:[%s5600_s0 + $0x238] sm:$0xff]   ;;  %v3723_v52 = vld [vmem:[%s5600_s0 + $0xb0] sm:$0xff]   ;;  %v3725_v53 = vld [vmem:[%s5600_s0 + $0x240] sm:$0xff]  }
  0x13   :  { %3448 = vmatpush3.bf16.msra.mxu0 %v3675_v6  ;;  %3667 = vmatpush3.bf16.msra.mxu1 %v3675_v6  ;;  %v3724_v54 = vld [vmem:[%s5600_s0 + $0xb8] sm:$0xff]   ;;  %v3726_v55 = vld [vmem:[%s5600_s0 + $0x248] sm:$0xff]   ;;  %v3727_v56 = vld [vmem:[%s5600_s0 + $0xc0] sm:$0xff]  }
  0x14   :  { %3449 = vmatprep.subr.bf16.mxu0 %v3676_v7  ;;  %3660 = vmatprep.subr.bf16.mxu1 %v3676_v7  ;;  %v3729_v57 = vld [vmem:[%s5600_s0 + $0x250] sm:$0xff]   ;;  %v3728_v58 = vld [vmem:[%s5600_s0 + $0xc8] sm:$0xff]   ;;  %v3730_v59 = vld [vmem:[%s5600_s0 + $0x258] sm:$0xff]  }
  0x15   :  { %v3731_v60 = vld [vmem:[%s5600_s0 + $0xd0] sm:$0xff]   ;;  %v3733_v61 = vld [vmem:[%s5600_s0 + $0x260] sm:$0xff]   ;;  %v3732_v62 = vld [vmem:[%s5600_s0 + $0xd8] sm:$0xff]  }
  0x16   :  { %v3734_v63 = vld [vmem:[%s5600_s0 + $0x268] sm:$0xff]   ;;  %v3735_v0 = vld [vmem:[%s5600_s0 + $0xe0] sm:$0xff]   ;;  %v3737_v1 = vld [vmem:[%s5600_s0 + $0x270] sm:$0xff]  }
  0x17   :  { %3450 = vmatpush3.bf16.msra.mxu0 %v3676_v7  ;;  %3668 = vmatpush3.bf16.msra.mxu1 %v3676_v7  ;;  %v3736_v2 = vld [vmem:[%s5600_s0 + $0xe8] sm:$0xff]   ;;  %v3738_v3 = vld [vmem:[%s5600_s0 + $0x278] sm:$0xff]   ;;  %v3739_v4 = vld [vmem:[%s5600_s0 + $0xf0] sm:$0xff]  }
  0x18   :  { %3451 = vmatprep.subr.bf16.mxu0 %v3677_v8  ;;  %3661 = vmatprep.subr.bf16.mxu1 %v3677_v8  ;;  %v3741_v5 = vld [vmem:[%s5600_s0 + $0x280] sm:$0xff]   ;;  %v3740_v6 = vld [vmem:[%s5600_s0 + $0xf8] sm:$0xff]   ;;  %v3742_v7 = vld [vmem:[%s5600_s0 + $0x288] sm:$0xff]  }
  0x1b   :  { %3452 = vmatpush3.bf16.msra.mxu0 %v3677_v8  ;;  %3669 = vmatpush3.bf16.msra.mxu1 %v3677_v8  ;;  %v3743_v8 = vld [vmem:[%s5600_s0 + $0x100] sm:$0xff]  }
  0x1c   :  { %3453 = vmatprep.subr.bf16.mxu0 %v3678_v9  ;;  %3662 = vmatprep.subr.bf16.mxu1 %v3678_v9 }
  0x1f   :  { %3454 = vmatpush3.bf16.msra.mxu0 %v3678_v9  ;;  %3670 = vmatpush3.bf16.msra.mxu1 %v3678_v9  ;;  %v3745_v9 = vld [vmem:[%s5600_s0 + $0x290] sm:$0xff]  }
  0x22   :  { %3456 = vmatmul.mubr.bf16.vlgmr.msra.gmra.mrb[0].mxu0 %v3680_v10  ;;  %3556 = vmatmul.mubr.bf16.vlgmr.msra.gmra.mrb[0].mxu1 %v3682_v11  ;;  %v3744_v10 = vld [vmem:[%s5600_s0 + $0x108] sm:$0xff]   ;;  %v3746_v11 = vld [vmem:[%s5600_s0 + $0x298] sm:$0xff]  }
  0x23   :  { %3459 = vmatprep.mubr.bf16.mxu0 %v3683_v12  ;;  %3559 = vmatprep.mubr.bf16.mxu1 %v3685_v13  ;;  %v3747_v12 = vld [vmem:[%s5600_s0 + $0x110] sm:$0xff]   ;;  %v3749_v13 = vld [vmem:[%s5600_s0 + $0x2a0] sm:$0xff]  }
  0x2a   :  { %3460 = vmatmul.mubr.bf16.gmra.mrb[4].mxu0 %v3684_v14  ;;  %3560 = vmatmul.mubr.bf16.gmra.mrb[4].mxu1 %v3686_v15  ;;  %v3748_v14 = vld [vmem:[%s5600_s0 + $0x118] sm:$0xff]   ;;  %v3750_v15 = vld [vmem:[%s5600_s0 + $0x2a8] sm:$0xff]  }
  0x2b   :  { %3463 = vmatprep.mubr.bf16.mxu0 %v3687_v16  ;;  %3563 = vmatprep.mubr.bf16.mxu1 %v3689_v17  ;;  %v3751_v16 = vld [vmem:[%s5600_s0 + $0x120] sm:$0xff]   ;;  %v3753_v17 = vld [vmem:[%s5600_s0 + $0x2b0] sm:$0xff]  }
  0x32   :  { %3464 = vmatmul.mubr.bf16.gmra.mrb[8].mxu0 %v3688_v18  ;;  %3564 = vmatmul.mubr.bf16.gmra.mrb[8].mxu1 %v3690_v19  ;;  %v3752_v18 = vld [vmem:[%s5600_s0 + $0x128] sm:$0xff]   ;;  %v3754_v19 = vld [vmem:[%s5600_s0 + $0x2b8] sm:$0xff]  }
  0x33   :  { %3467 = vmatprep.mubr.bf16.mxu0 %v3691_v20  ;;  %3567 = vmatprep.mubr.bf16.mxu1 %v3693_v21  ;;  %v3755_v20 = vld [vmem:[%s5600_s0 + $0x130] sm:$0xff]   ;;  %v3757_v21 = vld [vmem:[%s5600_s0 + $0x2c0] sm:$0xff]  }
  0x3a   :  { %3468 = vmatmul.mubr.bf16.gmra.mrb[12].mxu0 %v3692_v22  ;;  %3568 = vmatmul.mubr.bf16.gmra.mrb[12].mxu1 %v3694_v23  ;;  %v3756_v22 = vld [vmem:[%s5600_s0 + $0x138] sm:$0xff]   ;;  %v3758_v23 = vld [vmem:[%s5600_s0 + $0x2c8] sm:$0xff]  }
  0x3b   :  { %3471 = vmatprep.mubr.bf16.mxu0 %v3695_v24  ;;  %3571 = vmatprep.mubr.bf16.mxu1 %v3697_v25  ;;  %v3759_v24 = vld [vmem:[%s5600_s0 + $0x140] sm:$0xff]   ;;  %v3761_v25 = vld [vmem:[%s5600_s0 + $0x2d0] sm:$0xff]  }
  0x42   :  { %3472 = vmatmul.mubr.bf16.gmra.mrb[16].mxu0 %v3696_v26  ;;  %3572 = vmatmul.mubr.bf16.gmra.mrb[16].mxu1 %v3698_v27  ;;  %v3760_v26 = vld [vmem:[%s5600_s0 + $0x148] sm:$0xff]   ;;  %v3762_v27 = vld [vmem:[%s5600_s0 + $0x2d8] sm:$0xff]  }
  0x43   :  { %3475 = vmatprep.mubr.bf16.mxu0 %v3699_v28  ;;  %3575 = vmatprep.mubr.bf16.mxu1 %v3701_v29  ;;  %v3763_v28 = vld [vmem:[%s5600_s0 + $0x150] sm:$0xff]   ;;  %v3765_v29 = vld [vmem:[%s5600_s0 + $0x2e0] sm:$0xff]  }
  0x4a   :  { %3476 = vmatmul.mubr.bf16.gmra.mrb[20].mxu0 %v3700_v30  ;;  %3576 = vmatmul.mubr.bf16.gmra.mrb[20].mxu1 %v3702_v31  ;;  %v3764_v30 = vld [vmem:[%s5600_s0 + $0x158] sm:$0xff]   ;;  %v3766_v31 = vld [vmem:[%s5600_s0 + $0x2e8] sm:$0xff]  }
  0x4b   :  { %3479 = vmatprep.mubr.bf16.mxu0 %v3703_v32  ;;  %3579 = vmatprep.mubr.bf16.mxu1 %v3705_v33  ;;  %v3767_v32 = vld [vmem:[%s5600_s0 + $0x160] sm:$0xff]   ;;  %v3769_v33 = vld [vmem:[%s5600_s0 + $0x2f0] sm:$0xff]  }
  0x52   :  { %3480 = vmatmul.mubr.bf16.gmra.mrb[24].mxu0 %v3704_v34  ;;  %3580 = vmatmul.mubr.bf16.gmra.mrb[24].mxu1 %v3706_v35  ;;  %v3768_v34 = vld [vmem:[%s5600_s0 + $0x168] sm:$0xff]   ;;  %v3770_v35 = vld [vmem:[%s5600_s0 + $0x2f8] sm:$0xff]  }
  0x53   :  { %3483 = vmatprep.mubr.bf16.mxu0 %v3707_v36  ;;  %3583 = vmatprep.mubr.bf16.mxu1 %v3709_v37  ;;  %v3771_v36 = vld [vmem:[%s5600_s0 + $0x170] sm:$0xff]   ;;  %v3773_v37 = vld [vmem:[%s5600_s0 + $0x300] sm:$0xff]  }
  0x5a   :  { %3484 = vmatmul.mubr.bf16.gmra.mrb[28].mxu0 %v3708_v38  ;;  %3584 = vmatmul.mubr.bf16.gmra.mrb[28].mxu1 %v3710_v39  ;;  %v3772_v38 = vld [vmem:[%s5600_s0 + $0x178] sm:$0xff]   ;;  %v3774_v39 = vld [vmem:[%s5600_s0 + $0x308] sm:$0xff]  }
  0x5b   :  { %3487 = vmatprep.mubr.bf16.mxu0 %v3711_v40  ;;  %3587 = vmatprep.mubr.bf16.mxu1 %v3713_v41  ;;  %v3775_v40 = vld [vmem:[%s5600_s0 + $0x180] sm:$0xff]   ;;  %v3777_v41 = vld [vmem:[%s5600_s0 + $0x310] sm:$0xff]  }
  0x62   :  { %3488 = vmatmul.mubr.bf16.gmra.mrb[32].mxu0 %v3712_v42  ;;  %3588 = vmatmul.mubr.bf16.gmra.mrb[32].mxu1 %v3714_v43  ;;  %v3776_v42 = vld [vmem:[%s5600_s0 + $0x188] sm:$0xff]   ;;  %v3778_v43 = vld [vmem:[%s5600_s0 + $0x318] sm:$0xff]  }
  0x63   :  { %3491 = vmatprep.mubr.bf16.mxu0 %v3715_v44  ;;  %3591 = vmatprep.mubr.bf16.mxu1 %v3717_v45  ;;  %v4529_v44 = vld [vmem:[%s5601_s2] ss:$0 sm:$0xff] }
  0x6a   :  { %3492 = vmatmul.mubr.bf16.gmra.mrb[36].mxu0 %v3716_v46  ;;  %3592 = vmatmul.mubr.bf16.gmra.mrb[36].mxu1 %v3718_v47 }
  0x6b   :  { %3495 = vmatprep.mubr.bf16.mxu0 %v3719_v48  ;;  %3595 = vmatprep.mubr.bf16.mxu1 %v3721_v49 }
  0x72   :  { %3496 = vmatmul.mubr.bf16.gmra.mrb[40].mxu0 %v3720_v50  ;;  %3596 = vmatmul.mubr.bf16.gmra.mrb[40].mxu1 %v3722_v51 }
  0x73   :  { %3499 = vmatprep.mubr.bf16.mxu0 %v3723_v52  ;;  %3599 = vmatprep.mubr.bf16.mxu1 %v3725_v53 }
  0x7a   :  { %3500 = vmatmul.mubr.bf16.gmra.mrb[44].mxu0 %v3724_v54  ;;  %3600 = vmatmul.mubr.bf16.gmra.mrb[44].mxu1 %v3726_v55 }
  0x7b   :  { %3503 = vmatprep.mubr.bf16.mxu0 %v3727_v56  ;;  %3603 = vmatprep.mubr.bf16.mxu1 %v3729_v57 }
  0x82   :  { %3504 = vmatmul.mubr.bf16.gmra.mrb[48].mxu0 %v3728_v58  ;;  %3604 = vmatmul.mubr.bf16.gmra.mrb[48].mxu1 %v3730_v59 }
  0x83   :  { %3507 = vmatprep.mubr.bf16.mxu0 %v3731_v60  ;;  %3607 = vmatprep.mubr.bf16.mxu1 %v3733_v61 }
  0x8a   :  { %3508 = vmatmul.mubr.bf16.gmra.mrb[52].mxu0 %v3732_v62  ;;  %3608 = vmatmul.mubr.bf16.gmra.mrb[52].mxu1 %v3734_v63 }
  0x8b   :  { %3511 = vmatprep.mubr.bf16.mxu0 %v3735_v0  ;;  %3611 = vmatprep.mubr.bf16.mxu1 %v3737_v1 }
  0x92   :  { %3512 = vmatmul.mubr.bf16.gmra.mrb[56].mxu0 %v3736_v2  ;;  %3612 = vmatmul.mubr.bf16.gmra.mrb[56].mxu1 %v3738_v3 }
  0x93   :  { %3515 = vmatprep.mubr.bf16.mxu0 %v3739_v4  ;;  %3615 = vmatprep.mubr.bf16.mxu1 %v3741_v5 }
  0x9a   :  { %3516 = vmatmul.mubr.bf16.gmra.mrb[60].mxu0 %v3740_v6  ;;  %3616 = vmatmul.mubr.bf16.gmra.mrb[60].mxu1 %v3742_v7 }
  0x9b   :  { %3519 = vmatprep.mubr.bf16.mxu0 %v3743_v8  ;;  %3619 = vmatprep.mubr.bf16.mxu1 %v3745_v9 }
  0xa2   :  { %3520 = vmatmul.mubr.bf16.gmra.mrb[64].mxu0 %v3744_v10  ;;  %3620 = vmatmul.mubr.bf16.gmra.mrb[64].mxu1 %v3746_v11 }
  0xa3   :  { %3523 = vmatprep.mubr.bf16.mxu0 %v3747_v12  ;;  %3623 = vmatprep.mubr.bf16.mxu1 %v3749_v13 }
  0xaa   :  { %3524 = vmatmul.mubr.bf16.gmra.mrb[68].mxu0 %v3748_v14  ;;  %3624 = vmatmul.mubr.bf16.gmra.mrb[68].mxu1 %v3750_v15 }
  0xab   :  { %3527 = vmatprep.mubr.bf16.mxu0 %v3751_v16  ;;  %3627 = vmatprep.mubr.bf16.mxu1 %v3753_v17 }
  0xb2   :  { %3528 = vmatmul.mubr.bf16.gmra.mrb[72].mxu0 %v3752_v18  ;;  %3628 = vmatmul.mubr.bf16.gmra.mrb[72].mxu1 %v3754_v19 }
  0xb3   :  { %3531 = vmatprep.mubr.bf16.mxu0 %v3755_v20  ;;  %3631 = vmatprep.mubr.bf16.mxu1 %v3757_v21 }
  0xba   :  { %3532 = vmatmul.mubr.bf16.gmra.mrb[76].mxu0 %v3756_v22  ;;  %3632 = vmatmul.mubr.bf16.gmra.mrb[76].mxu1 %v3758_v23 }
  0xbb   :  { %3535 = vmatprep.mubr.bf16.mxu0 %v3759_v24  ;;  %3635 = vmatprep.mubr.bf16.mxu1 %v3761_v25 }
  0xc2   :  { %3536 = vmatmul.mubr.bf16.gmra.mrb[80].mxu0 %v3760_v26  ;;  %3636 = vmatmul.mubr.bf16.gmra.mrb[80].mxu1 %v3762_v27 }
  0xc3   :  { %3539 = vmatprep.mubr.bf16.mxu0 %v3763_v28  ;;  %3639 = vmatprep.mubr.bf16.mxu1 %v3765_v29 }
  0xca   :  { %3540 = vmatmul.mubr.bf16.gmra.mrb[84].mxu0 %v3764_v30  ;;  %3640 = vmatmul.mubr.bf16.gmra.mrb[84].mxu1 %v3766_v31 }
  0xcb   :  { %3543 = vmatprep.mubr.bf16.mxu0 %v3767_v32  ;;  %3643 = vmatprep.mubr.bf16.mxu1 %v3769_v33 }
  0xd2   :  { %3544 = vmatmul.mubr.bf16.gmra.mrb[88].mxu0 %v3768_v34  ;;  %3644 = vmatmul.mubr.bf16.gmra.mrb[88].mxu1 %v3770_v35 }
  0xd3   :  { %3547 = vmatprep.mubr.bf16.mxu0 %v3771_v36  ;;  %3647 = vmatprep.mubr.bf16.mxu1 %v3773_v37 }
  0xda   :  { %3548 = vmatmul.mubr.bf16.gmra.mrb[92].mxu0 %v3772_v38  ;;  %3648 = vmatmul.mubr.bf16.gmra.mrb[92].mxu1 %v3774_v39 }
  0xdb   :  { %3551 = vmatprep.mubr.bf16.mxu0 %v3775_v40  ;;  %3651 = vmatprep.mubr.bf16.mxu1 %v3777_v41 }
  0xe2   :  { %3552 = vmatmul.mubr.bf16.gmra.mrb[96].mxu0 %v3776_v42  ;;  %3652 = vmatmul.mubr.bf16.gmra.mrb[96].mxu1 %v3778_v43 }
  0xf5   :  { %v3457_v45 = vpop.f32.mrb[0].mxu0  ;;  %v3557_v46 = vpop.f32.mrb[0].mxu1 }
  0xf6   :  { %v929_v47 = vadd.f32 %v3457_v45, %v4529_v44  ;;  %v920_v48 = vpop.f32.mrb[1].mxu0  ;;  %v1329_v49 = vadd.f32 %v3557_v46, %v4529_v44  ;;  %v1320_v50 = vpop.f32.mrb[1].mxu1 }
  0xf7   :  { %v921_v51 = vadd.f32 %v4529_v44, %v920_v48  ;;  %v3458_v52 = vpop.f32.mrb[2].mxu0  ;;  %v1321_v53 = vadd.f32 %v4529_v44, %v1320_v50  ;;  %v3558_v54 = vpop.f32.mrb[2].mxu1 }
  0xf8   :  { %v1721_v55 = vmul.f32 0.5, %v929_v47  ;;  %v1821_v56 = vmul.f32 0.5, %v1329_v49  ;;  %v932_v57 = vadd.f32 %v3458_v52, %v4529_v44  ;;  %v923_v58 = vpop.f32.mrb[3].mxu0  ;;  %v1323_v59 = vpop.f32.mrb[3].mxu1  ;;  %v1332_v62 = vadd.f32 %v3558_v54, %v4529_v44 }
  0xf9   :  { %v1719_v60 = vmul.f32 0.5, %v921_v51  ;;  %v924_v61 = vadd.f32 %v4529_v44, %v923_v58  ;;  %v1819_v0 = vmul.f32 0.5, %v1321_v53  ;;  %v1324_v1 = vadd.f32 %v4529_v44, %v1323_v59 }
  0xfa   :  { %3779 = vtanh.f32 %v1721_v55  ;;  %v1722_v63 = vmul.f32 0.5, %v932_v57  ;;  %v1822_v3 = vmul.f32 0.5, %v1332_v62 }
  0xfb   :  { %3781 = vtanh.f32 %v1719_v60  ;;  %v1720_v2 = vmul.f32 0.5, %v924_v61  ;;  %v1820_v6 = vmul.f32 0.5, %v1324_v1 }
  0xfc   :  { %3783 = vtanh.f32 %v1821_v56 }
  0xfd   :  { %3785 = vtanh.f32 %v1722_v63  ;;  %v3461_v4 = vpop.f32.mrb[4].mxu0  ;;  %v3561_v5 = vpop.f32.mrb[4].mxu1 }
  0xfe   :  { %3787 = vtanh.f32 %v1819_v0  ;;  %v945_v7 = vadd.f32 %v3461_v4, %v4529_v44  ;;  %v936_v8 = vpop.f32.mrb[5].mxu0  ;;  %v1345_v9 = vadd.f32 %v3561_v5, %v4529_v44  ;;  %v1336_v10 = vpop.f32.mrb[5].mxu1 }
  0xff   :  { %3789 = vtanh.f32 %v1720_v2  ;;  %v937_v11 = vadd.f32 %v4529_v44, %v936_v8  ;;  %v3462_v12 = vpop.f32.mrb[6].mxu0  ;;  %v1337_v13 = vadd.f32 %v4529_v44, %v1336_v10  ;;  %v3562_v14 = vpop.f32.mrb[6].mxu1 }
 0x100   :  { %v1725_v15 = vmul.f32 0.5, %v945_v7  ;;  %v948_v16 = vadd.f32 %v3462_v12, %v4529_v44  ;;  %v939_v17 = vpop.f32.mrb[7].mxu0  ;;  %v1339_v18 = vpop.f32.mrb[7].mxu1  ;;  %3791 = vtanh.f32 %v1822_v3  ;;  %v1825_v20 = vmul.f32 0.5, %v1345_v9 }
 0x101   :  { %v1723_v19 = vmul.f32 0.5, %v937_v11  ;;  %3793 = vtanh.f32 %v1820_v6  ;;  %v940_v22 = vadd.f32 %v4529_v44, %v939_v17  ;;  %v1823_v23 = vmul.f32 0.5, %v1337_v13 }
 0x102   :  { %v1726_v21 = vmul.f32 0.5, %v948_v16  ;;  %3795 = vtanh.f32 %v1725_v15  ;;  %v1348_v24 = vadd.f32 %v3562_v14, %v4529_v44  ;;  %v1340_v26 = vadd.f32 %v4529_v44, %v1339_v18 }
 0x103   :  { %3797 = vtanh.f32 %v1723_v19  ;;  %v1724_v31 = vmul.f32 0.5, %v940_v22 }
 0x104   :  { %v3780_v25 = vpop.eup %3779  ;;  %3799 = vtanh.f32 %v1825_v20  ;;  %v1826_v36 = vmul.f32 0.5, %v1348_v24  ;;  %v1824_v42 = vmul.f32 0.5, %v1340_v26 }
 0x105   :  { %v3782_v27 = vpop.eup %3781  ;;  %v3465_v28 = vpop.f32.mrb[8].mxu0  ;;  %3801 = vtanh.f32 %v1726_v21  ;;  %v2121_v47 = vmul.f32 0.5, %v3780_v25 }
 0x106   :  { %v3565_v29 = vpop.f32.mrb[8].mxu1  ;;  %v3784_v30 = vpop.eup %3783  ;;  %v961_v32 = vadd.f32 %v3465_v28, %v4529_v44  ;;  %3803 = vtanh.f32 %v1823_v23  ;;  %v2119_v49 = vmul.f32 0.5, %v3782_v27 }
 0x107   :  { %v952_v33 = vpop.f32.mrb[9].mxu0  ;;  %v1352_v34 = vpop.f32.mrb[9].mxu1  ;;  %v1361_v38 = vadd.f32 %v3565_v29, %v4529_v44  ;;  %v2221_v50 = vmul.f32 0.5, %v3784_v30  ;;  %3805 = vtanh.f32 %v1724_v31  ;;  %v4552_v61 = vadd.f32 0.5, %v2121_v47 }
 0x108   :  { %v3786_v35 = vpop.eup %3785  ;;  %v953_v37 = vadd.f32 %v4529_v44, %v952_v33  ;;  %v3466_v39 = vpop.f32.mrb[10].mxu0  ;;  %v1729_v48 = vmul.f32 0.5, %v961_v32  ;;  %3807 = vtanh.f32 %v1826_v36  ;;  %v1353_v59 = vadd.f32 %v4529_v44, %v1352_v34 }
 0x109   :  { %v3566_v40 = vpop.f32.mrb[10].mxu1  ;;  %v3788_v41 = vpop.eup %3787  ;;  %v2122_v53 = vmul.f32 0.5, %v3786_v35  ;;  %v1829_v54 = vmul.f32 0.5, %v1361_v38  ;;  %v964_v55 = vadd.f32 %v3466_v39, %v4529_v44  ;;  %3809 = vtanh.f32 %v1824_v42 }
 0x10a   :  { %v955_v43 = vpop.f32.mrb[11].mxu0  ;;  %v1355_v45 = vpop.f32.mrb[11].mxu1  ;;  %v1727_v51 = vmul.f32 0.5, %v953_v37  ;;  %v2219_v57 = vmul.f32 0.5, %v3788_v41  ;;  %3811 = vtanh.f32 %v1729_v48  ;;  %v4555_v2 = vadd.f32 0.5, %v2119_v49 }
 0x10b   :  { %v3790_v46 = vpop.eup %3789  ;;  %v956_v62 = vadd.f32 %v4529_v44, %v955_v43  ;;  %v1730_v3 = vmul.f32 0.5, %v964_v55  ;;  %v1364_v4 = vadd.f32 %v3566_v40, %v4529_v44  ;;  %v4558_v8 = vadd.f32 0.5, %v2221_v50 }
 0x10c   :  { %v3792_v52 = vpop.eup %3791  ;;  %v2120_v58 = vmul.f32 0.5, %v3790_v46  ;;  %3813 = vtanh.f32 %v1727_v51  ;;  %v4560_v9 = vadd.f32 0.5, %v2122_v53  ;;  %v1827_v10 = vmul.f32 0.5, %v1353_v59 }
 0x10d   :  { %v3794_v56 = vpop.eup %3793  ;;  %v3469_v63 = vpop.f32.mrb[12].mxu0  ;;  %3815 = vtanh.f32 %v1829_v54  ;;  %v4562_v14 = vadd.f32 0.5, %v2219_v57  ;;  %v2222_v16 = vmul.f32 0.5, %v3792_v52  ;;  %v1728_v17 = vmul.f32 0.5, %v956_v62 }
 0x10e   :  { %v3796_v60 = vpop.eup %3795  ;;  %v3569_v0 = vpop.f32.mrb[12].mxu1  ;;  %v4564_v15 = vadd.f32 0.5, %v2120_v58  ;;  %v2220_v21 = vmul.f32 0.5, %v3794_v56  ;;  %v1830_v23 = vmul.f32 0.5, %v1364_v4  ;;  %v1356_v24 = vadd.f32 %v4529_v44, %v1355_v45 }
 0x10f   :  { %v3798_v1 = vpop.eup %3797  ;;  %v968_v5 = vpop.f32.mrb[13].mxu0  ;;  %v2125_v22 = vmul.f32 0.5, %v3796_v60  ;;  %3817 = vtanh.f32 %v1730_v3  ;;  %v977_v27 = vadd.f32 %v3469_v63, %v4529_v44  ;;  %v1377_v34 = vadd.f32 %v3569_v0, %v4529_v44 }
 0x110   :  { %v1368_v6 = vpop.f32.mrb[13].mxu1  ;;  %v3800_v7 = vpop.eup %3799  ;;  %v2123_v25 = vmul.f32 0.5, %v3798_v1  ;;  %3819 = vtanh.f32 %v1827_v10  ;;  %v1828_v29 = vmul.f32 0.5, %v1356_v24  ;;  %v969_v30 = vadd.f32 %v4529_v44, %v968_v5 }
 0x111   :  { %v3470_v11 = vpop.f32.mrb[14].mxu0  ;;  %v3570_v12 = vpop.f32.mrb[14].mxu1  ;;  %v2225_v26 = vmul.f32 0.5, %v3800_v7  ;;  %3821 = vtanh.f32 %v1728_v17  ;;  %v1733_v33 = vmul.f32 0.5, %v977_v27  ;;  %v4570_v36 = vadd.f32 0.5, %v2222_v16 }
 0x112   :  { %v3802_v13 = vpop.eup %3801  ;;  %v971_v18 = vpop.f32.mrb[15].mxu0  ;;  %v4572_v37 = vadd.f32 0.5, %v2220_v21  ;;  %v4574_v38 = vadd.f32 0.5, %v2125_v22  ;;  %3823 = vtanh.f32 %v1830_v23  ;;  %v4576_v42 = vadd.f32 0.5, %v2123_v25 }
 0x113   :  { %v1371_v19 = vpop.f32.mrb[15].mxu1  ;;  %v3804_v20 = vpop.eup %3803  ;;  %v2126_v28 = vmul.f32 0.5, %v3802_v13  ;;  %v4578_v43 = vadd.f32 0.5, %v2225_v26  ;;  %3825 = vtanh.f32 %v1828_v29  ;;  %v1731_v45 = vmul.f32 0.5, %v969_v30 }
 0x114   :  { %v3806_v31 = vpop.eup %3805  ;;  %v2223_v32 = vmul.f32 0.5, %v3804_v20  ;;  %3827 = vtanh.f32 %v1733_v33  ;;  %v1833_v50 = vmul.f32 0.5, %v1377_v34  ;;  %v980_v51 = vadd.f32 %v3470_v11, %v4529_v44 }
 0x115   :  { %v3808_v35 = vpop.eup %3807  ;;  %v3473_v39 = vpop.f32.mrb[16].mxu0  ;;  %5603 = vst [vmem:[#allocation2_spill] sm:$0xff] %v4578_v43  ;;  %v2124_v49 = vmul.f32 0.5, %v3806_v31  ;;  %v4581_v55 = vadd.f32 0.5, %v2126_v28  ;;  %v1369_v57 = vadd.f32 %v4529_v44, %v1368_v6  ;;  %v972_v58 = vadd.f32 %v4529_v44, %v971_v18 }
 0x116   :  { %v3573_v40 = vpop.f32.mrb[16].mxu1  ;;  %v3810_v41 = vpop.eup %3809  ;;  %v4583_v56 = vadd.f32 0.5, %v2223_v32  ;;  %v2226_v63 = vmul.f32 0.5, %v3808_v35  ;;  %v1734_v0 = vmul.f32 0.5, %v980_v51  ;;  %v1380_v1 = vadd.f32 %v3570_v12, %v4529_v44 }
 0x117   :  { %v984_v46 = vpop.f32.mrb[17].mxu0  ;;  %v1384_v47 = vpop.f32.mrb[17].mxu1  ;;  %5604 = vst [vmem:[#allocation3_spill] sm:$0xff] %v4581_v55  ;;  %v1372_v3 = vadd.f32 %v4529_v44, %v1371_v19  ;;  %3829 = vtanh.f32 %v1731_v45  ;;  %v1831_v4 = vmul.f32 0.5, %v1369_v57  ;;  %v1732_v5 = vmul.f32 0.5, %v972_v58 }
 0x118   :  { %v3812_v48 = vpop.eup %3811  ;;  %v3474_v52 = vpop.f32.mrb[18].mxu0  ;;  %v993_v7 = vadd.f32 %v3473_v39, %v4529_v44  ;;  %v4592_v10 = vadd.f32 0.5, %v2124_v49  ;;  %v2224_v6 = vmul.f32 0.5, %v3810_v41  ;;  %3831 = vtanh.f32 %v1833_v50 }
 0x119   :  { %v3574_v53 = vpop.f32.mrb[18].mxu1  ;;  %v3814_v54 = vpop.eup %3813  ;;  %v1834_v11 = vmul.f32 0.5, %v1380_v1  ;;  %v2129_v16 = vmul.f32 0.5, %v3812_v48  ;;  %3833 = vtanh.f32 %v1734_v0  ;;  %v4594_v21 = vadd.f32 0.5, %v2226_v63 }
 0x11a   :  { %v987_v59 = vpop.f32.mrb[19].mxu0  ;;  %v4587_v60 = vpop.f32.mrb[19].mxu1  ;;  %v2127_v17 = vmul.f32 0.5, %v3814_v54  ;;  %3835 = vtanh.f32 %v1831_v4  ;;  %v1832_v12 = vmul.f32 0.5, %v1372_v3  ;;  %v985_v19 = vadd.f32 %v4529_v44, %v984_v46 }
 0x11b   :  { %v3816_v62 = vpop.eup %3815  ;;  %5605 = vst [vmem:[#allocation4_spill] sm:$0xff] %v4594_v21  ;;  %3837 = vtanh.f32 %v1732_v5  ;;  %v1737_v25 = vmul.f32 0.5, %v993_v7  ;;  %v1393_v26 = vadd.f32 %v3573_v40, %v4529_v44  ;;  %v996_v27 = vadd.f32 %v3474_v52, %v4529_v44 }
 0x11c   :  { %v3818_v13 = vpop.eup %3817  ;;  %v2229_v18 = vmul.f32 0.5, %v3816_v62  ;;  %v4601_v31 = vadd.f32 0.5, %v2224_v6  ;;  %3839 = vtanh.f32 %v1834_v11  ;;  %v1735_v32 = vmul.f32 0.5, %v985_v19 }
 0x11d   :  { %v3820_v20 = vpop.eup %3819  ;;  %v3477_v22 = vpop.f32.mrb[20].mxu0  ;;  %v1385_v33 = vadd.f32 %v4529_v44, %v1384_v47  ;;  %v4606_v41 = vadd.f32 0.5, %v2129_v16  ;;  %v4608_v45 = vadd.f32 0.5, %v2127_v17  ;;  %v1837_v46 = vmul.f32 0.5, %v1393_v26 }
 0x11e   :  { %v3577_v23 = vpop.f32.mrb[20].mxu1  ;;  %v3822_v24 = vpop.eup %3821  ;;  %v4610_v40 = vadd.f32 0.5, %v2229_v18  ;;  %v2130_v51 = vmul.f32 0.5, %v3818_v13  ;;  %3841 = vtanh.f32 %v1832_v12  ;;  %v1738_v52 = vmul.f32 0.5, %v996_v27 }
 0x11f   :  { %v1000_v28 = vpop.f32.mrb[21].mxu0  ;;  %v4599_v29 = vpop.f32.mrb[21].mxu1  ;;  %5606 = vst [vmem:[#allocation5_spill] sm:$0xff] %v4606_v41  ;;  %v988_v47 = vadd.f32 %v4529_v44, %v987_v59  ;;  %v2227_v54 = vmul.f32 0.5, %v3820_v20  ;;  %3843 = vtanh.f32 %v1737_v25  ;;  %v1835_v57 = vmul.f32 0.5, %v1385_v33 }
 0x120   :  { %v3824_v30 = vpop.eup %3823  ;;  %v3478_v34 = vpop.f32.mrb[22].mxu0  ;;  %5607 = vst [vmem:[#allocation6_spill] sm:$0xff] %v4610_v40  ;;  %v1396_v58 = vadd.f32 %v3574_v53, %v4529_v44  ;;  %v2128_v62 = vmul.f32 0.5, %v3822_v24  ;;  %3845 = vtanh.f32 %v1735_v32  ;;  %v1388_v5 = vadd.f32 %v4529_v44, %v4587_v60 }
 0x121   :  { %v4604_v35 = vpop.f32.mrb[22].mxu1  ;;  %v3826_v39 = vpop.eup %3825  ;;  %v2230_v63 = vmul.f32 0.5, %v3824_v30  ;;  %3847 = vtanh.f32 %v1837_v46  ;;  %v1736_v4 = vmul.f32 0.5, %v988_v47  ;;  %v1009_v59 = vadd.f32 %v3477_v22, %v4529_v44 }
 0x122   :  { %v1003_v48 = vpop.f32.mrb[23].mxu0  ;;  %v4612_v49 = vpop.f32.mrb[23].mxu1  ;;  %v2228_v0 = vmul.f32 0.5, %v3826_v39  ;;  %3849 = vtanh.f32 %v1738_v52  ;;  %v1838_v6 = vmul.f32 0.5, %v1396_v58  ;;  %v1001_v11 = vadd.f32 %v4529_v44, %v1000_v28 }
 0x123   :  { %v3828_v50 = vpop.eup %3827  ;;  %v4624_v17 = vadd.f32 0.5, %v2130_v51  ;;  %v4626_v18 = vadd.f32 0.5, %v2227_v54  ;;  %3851 = vtanh.f32 %v1835_v57  ;;  %v1409_v20 = vadd.f32 %v3577_v23, %v4529_v44 }
 0x124   :  { %v3830_v1 = vpop.eup %3829  ;;  %v2133_v3 = vmul.f32 0.5, %v3828_v50  ;;  %v4633_v22 = vadd.f32 0.5, %v2128_v62  ;;  %v4635_v24 = vadd.f32 0.5, %v2230_v63  ;;  %v1836_v25 = vmul.f32 0.5, %v1388_v5 }
 0x125   :  { %v3832_v7 = vpop.eup %3831  ;;  %v4620_v13 = vpop.f32.mrb[24].mxu0  ;;  %5608 = vst [vmem:[#allocation7_spill] sm:$0xff] %v4624_v17  ;;  %5609 = vst [vmem:[#allocation8_spill] sm:$0xff] %v4626_v18  ;;  %v1012_v26 = vadd.f32 %v3478_v34, %v4529_v44  ;;  %v4642_v32 = vadd.f32 0.5, %v2228_v0  ;;  %v2131_v23 = vmul.f32 0.5, %v3830_v1  ;;  %3853 = vtanh.f32 %v1736_v4 }
 0x126   :  { %v4622_v53 = vpop.f32.mrb[24].mxu1  ;;  %v3834_v16 = vpop.eup %3833  ;;  %5610 = vst [vmem:[#allocation9_spill] sm:$0xff] %v4633_v22  ;;  %5611 = vst [vmem:[#allocation10_spill] sm:$0xff] %v4635_v24  ;;  %v1741_v33 = vmul.f32 0.5, %v1009_v59  ;;  %v4648_v51 = vadd.f32 0.5, %v2133_v3  ;;  %v2233_v52 = vmul.f32 0.5, %v3832_v7  ;;  %3855 = vtanh.f32 %v1838_v6 }
 0x127   :  { %v4629_v60 = vpop.f32.mrb[25].mxu0  ;;  %v4631_v12 = vpop.f32.mrb[25].mxu1  ;;  %5612 = vst [vmem:[#allocation11_spill] sm:$0xff] %v4642_v32  ;;  %v1739_v34 = vmul.f32 0.5, %v1001_v11  ;;  %v2134_v47 = vmul.f32 0.5, %v3834_v16  ;;  %v1841_v57 = vmul.f32 0.5, %v1409_v20  ;;  %v1401_v58 = vadd.f32 %v4529_v44, %v4599_v29 }
 0x128   :  { %v3836_v19 = vpop.eup %3835  ;;  %v4638_v27 = vpop.f32.mrb[26].mxu0  ;;  %5613 = vst [vmem:[#allocation12_spill] sm:$0xff] %v4648_v51  ;;  %3857 = vtanh.f32 %v1836_v25  ;;  %v1742_v0 = vmul.f32 0.5, %v1012_v26  ;;  %v1004_v1 = vadd.f32 %v4529_v44, %v1003_v48  ;;  %v4653_v5 = vadd.f32 0.5, %v2131_v23 }
 0x129   :  { %v4640_v28 = vpop.f32.mrb[26].mxu1  ;;  %v3838_v30 = vpop.eup %3837  ;;  %v2231_v54 = vmul.f32 0.5, %v3836_v19  ;;  %3859 = vtanh.f32 %v1741_v33  ;;  %v1839_v7 = vmul.f32 0.5, %v1401_v58  ;;  %v4655_v59 = vadd.f32 0.5, %v2233_v52 }
 0x12a   :  { %v4644_v39 = vpop.f32.mrb[27].mxu0  ;;  %v4646_v46 = vpop.f32.mrb[27].mxu1  ;;  %v2132_v63 = vmul.f32 0.5, %v3838_v30  ;;  %5614 = vst [vmem:[#allocation13_spill] sm:$0xff] %v4653_v5  ;;  %3861 = vtanh.f32 %v1739_v34  ;;  %v1740_v11 = vmul.f32 0.5, %v1004_v1  ;;  %v1412_v29 = vadd.f32 %v4604_v35, %v4529_v44 }
 0x12b   :  { %v3840_v50 = vpop.eup %3839  ;;  %5615 = vst [vmem:[#allocation14_spill] sm:$0xff] %v4655_v59  ;;  %v4663_v48 = vadd.f32 0.5, %v2134_v47  ;;  %v4665_v25 = vadd.f32 0.5, %v2231_v54  ;;  %3863 = vtanh.f32 %v1841_v57  ;;  %v1404_v26 = vadd.f32 %v4529_v44, %v4612_v49 }
 0x12c   :  { %v3842_v62 = vpop.eup %3841  ;;  %v2234_v3 = vmul.f32 0.5, %v3840_v50  ;;  %v4673_v50 = vadd.f32 0.5, %v2132_v63  ;;  %3865 = vtanh.f32 %v1742_v0  ;;  %v1842_v52 = vmul.f32 0.5, %v1412_v29 }
 0x12d   :  { %v3844_v4 = vpop.eup %3843  ;;  %v4659_v16 = vpop.f32.mrb[28].mxu0  ;;  %5616 = vst [vmem:[#allocation15_spill] sm:$0xff] %v4663_v48  ;;  %5617 = vst [vmem:[#allocation16_spill] sm:$0xff] %v4665_v25  ;;  %v2232_v35 = vmul.f32 0.5, %v3842_v62  ;;  %3867 = vtanh.f32 %v1839_v7  ;;  %v1025_v49 = vadd.f32 %v4620_v13, %v4529_v44  ;;  %v1840_v62 = vmul.f32 0.5, %v1404_v26 }
 0x12e   :  { %v3846_v6 = vpop.eup %3845  ;;  %v4661_v20 = vpop.f32.mrb[28].mxu1  ;;  %5618 = vst [vmem:[#allocation17_spill] sm:$0xff] %v4673_v50  ;;  %v4679_v58 = vadd.f32 0.5, %v2234_v3  ;;  %v2137_v57 = vmul.f32 0.5, %v3844_v4  ;;  %3869 = vtanh.f32 %v1740_v11  ;;  %v1017_v0 = vadd.f32 %v4529_v44, %v4629_v60 }
 0x12f   :  { %v3848_v19 = vpop.eup %3847  ;;  %v4669_v30 = vpop.f32.mrb[29].mxu0  ;;  %v2135_v63 = vmul.f32 0.5, %v3846_v6  ;;  %3871 = vtanh.f32 %v1842_v52  ;;  %v1745_v3 = vmul.f32 0.5, %v1025_v49  ;;  %v1425_v4 = vadd.f32 %v4622_v53, %v4529_v44 }
 0x130   :  { %v4671_v23 = vpop.f32.mrb[29].mxu1  ;;  %v3850_v33 = vpop.eup %3849  ;;  %5619 = vst [vmem:[#allocation18_spill] sm:$0xff] %v4679_v58  ;;  %v2237_v59 = vmul.f32 0.5, %v3848_v19  ;;  %v1743_v51 = vmul.f32 0.5, %v1017_v0  ;;  %v1028_v24 = vadd.f32 %v4638_v27, %v4529_v44  ;;  %v4693_v6 = vadd.f32 0.5, %v2232_v35 }
 0x131   :  { %v4675_v34 = vpop.f32.mrb[30].mxu0  ;;  %v4677_v47 = vpop.f32.mrb[30].mxu1  ;;  %v2138_v58 = vmul.f32 0.5, %v3850_v33  ;;  %v4695_v11 = vadd.f32 0.5, %v2137_v57  ;;  %v1845_v26 = vmul.f32 0.5, %v1425_v4  ;;  %v1417_v60 = vadd.f32 %v4529_v44, %v4631_v12 }
 0x132   :  { %v3852_v54 = vpop.eup %3851  ;;  %v4683_v1 = vpop.f32.mrb[31].mxu0  ;;  %5620 = vst [vmem:[#allocation19_spill] sm:$0xff] %v4693_v6  ;;  %v4699_v52 = vadd.f32 0.5, %v2135_v63  ;;  %3873 = vtanh.f32 %v1840_v62  ;;  %v1746_v53 = vmul.f32 0.5, %v1028_v24  ;;  %v4705_v27 = vadd.f32 0.5, %v2237_v59 }
 0x133   :  { %v4685_v48 = vpop.f32.mrb[31].mxu1  ;;  %v3854_v29 = vpop.eup %3853  ;;  %v2235_v13 = vmul.f32 0.5, %v3852_v54  ;;  %5621 = vst [vmem:[#allocation20_spill] sm:$0xff] %v4695_v11  ;;  %3875 = vtanh.f32 %v1745_v3  ;;  %v1843_v57 = vmul.f32 0.5, %v1417_v60  ;;  %v4711_v63 = vadd.f32 0.5, %v2138_v58 }
 0x134   :  { %v3856_v7 = vpop.eup %3855  ;;  %5622 = vst [vmem:[#allocation21_spill] sm:$0xff] %v4699_v52  ;;  %v2136_v49 = vmul.f32 0.5, %v3854_v29  ;;  %5623 = vst [vmem:[#allocation22_spill] sm:$0xff] %v4705_v27  ;;  %3877 = vtanh.f32 %v1743_v51  ;;  %v1020_v24 = vadd.f32 %v4529_v44, %v4644_v39  ;;  %v1428_v60 = vadd.f32 %v4640_v28, %v4529_v44 }
 0x135   :  { %v3858_v19 = vpop.eup %3857  ;;  %v4701_v33 = vpop.f32.mrb[32].mxu0  ;;  %v2238_v35 = vmul.f32 0.5, %v3856_v7  ;;  %5624 = vst [vmem:[#allocation23_spill] sm:$0xff] %v4711_v63  ;;  %v4713_v29 = vadd.f32 0.5, %v2235_v13  ;;  %3879 = vtanh.f32 %v1845_v26  ;;  %v1420_v58 = vadd.f32 %v4529_v44, %v4646_v46 }
 0x136   :  { %v4703_v54 = vpop.f32.mrb[32].mxu1  ;;  %v3860_v0 = vpop.eup %3859  ;;  %v2236_v3 = vmul.f32 0.5, %v3858_v19  ;;  %v4729_v27 = vadd.f32 0.5, %v2136_v49  ;;  %3881 = vtanh.f32 %v1746_v53  ;;  %v1744_v39 = vmul.f32 0.5, %v1020_v24 }
 0x137   :  { %v4707_v4 = vpop.f32.mrb[33].mxu0  ;;  %v4709_v11 = vpop.f32.mrb[33].mxu1  ;;  %5625 = vst [vmem:[#allocation24_spill] sm:$0xff] %v4713_v29  ;;  %v1041_v29 = vadd.f32 %v4659_v16, %v4529_v44  ;;  %v4733_v26 = vadd.f32 0.5, %v2238_v35  ;;  %3883 = vtanh.f32 %v1843_v57  ;;  %v1846_v28 = vmul.f32 0.5, %v1428_v60 }
 0x138   :  { %v3862_v12 = vpop.eup %3861  ;;  %v4717_v62 = vpop.f32.mrb[34].mxu0  ;;  %5626 = vst [vmem:[#allocation25_spill] sm:$0xff] %v4729_v27  ;;  %v1033_v46 = vadd.f32 %v4529_v44, %v4669_v30  ;;  %v2141_v6 = vmul.f32 0.5, %v3860_v0  ;;  %3885 = vtanh.f32 %v1744_v39  ;;  %v1844_v17 = vmul.f32 0.5, %v1420_v58 }
 0x139   :  { %v4719_v59 = vpop.f32.mrb[34].mxu1  ;;  %v3864_v7 = vpop.eup %3863  ;;  %5627 = vst [vmem:[#allocation26_spill] sm:$0xff] %v4733_v26  ;;  %v1441_v49 = vadd.f32 %v4661_v20, %v4529_v44  ;;  %v4739_v24 = vadd.f32 0.5, %v2236_v3  ;;  %v2139_v27 = vmul.f32 0.5, %v3862_v12  ;;  %3887 = vtanh.f32 %v1846_v28 }
 0x13a   :  { %v4725_v63 = vpop.f32.mrb[35].mxu0  ;;  %v4727_v13 = vpop.f32.mrb[35].mxu1  ;;  %v1749_v16 = vmul.f32 0.5, %v1041_v29  ;;  %v2241_v35 = vmul.f32 0.5, %v3864_v7  ;;  %v1747_v57 = vmul.f32 0.5, %v1033_v46  ;;  %v1044_v60 = vadd.f32 %v4675_v34, %v4529_v44 }
 0x13b   :  { %v3866_v51 = vpop.eup %3865  ;;  %5628 = vst [vmem:[#allocation27_spill] sm:$0xff] %v4739_v24  ;;  %v1849_v39 = vmul.f32 0.5, %v1441_v49  ;;  %v1433_v20 = vadd.f32 %v4529_v44, %v4671_v23  ;;  %v1036_v12 = vadd.f32 %v4529_v44, %v4683_v1  ;;  %3889 = vtanh.f32 %v1844_v17 }
 0x13c   :  { %v3868_v19 = vpop.eup %3867  ;;  %v2142_v26 = vmul.f32 0.5, %v3866_v51  ;;  %v1750_v34 = vmul.f32 0.5, %v1044_v60  ;;  %v4759_v49 = vadd.f32 0.5, %v2141_v6  ;;  %v4761_v23 = vadd.f32 0.5, %v2139_v27 }
 0x13d   :  { %v3870_v52 = vpop.eup %3869  ;;  %v4743_v30 = vpop.f32.mrb[36].mxu0  ;;  %v2239_v58 = vmul.f32 0.5, %v3868_v19  ;;  %3891 = vtanh.f32 %v1749_v16  ;;  %v1847_v1 = vmul.f32 0.5, %v1433_v20  ;;  %v1748_v27 = vmul.f32 0.5, %v1036_v12 }
 0x13e   :  { %v3872_v53 = vpop.eup %3871  ;;  %v4745_v0 = vpop.f32.mrb[36].mxu1  ;;  %v2140_v51 = vmul.f32 0.5, %v3870_v52  ;;  %5629 = vst [vmem:[#allocation28_spill] sm:$0xff] %v4759_v49  ;;  %5630 = vst [vmem:[#allocation29_spill] sm:$0xff] %v4761_v23  ;;  %v4767_v52 = vadd.f32 0.5, %v2241_v35  ;;  %v4769_v17 = vadd.f32 0.5, %v2142_v26  ;;  %3893 = vtanh.f32 %v1747_v57 }
 0x13f   :  { %v4751_v3 = vpop.f32.mrb[37].mxu0  ;;  %v4753_v29 = vpop.f32.mrb[37].mxu1  ;;  %v2242_v28 = vmul.f32 0.5, %v3872_v53  ;;  %v1444_v53 = vadd.f32 %v4677_v47, %v4529_v44  ;;  %v4773_v6 = vadd.f32 0.5, %v2239_v58  ;;  %3895 = vtanh.f32 %v1849_v39 }
 0x140   :  { %v3874_v7 = vpop.eup %3873  ;;  %v4755_v46 = vpop.f32.mrb[38].mxu0  ;;  %5631 = vst [vmem:[#allocation30_spill] sm:$0xff] %v4767_v52  ;;  %5632 = vst [vmem:[#allocation31_spill] sm:$0xff] %v4769_v17  ;;  %v1436_v16 = vadd.f32 %v4529_v44, %v4685_v48  ;;  %v4777_v49 = vadd.f32 0.5, %v2140_v51  ;;  %3897 = vtanh.f32 %v1750_v34  ;;  %v1057_v47 = vadd.f32 %v4701_v33, %v4529_v44 }
 0x141   :  { %v4757_v24 = vpop.f32.mrb[38].mxu1  ;;  %v3876_v19 = vpop.eup %3875  ;;  %5633 = vst [vmem:[#allocation32_spill] sm:$0xff] %v4773_v6  ;;  %v4779_v23 = vadd.f32 0.5, %v2242_v28  ;;  %v2240_v35 = vmul.f32 0.5, %v3874_v7  ;;  %3899 = vtanh.f32 %v1847_v1  ;;  %v1850_v57 = vmul.f32 0.5, %v1444_v53 }
 0x142   :  { %v4763_v50 = vpop.f32.mrb[39].mxu0  ;;  %v4765_v40 = vpop.f32.mrb[39].mxu1  ;;  %5634 = vst [vmem:[#allocation33_spill] sm:$0xff] %v4777_v49  ;;  %v1049_v58 = vadd.f32 %v4529_v44, %v4707_v4  ;;  %v2145_v12 = vmul.f32 0.5, %v3876_v19  ;;  %v1457_v51 = vadd.f32 %v4703_v54, %v4529_v44  ;;  %3901 = vtanh.f32 %v1748_v27 }
 0x143   :  { %v3878_v41 = vpop.eup %3877  ;;  %5635 = vst [vmem:[#allocation34_spill] sm:$0xff] %v4779_v23  ;;  %v1848_v53 = vmul.f32 0.5, %v1436_v16  ;;  %v1060_v33 = vadd.f32 %v4717_v62, %v4529_v44  ;;  %v1449_v54 = vadd.f32 %v4529_v44, %v4709_v11  ;;  %3903 = vtanh.f32 %v1850_v57 }
 0x144   :  { %v3880_v60 = vpop.eup %3879  ;;  %v2143_v17 = vmul.f32 0.5, %v3878_v41  ;;  %v4797_v41 = vadd.f32 0.5, %v2240_v35  ;;  %v1751_v16 = vmul.f32 0.5, %v1049_v58  ;;  %v1052_v62 = vadd.f32 %v4529_v44, %v4725_v63 }
 0x145   :  { %v3882_v20 = vpop.eup %3881  ;;  %v2245_v48 = vmul.f32 0.5, %v3880_v60  ;;  %v4787_v28 = vpop.f32.mrb[40].mxu0  ;;  %v1753_v60 = vmul.f32 0.5, %v1057_v47  ;;  %3905 = vtanh.f32 %v1848_v53  ;;  %v1754_v57 = vmul.f32 0.5, %v1060_v33 }
 0x146   :  { %v3884_v26 = vpop.eup %3883  ;;  %v4789_v7 = vpop.f32.mrb[40].mxu1  ;;  %v2146_v1 = vmul.f32 0.5, %v3882_v20  ;;  %5636 = vst [vmem:[#allocation35_spill] sm:$0xff] %v4797_v41  ;;  %v4813_v47 = vadd.f32 0.5, %v2143_v17  ;;  %v1853_v41 = vmul.f32 0.5, %v1457_v51  ;;  %v1851_v21 = vmul.f32 0.5, %v1449_v54 }
 0x147   :  { %v3886_v39 = vpop.eup %3885  ;;  %v4793_v23 = vpop.f32.mrb[41].mxu0  ;;  %v2243_v19 = vmul.f32 0.5, %v3884_v26  ;;  %v4811_v26 = vadd.f32 0.5, %v2145_v12  ;;  %v4815_v5 = vadd.f32 0.5, %v2245_v48  ;;  %3907 = vtanh.f32 %v1753_v60 }
 0x148   :  { %v3888_v34 = vpop.eup %3887  ;;  %v4795_v4 = vpop.f32.mrb[41].mxu1  ;;  %v2144_v27 = vmul.f32 0.5, %v3886_v39  ;;  %5638 = vst [vmem:[#allocation37_spill] sm:$0xff] %v4813_v47  ;;  %v4817_v39 = vadd.f32 0.5, %v2146_v1  ;;  %v1460_v12 = vadd.f32 %v4719_v59, %v4529_v44  ;;  %3909 = vtanh.f32 %v1751_v16 }
 0x149   :  { %v4801_v52 = vpop.f32.mrb[42].mxu0  ;;  %v4803_v49 = vpop.f32.mrb[42].mxu1  ;;  %5637 = vst [vmem:[#allocation36_spill] sm:$0xff] %v4811_v26  ;;  %v2246_v11 = vmul.f32 0.5, %v3888_v34  ;;  %5639 = vst [vmem:[#allocation38_spill] sm:$0xff] %v4815_v5  ;;  %v4819_v63 = vadd.f32 0.5, %v2243_v19  ;;  %v1452_v48 = vadd.f32 %v4529_v44, %v4727_v13  ;;  %3911 = vtanh.f32 %v1853_v41 }
 0x14a   :  { %v4807_v20 = vpop.f32.mrb[43].mxu0  ;;  %v4809_v6 = vpop.f32.mrb[43].mxu1  ;;  %5640 = vst [vmem:[#allocation39_spill] sm:$0xff] %v4817_v39  ;;  %v4823_v17 = vadd.f32 0.5, %v2144_v27  ;;  %v1752_v51 = vmul.f32 0.5, %v1052_v62  ;;  %v1854_v33 = vmul.f32 0.5, %v1460_v12  ;;  %3913 = vtanh.f32 %v1754_v57 }
 0x14b   :  { %v3890_v35 = vpop.eup %3889  ;;  %5641 = vst [vmem:[#allocation40_spill] sm:$0xff] %v4819_v63  ;;  %v4827_v1 = vadd.f32 0.5, %v2246_v11  ;;  %v1852_v27 = vmul.f32 0.5, %v1452_v48  ;;  %v1073_v16 = vadd.f32 %v4743_v30, %v4529_v44  ;;  %3915 = vtanh.f32 %v1851_v21 }
 0x14c   :  { %v3892_v25 = vpop.eup %3891  ;;  %5642 = vst [vmem:[#allocation41_spill] sm:$0xff] %v4823_v17  ;;  %v2244_v53 = vmul.f32 0.5, %v3890_v35  ;;  %v1065_v41 = vadd.f32 %v4529_v44, %v4751_v3  ;;  %v1473_v35 = vadd.f32 %v4745_v0, %v4529_v44  ;;  %3917 = vtanh.f32 %v1752_v51 }
 0x14d   :  { %v3894_v58 = vpop.eup %3893  ;;  %5643 = vst [vmem:[#allocation42_spill] sm:$0xff] %v4827_v1  ;;  %v4829_v19 = vpop.f32.mrb[44].mxu0  ;;  %v2149_v59 = vmul.f32 0.5, %v3892_v25  ;;  %v1757_v30 = vmul.f32 0.5, %v1073_v16  ;;  %3919 = vtanh.f32 %v1854_v33  ;;  %v1076_v3 = vadd.f32 %v4755_v46, %v4529_v44 }
 0x14e   :  { %v3896_v26 = vpop.eup %3895  ;;  %v4831_v60 = vpop.f32.mrb[44].mxu1  ;;  %v2147_v11 = vmul.f32 0.5, %v3894_v58  ;;  %v1755_v58 = vmul.f32 0.5, %v1065_v41  ;;  %3921 = vtanh.f32 %v1852_v27  ;;  %v1857_v17 = vmul.f32 0.5, %v1473_v35 }
 0x14f   :  { %v3898_v34 = vpop.eup %3897  ;;  %v4835_v62 = vpop.f32.mrb[45].mxu0  ;;  %v2249_v48 = vmul.f32 0.5, %v3896_v26  ;;  %v1465_v63 = vadd.f32 %v4529_v44, %v4753_v29  ;;  %v1068_v26 = vadd.f32 %v4529_v44, %v4763_v50  ;;  %v4857_v51 = vadd.f32 0.5, %v2244_v53  ;;  %v4868_v44 = vld [vmem:[%s5601_s2] ss:$0 sm:$0xff] }
 0x150   :  { %v3900_v54 = vpop.eup %3899  ;;  %v4837_v13 = vpop.f32.mrb[45].mxu1  ;;  %v2150_v1 = vmul.f32 0.5, %v3898_v34  ;;  %3923 = vtanh.f32 %v1757_v30  ;;  %v1758_v16 = vmul.f32 0.5, %v1076_v3  ;;  %v4859_v33 = vadd.f32 0.5, %v2149_v59 }
 0x151   :  { %v4843_v12 = vpop.f32.mrb[46].mxu0  ;;  %v4845_v25 = vpop.f32.mrb[46].mxu1  ;;  %v2247_v21 = vmul.f32 0.5, %v3900_v54  ;;  %5644 = vst [vmem:[#allocation43_spill] sm:$0xff] %v4857_v51  ;;  %v4861_v41 = vadd.f32 0.5, %v2147_v11  ;;  %v4863_v46 = vadd.f32 0.5, %v2249_v48  ;;  %3925 = vtanh.f32 %v1755_v58 }
 0x152   :  { %v3902_v57 = vpop.eup %3901  ;;  %v4847_v39 = vpop.f32.mrb[47].mxu0  ;;  %5645 = vst [vmem:[#allocation44_spill] sm:$0xff] %v4859_v33  ;;  %v1855_v27 = vmul.f32 0.5, %v1465_v63  ;;  %v1756_v29 = vmul.f32 0.5, %v1068_v26  ;;  %v1476_v50 = vadd.f32 %v4868_v44, %v4757_v24  ;;  %3927 = vtanh.f32 %v1857_v17 }
 0x153   :  { %v4849_v5 = vpop.f32.mrb[47].mxu1  ;;  %v3904_v0 = vpop.eup %3903  ;;  %v2148_v34 = vmul.f32 0.5, %v3902_v57  ;;  %5646 = vst [vmem:[#allocation45_spill] sm:$0xff] %v4861_v41  ;;  %5647 = vst [vmem:[#allocation46_spill] sm:$0xff] %v4863_v46  ;;  %v4876_v57 = vadd.f32 0.5, %v2150_v1  ;;  %v4878_v63 = vadd.f32 0.5, %v2247_v21  ;;  %v1468_v48 = vadd.f32 %v4868_v44, %v4765_v40 }
 0x154   :  { %v3906_v54 = vpop.eup %3905  ;;  %v2250_v47 = vmul.f32 0.5, %v3904_v0  ;;  %3929 = vtanh.f32 %v1758_v16  ;;  %v1858_v26 = vmul.f32 0.5, %v1476_v50  ;;  %v1089_v40 = vadd.f32 %v4868_v44, %v4787_v28 }
 0x155   :  { %v3908_v35 = vpop.eup %3907  ;;  %v4872_v53 = vpop.f32.mrb[48].mxu0  ;;  %5648 = vst [vmem:[#allocation47_spill] sm:$0xff] %v4876_v57  ;;  %5649 = vst [vmem:[#allocation48_spill] sm:$0xff] %v4878_v63  ;;  %v4886_v0 = vadd.f32 0.5, %v2148_v34  ;;  %v2248_v24 = vmul.f32 0.5, %v3906_v54  ;;  %3931 = vtanh.f32 %v1855_v27  ;;  %v1856_v17 = vmul.f32 0.5, %v1468_v48 }
 0x156   :  { %v4874_v59 = vpop.f32.mrb[48].mxu1  ;;  %v3910_v11 = vpop.eup %3909  ;;  %v2153_v57 = vmul.f32 0.5, %v3908_v35  ;;  %3933 = vtanh.f32 %v1756_v29  ;;  %v1081_v16 = vadd.f32 %v4868_v44, %v4793_v23  ;;  %v1489_v54 = vadd.f32 %v4868_v44, %v4789_v7 }
 0x157   :  { %v4882_v30 = vpop.f32.mrb[49].mxu0  ;;  %v4884_v58 = vpop.f32.mrb[49].mxu1  ;;  %5650 = vst [vmem:[#allocation49_spill] sm:$0xff] %v4886_v0  ;;  %v4898_v0 = vadd.f32 0.5, %v2250_v47  ;;  %v2151_v27 = vmul.f32 0.5, %v3910_v11  ;;  %3935 = vtanh.f32 %v1858_v26  ;;  %v1761_v48 = vmul.f32 0.5, %v1089_v40 }
 0x158   :  { %v3912_v3 = vpop.eup %3911  ;;  %v4888_v46 = vpop.f32.mrb[50].mxu0  ;;  %v4904_v41 = vadd.f32 0.5, %v2248_v24  ;;  %3937 = vtanh.f32 %v1856_v17  ;;  %v1759_v51 = vmul.f32 0.5, %v1081_v16  ;;  %v1092_v47 = vadd.f32 %v4868_v44, %v4801_v52 }
 0x159   :  { %v4890_v1 = vpop.f32.mrb[50].mxu1  ;;  %v3914_v21 = vpop.eup %3913  ;;  %5651 = vst [vmem:[#allocation50_spill] sm:$0xff] %v4898_v0  ;;  %v2253_v50 = vmul.f32 0.5, %v3912_v3  ;;  %v4908_v0 = vadd.f32 0.5, %v2153_v57  ;;  %v1481_v7 = vadd.f32 %v4868_v44, %v4795_v4  ;;  %v1084_v11 = vadd.f32 %v4868_v44, %v4807_v20 }
 0x15a   :  { %v4894_v33 = vpop.f32.mrb[51].mxu0  ;;  %v4896_v63 = vpop.f32.mrb[51].mxu1  ;;  %5652 = vst [vmem:[#allocation51_spill] sm:$0xff] %v4904_v41  ;;  %v2154_v23 = vmul.f32 0.5, %v3914_v21  ;;  %3939 = vtanh.f32 %v1761_v48  ;;  %v1861_v24 = vmul.f32 0.5, %v1489_v54  ;;  %v4918_v52 = vadd.f32 0.5, %v2151_v27 }
 0x15b   :  { %v3916_v34 = vpop.eup %3915  ;;  %5653 = vst [vmem:[#allocation52_spill] sm:$0xff] %v4908_v0  ;;  %v4920_v57 = vadd.f32 0.5, %v2253_v50  ;;  %v1762_v0 = vmul.f32 0.5, %v1092_v47  ;;  %3941 = vtanh.f32 %v1759_v51  ;;  %v1492_v54 = vadd.f32 %v4868_v44, %v4803_v49 }
 0x15c   :  { %v3918_v35 = vpop.eup %3917  ;;  %v2251_v26 = vmul.f32 0.5, %v3916_v34  ;;  %5654 = vst [vmem:[#allocation53_spill] sm:$0xff] %v4918_v52  ;;  %v1859_v34 = vmul.f32 0.5, %v1481_v7  ;;  %v4932_v50 = vadd.f32 0.5, %v2154_v23  ;;  %v1760_v47 = vmul.f32 0.5, %v1084_v11 }
 0x15d   :  { %v3920_v28 = vpop.eup %3919  ;;  %v2152_v40 = vmul.f32 0.5, %v3918_v35  ;;  %v4914_v17 = vpop.f32.mrb[52].mxu0  ;;  %5655 = vst [vmem:[#allocation54_spill] sm:$0xff] %v4920_v57  ;;  %v1484_v57 = vadd.f32 %v4868_v44, %v4809_v6  ;;  %3943 = vtanh.f32 %v1861_v24  ;;  %v1862_v32 = vmul.f32 0.5, %v1492_v54 }
 0x15e   :  { %v3922_v29 = vpop.eup %3921  ;;  %v4916_v16 = vpop.f32.mrb[52].mxu1  ;;  %v2254_v21 = vmul.f32 0.5, %v3920_v28  ;;  %5656 = vst [vmem:[#allocation55_spill] sm:$0xff] %v4932_v50  ;;  %v4940_v7 = vadd.f32 0.5, %v2251_v26  ;;  %3945 = vtanh.f32 %v1762_v0  ;;  %v1105_v11 = vadd.f32 %v4868_v44, %v4829_v19 }
 0x15f   :  { %v3924_v3 = vpop.eup %3923  ;;  %v4922_v41 = vpop.f32.mrb[53].mxu0  ;;  %v2252_v55 = vmul.f32 0.5, %v3922_v29  ;;  %v4942_v49 = vadd.f32 0.5, %v2152_v40  ;;  %v1860_v23 = vmul.f32 0.5, %v1484_v57  ;;  %3947 = vtanh.f32 %v1859_v34 }
 0x160   :  { %v4924_v4 = vpop.f32.mrb[53].mxu1  ;;  %v3926_v20 = vpop.eup %3925  ;;  %v2157_v28 = vmul.f32 0.5, %v3924_v3  ;;  %5657 = vst [vmem:[#allocation56_spill] sm:$0xff] %v4940_v7  ;;  %v4944_v43 = vadd.f32 0.5, %v2254_v21  ;;  %v1097_v26 = vadd.f32 %v4868_v44, %v4835_v62  ;;  %3949 = vtanh.f32 %v1760_v47 }
 0x161   :  { %v4928_v35 = vpop.f32.mrb[54].mxu0  ;;  %v4930_v48 = vpop.f32.mrb[54].mxu1  ;;  %5658 = vst [vmem:[#allocation57_spill] sm:$0xff] %v4942_v49  ;;  %v4948_v3 = vadd.f32 0.5, %v2252_v55  ;;  %v2155_v50 = vmul.f32 0.5, %v3926_v20  ;;  %3951 = vtanh.f32 %v1862_v32  ;;  %v1765_v0 = vmul.f32 0.5, %v1105_v11 }
 0x162   :  { %v3928_v27 = vpop.eup %3927  ;;  %v4936_v52 = vpop.f32.mrb[55].mxu0  ;;  %5659 = vst [vmem:[#allocation58_spill] sm:$0xff] %v4944_v43  ;;  %v4952_v49 = vadd.f32 0.5, %v2157_v28  ;;  %v1763_v57 = vmul.f32 0.5, %v1097_v26  ;;  %v1505_v19 = vadd.f32 %v4868_v44, %v4831_v60  ;;  %3953 = vtanh.f32 %v1860_v23 }
 0x163   :  { %v4938_v29 = vpop.f32.mrb[55].mxu1  ;;  %v3930_v51 = vpop.eup %3929  ;;  %5660 = vst [vmem:[#allocation59_spill] sm:$0xff] %v4948_v3  ;;  %v2257_v24 = vmul.f32 0.5, %v3928_v27  ;;  %v1108_v62 = vadd.f32 %v4868_v44, %v4843_v12  ;;  %v1497_v34 = vadd.f32 %v4868_v44, %v4837_v13  ;;  %v1100_v27 = vadd.f32 %v4868_v44, %v4847_v39 }
 0x164   :  { %v3932_v22 = vpop.eup %3931  ;;  %5661 = vst [vmem:[#allocation60_spill] sm:$0xff] %v4952_v49  ;;  %v2158_v54 = vmul.f32 0.5, %v3930_v51  ;;  %3955 = vtanh.f32 %v1763_v57  ;;  %v4974_v12 = vadd.f32 0.5, %v2155_v50  ;;  %v1500_v50 = vadd.f32 %v4868_v44, %v4849_v5 }
 0x165   :  { %v3934_v6 = vpop.eup %3933  ;;  %v4956_v55 = vpop.f32.mrb[56].mxu0  ;;  %v2255_v60 = vmul.f32 0.5, %v3932_v22  ;;  %v1863_v13 = vmul.f32 0.5, %v1497_v34  ;;  %v1764_v43 = vmul.f32 0.5, %v1100_v27  ;;  %v4980_v18 = vadd.f32 0.5, %v2257_v24 }
 0x166   :  { %v3936_v40 = vpop.eup %3935  ;;  %v4958_v20 = vpop.f32.mrb[56].mxu1  ;;  %v2156_v51 = vmul.f32 0.5, %v3934_v6  ;;  %5662 = vst [vmem:[#allocation61_spill] sm:$0xff] %v4974_v12  ;;  %v4982_v22 = vadd.f32 0.5, %v2158_v54  ;;  %3957 = vtanh.f32 %v1765_v0  ;;  %v1865_v6 = vmul.f32 0.5, %v1505_v19 }
 0x167   :  { %v3938_v21 = vpop.eup %3937  ;;  %v4966_v32 = vpop.f32.mrb[57].mxu0  ;;  %v2258_v11 = vmul.f32 0.5, %v3936_v40  ;;  %5663 = vst [vmem:[#allocation62_spill] sm:$0xff] %v4980_v18  ;;  %v1766_v57 = vmul.f32 0.5, %v1108_v62  ;;  %3959 = vtanh.f32 %v1863_v13  ;;  %v4986_v34 = vadd.f32 0.5, %v2255_v60 }
 0x168   :  { %v4968_v28 = vpop.f32.mrb[57].mxu1  ;;  %v3940_v47 = vpop.eup %3939  ;;  %v2256_v49 = vmul.f32 0.5, %v3938_v21  ;;  %5664 = vst [vmem:[#allocation63_spill] sm:$0xff] %v4982_v22  ;;  %v4988_v27 = vadd.f32 0.5, %v2156_v51  ;;  %3961 = vtanh.f32 %v1764_v43  ;;  %v1864_v0 = vmul.f32 0.5, %v1500_v50 }
 0x169   :  { %v4970_v26 = vpop.f32.mrb[58].mxu0  ;;  %v4972_v23 = vpop.f32.mrb[58].mxu1  ;;  %v2161_v40 = vmul.f32 0.5, %v3940_v47  ;;  %5665 = vst [vmem:[#allocation64_spill] sm:$0xff] %v4986_v34  ;;  %v4990_v12 = vadd.f32 0.5, %v2258_v11  ;;  %v1121_v19 = vadd.f32 %v4868_v44, %v4872_v53  ;;  %3963 = vtanh.f32 %v1865_v6 }
 0x16a   :  { %v4976_v3 = vpop.f32.mrb[59].mxu0  ;;  %v4978_v39 = vpop.f32.mrb[59].mxu1  ;;  %5666 = vst [vmem:[#allocation65_spill] sm:$0xff] %v4988_v27  ;;  %v4992_v18 = vadd.f32 0.5, %v2256_v49  ;;  %v1508_v5 = vadd.f32 %v4868_v44, %v4845_v25  ;;  %v1113_v47 = vadd.f32 %v4868_v44, %v4882_v30  ;;  %v1521_v60 = vadd.f32 %v4868_v44, %v4874_v59 }
 0x16b   :  { %v3942_v7 = vpop.eup %3941  ;;  %5667 = vst [vmem:[#allocation66_spill] sm:$0xff] %v4990_v12  ;;  %v5006_v51 = vadd.f32 0.5, %v2161_v40  ;;  %3965 = vtanh.f32 %v1766_v57  ;;  %v1769_v53 = vmul.f32 0.5, %v1121_v19  ;;  %v1124_v59 = vadd.f32 %v4868_v44, %v4888_v46 }
 0x16c   :  { %v3944_v21 = vpop.eup %3943  ;;  %5668 = vst [vmem:[#allocation67_spill] sm:$0xff] %v4992_v18  ;;  %v2159_v54 = vmul.f32 0.5, %v3942_v7  ;;  %3967 = vtanh.f32 %v1864_v0  ;;  %v1767_v30 = vmul.f32 0.5, %v1113_v47  ;;  %v1869_v50 = vmul.f32 0.5, %v1521_v60 }
 0x16d   :  { %v3946_v24 = vpop.eup %3945  ;;  %v5002_v43 = vpop.f32.mrb[60].mxu0  ;;  %5669 = vst [vmem:[#allocation68_spill] sm:$0xff] %v5006_v51  ;;  %v2261_v11 = vmul.f32 0.5, %v3944_v21  ;;  %3969 = vtanh.f32 %v1769_v53  ;;  %v1513_v57 = vadd.f32 %v4868_v44, %v4884_v58  ;;  %v1866_v47 = vmul.f32 0.5, %v1508_v5 }
 0x16e   :  { %v3948_v62 = vpop.eup %3947  ;;  %v5004_v49 = vpop.f32.mrb[60].mxu1  ;;  %v2162_v51 = vmul.f32 0.5, %v3946_v24  ;;  %3971 = vtanh.f32 %v1767_v30  ;;  %v1770_v60 = vmul.f32 0.5, %v1124_v59  ;;  %v1116_v46 = vadd.f32 %v4868_v44, %v4894_v33 }
 0x16f   :  { %v3950_v7 = vpop.eup %3949  ;;  %v5008_v13 = vpop.f32.mrb[61].mxu0  ;;  %v2259_v21 = vmul.f32 0.5, %v3948_v62  ;;  %3973 = vtanh.f32 %v1869_v50  ;;  %v1867_v24 = vmul.f32 0.5, %v1513_v57  ;;  %v5028_v53 = vadd.f32 0.5, %v2159_v54 }
 0x170   :  { %v5010_v6 = vpop.f32.mrb[61].mxu1  ;;  %v3952_v25 = vpop.eup %3951  ;;  %v2160_v27 = vmul.f32 0.5, %v3950_v7  ;;  %v5030_v58 = vadd.f32 0.5, %v2261_v11  ;;  %3975 = vtanh.f32 %v1770_v60  ;;  %v5034_v30 = vadd.f32 0.5, %v2162_v51 }
 0x171   :  { %v5014_v12 = vpop.f32.mrb[62].mxu0  ;;  %v5016_v22 = vpop.f32.mrb[62].mxu1  ;;  %v2262_v34 = vmul.f32 0.5, %v3952_v25  ;;  %5673 = vst [vmem:[#allocation72_spill] sm:$0xff] %v5028_v53  ;;  %3977 = vtanh.f32 %v1867_v24  ;;  %v5036_v7 = vadd.f32 0.5, %v2259_v21  ;;  %v1768_v25 = vmul.f32 0.5, %v1116_v46 }
 0x172   :  { %5670 = vst [vmem:[#allocation69_spill] sm:$0xff] %v5016_v22  ;;  %v3954_v40 = vpop.eup %3953  ;;  %v5020_v19 = vpop.f32.mrb[63].mxu0  ;;  %5674 = vst [vmem:[#allocation73_spill] sm:$0xff] %v5030_v58  ;;  %3979 = vtanh.f32 %v1866_v47  ;;  %v5042_v57 = vadd.f32 0.5, %v2160_v27  ;;  %v1137_v51 = vadd.f32 %v4868_v44, %v4914_v17  ;;  %v1129_v27 = vadd.f32 %v4868_v44, %v4922_v41 }
 0x173   :  { %v5022_v18 = vpop.f32.mrb[63].mxu1  ;;  %v3956_v0 = vpop.eup %3955  ;;  %5675 = vst [vmem:[#allocation74_spill] sm:$0xff] %v5034_v30  ;;  %v2260_v59 = vmul.f32 0.5, %v3954_v40  ;;  %5676 = vst [vmem:[#allocation75_spill] sm:$0xff] %v5036_v7  ;;  %v5044_v60 = vadd.f32 0.5, %v2262_v34  ;;  %v1537_v34 = vadd.f32 %v4868_v44, %v4916_v16  ;;  %v1140_v30 = vadd.f32 %v4868_v44, %v4928_v35 }
 0x174   :  { %5671 = vst [vmem:[#allocation70_spill] sm:$0xff] %v5022_v18  ;;  %v5026_v62 = vpop.eup %3957  ;;  %v1524_v18 = vadd.f32 %v4868_v44, %v4890_v1  ;;  %v2163_v22 = vmul.f32 0.5, %v3956_v0  ;;  %5677 = vst [vmem:[#allocation76_spill] sm:$0xff] %v5042_v57  ;;  %v1516_v1 = vadd.f32 %v4868_v44, %v4896_v63 }
 0x175   :  { %5672 = vst [vmem:[#allocation71_spill] sm:$0xff] %v5026_v62  ;;  %v3960_v5 = vpop.eup %3959  ;;  %v5038_v54 = vpop.f32.mrb[64].mxu0  ;;  %5678 = vst [vmem:[#allocation77_spill] sm:$0xff] %v5044_v60  ;;  %v5066_v17 = vadd.f32 0.5, %v2260_v59  ;;  %v1771_v60 = vmul.f32 0.5, %v1129_v27  ;;  %v1873_v16 = vmul.f32 0.5, %v1537_v34  ;;  %v1132_v59 = vadd.f32 %v4868_v44, %v4936_v52 }
 0x176   :  { %v3962_v33 = vpop.eup %3961  ;;  %v1870_v50 = vmul.f32 0.5, %v1524_v18  ;;  %v5040_v11 = vpop.f32.mrb[64].mxu1  ;;  %v2263_v18 = vmul.f32 0.5, %v3960_v5  ;;  %v5068_v24 = vadd.f32 0.5, %v2163_v22  ;;  %v1868_v57 = vmul.f32 0.5, %v1516_v1 }
 0x177   :  { %v5050_v40 = vpop.f32.mrb[65].mxu0  ;;  %v5052_v21 = vpop.f32.mrb[65].mxu1  ;;  %5681 = vst [vmem:[#allocation80_spill] sm:$0xff] %v5066_v17  ;;  %v2164_v62 = vmul.f32 0.5, %v3962_v33  ;;  %v1529_v22 = vadd.f32 %v4868_v44, %v4924_v4  ;;  %v1540_v4 = vadd.f32 %v4868_v44, %v4930_v48 }
 0x178   :  { %v5054_v0 = vpop.eup %3963  ;;  %3981 = vtanh.f32 %v1870_v50  ;;  %v5060_v47 = vpop.f32.mrb[66].mxu0  ;;  %5682 = vst [vmem:[#allocation81_spill] sm:$0xff] %v5068_v24  ;;  %v1772_v24 = vmul.f32 0.5, %v1132_v59 }
 0x179   :  { %5679 = vst [vmem:[#allocation78_spill] sm:$0xff] %v5054_v0  ;;  %v5062_v63 = vpop.f32.mrb[66].mxu1  ;;  %v5064_v46 = vpop.eup %3965  ;;  %v1773_v0 = vmul.f32 0.5, %v1137_v51  ;;  %3983 = vtanh.f32 %v1768_v25  ;;  %v5080_v51 = vadd.f32 0.5, %v2263_v18  ;;  %v1774_v25 = vmul.f32 0.5, %v1140_v30 }
 0x17a   :  { %5680 = vst [vmem:[#allocation79_spill] sm:$0xff] %v5064_v46  ;;  %v5070_v5 = vpop.f32.mrb[67].mxu0  ;;  %v5072_v50 = vpop.f32.mrb[67].mxu1  ;;  %v5082_v34 = vadd.f32 0.5, %v2164_v62  ;;  %v1871_v35 = vmul.f32 0.5, %v1529_v22  ;;  %v1532_v62 = vadd.f32 %v4868_v44, %v4938_v29 }
 0x17b   :  { %v3968_v41 = vpop.eup %3967  ;;  %3985 = vtanh.f32 %v1773_v0  ;;  %5683 = vst [vmem:[#allocation82_spill] sm:$0xff] %v5080_v51 }
 0x17c   :  { %v3970_v58 = vpop.eup %3969  ;;  %3987 = vtanh.f32 %v1771_v60  ;;  %5684 = vst [vmem:[#allocation83_spill] sm:$0xff] %v5082_v34  ;;  %v2264_v60 = vmul.f32 0.5, %v3968_v41 }
 0x17d   :  { %v3972_v33 = vpop.eup %3971  ;;  %v2169_v46 = vmul.f32 0.5, %v3970_v58  ;;  %3989 = vtanh.f32 %v1873_v16  ;;  %v5086_v52 = vpop.f32.mrb[68].mxu0 }
 0x17e   :  { %v3974_v27 = vpop.eup %3973  ;;  %3991 = vtanh.f32 %v1774_v25  ;;  %v5088_v18 = vpop.f32.mrb[68].mxu1  ;;  %v2167_v48 = vmul.f32 0.5, %v3972_v33 }
 0x17f   :  { %v3976_v1 = vpop.eup %3975  ;;  %v2369_v0 = vadd.f32 0.5, %v2169_v46  ;;  %v2269_v17 = vmul.f32 0.5, %v3974_v27  ;;  %3993 = vtanh.f32 %v1871_v35  ;;  %v5092_v16 = vpop.f32.mrb[69].mxu0  ;;  %v1874_v35 = vmul.f32 0.5, %v1540_v4 }
 0x180   :  { %v3978_v58 = vpop.eup %3977  ;;  %v2170_v30 = vmul.f32 0.5, %v3976_v1  ;;  %v5094_v22 = vpop.f32.mrb[69].mxu1  ;;  %3995 = vtanh.f32 %v1772_v24  ;;  %v1872_v1 = vmul.f32 0.5, %v1532_v62  ;;  %v5112_v24 = vadd.f32 0.5, %v2264_v60 }
 0x181   :  { %v5096_v46 = vpop.eup %3979  ;;  %v2519_v59 = vadd.f32 %v2369_v0, %v4555_v2  ;;  %v2469_v25 = vadd.f32 0.5, %v2269_v17  ;;  %v5099_v27 = vpop.f32.mrb[70].mxu0  ;;  %3997 = vtanh.f32 %v1868_v57  ;;  %v2267_v53 = vmul.f32 0.5, %v3978_v58 }
 0x182   :  { %5685 = vst [vmem:[#allocation84_spill] sm:$0xff] %v5096_v46  ;;  %v5101_v34 = vpop.f32.mrb[70].mxu1  ;;  %v2370_v41 = vadd.f32 0.5, %v2170_v30  ;;  %v5103_v29 = vpop.f32.mrb[71].mxu0  ;;  %v1153_v2 = vadd.f32 %v4868_v44, %v4956_v55  ;;  %v1145_v17 = vadd.f32 %v4868_v44, %v4966_v32  ;;  %5686 = vst [vmem:[#allocation85_spill] sm:$0xff] %v5112_v24  ;;  %3999 = vtanh.f32 %v1874_v35 }
 0x183   :  { %v5105_v51 = vpop.f32.mrb[71].mxu1  ;;  %v3982_v7 = vpop.eup %3981  ;;  %v2569_v46 = vadd.f32 %v2519_v59, %v4562_v14  ;;  %v5117_v4 = vadd.f32 0.5, %v2167_v48  ;;  %4001 = vtanh.f32 %v1872_v1  ;;  %v1553_v32 = vadd.f32 %v4868_v44, %v4958_v20 }
 0x184   :  { %v2520_v57 = vadd.f32 %v2370_v41, %v4564_v15  ;;  %v2270_v33 = vmul.f32 0.5, %v3982_v7  ;;  %v5115_v0 = vpop.eup %3983  ;;  %v1777_v14 = vmul.f32 0.5, %v1153_v2  ;;  %v1775_v59 = vmul.f32 0.5, %v1145_v17 }
 0x185   :  { %5687 = vst [vmem:[#allocation86_spill] sm:$0xff] %v5115_v0  ;;  %5688 = vst [vmem:[#allocation87_spill] sm:$0xff] %v5117_v4  ;;  %v2619_v30 = vadd.f32 %v2569_v46, %v2469_v25  ;;  %v3986_v58 = vpop.eup %3985  ;;  %v5122_v15 = vadd.f32 0.5, %v2267_v53  ;;  %v5124_v41 = vpop.f32.mrb[72].mxu0  ;;  %v1877_v1 = vmul.f32 0.5, %v1553_v32  ;;  %v1156_v53 = vadd.f32 %v4868_v44, %v4970_v26 }
 0x186   :  { %v2470_v62 = vadd.f32 0.5, %v2270_v33  ;;  %v2570_v55 = vadd.f32 %v2520_v57, %v4572_v37  ;;  %v3988_v60 = vpop.eup %3987  ;;  %v2173_v7 = vmul.f32 0.5, %v3986_v58  ;;  %4003 = vtanh.f32 %v1777_v14  ;;  %v5126_v48 = vpop.f32.mrb[72].mxu1 }
 0x187   :  { %v2669_v24 = vmul.f32 0.25, %v2619_v30  ;;  %5689 = vst [vmem:[#allocation88_spill] sm:$0xff] %v5122_v15  ;;  %v3990_v46 = vpop.eup %3989  ;;  %v2171_v35 = vmul.f32 0.5, %v3988_v60  ;;  %4005 = vtanh.f32 %v1775_v59  ;;  %v5128_v37 = vpop.f32.mrb[73].mxu0  ;;  %v1545_v33 = vadd.f32 %v4868_v44, %v4968_v28 }
 0x188   :  { %v2620_v25 = vadd.f32 %v2570_v55, %v2470_v62  ;;  %v5130_v2 = vpop.f32.mrb[73].mxu1  ;;  %v3992_v20 = vpop.eup %3991  ;;  %v2373_v17 = vadd.f32 0.5, %v2173_v7  ;;  %v2273_v57 = vmul.f32 0.5, %v3990_v46  ;;  %4007 = vtanh.f32 %v1877_v1 }
 0x189   :  { %5690 = vst [vmem:[#allocation89_spill] sm:$0xff] %v5130_v2  ;;  %v5136_v30 = vpop.f32.mrb[74].mxu0  ;;  %v5138_v14 = vpop.f32.mrb[74].mxu1  ;;  %v2371_v55 = vadd.f32 0.5, %v2171_v35  ;;  %v2174_v59 = vmul.f32 0.5, %v3992_v20  ;;  %v1778_v15 = vmul.f32 0.5, %v1156_v53 }
 0x18a   :  { %5691 = vst [vmem:[#allocation90_spill] sm:$0xff] %v5138_v14  ;;  %v3994_v58 = vpop.eup %3993  ;;  %v2670_v62 = vmul.f32 0.25, %v2620_v25  ;;  %v5140_v32 = vpop.f32.mrb[75].mxu0  ;;  %v2523_v46 = vadd.f32 %v2373_v17, %v4576_v42  ;;  %v2473_v26 = vadd.f32 0.5, %v2273_v57  ;;  %v1875_v20 = vmul.f32 0.5, %v1545_v33 }
 0x18b   :  { %5692 = vst [vmem:[#allocation91_spill] sm:$0xff] %v5140_v32  ;;  %v5142_v60 = vpop.f32.mrb[75].mxu1  ;;  %v3996_v7 = vpop.eup %3995  ;;  %v2271_v0 = vmul.f32 0.5, %v3994_v58  ;;  %v2521_v14 = vadd.f32 %v2371_v55, %v4552_v61  ;;  %v2374_v2 = vadd.f32 0.5, %v2174_v59  ;;  %4009 = vtanh.f32 %v1778_v15 }
 0x18c   :  { %v5145_v28 = vpop.eup %3997  ;;  %v3185_v4 = vpack.c.bf16 %v2670_v62, %v2669_v24  ;;  %v2172_v25 = vmul.f32 0.5, %v3996_v7  ;;  %v2573_v35 = vadd.f32 %v2523_v46, %v4583_v56  ;;  %v1148_v61 = vadd.f32 %v4868_v44, %v4976_v3 }
 0x18d   :  { %5693 = vst [vmem:[#allocation92_spill] sm:$0xff] %v5145_v28  ;;  %v2471_v1 = vadd.f32 0.5, %v2271_v0  ;;  %v4000_v32 = vpop.eup %3999  ;;  %v2524_v42 = vadd.f32 %v2374_v2, %v4592_v10  ;;  %v2571_v17 = vadd.f32 %v2521_v14, %v4558_v8  ;;  %4011 = vtanh.f32 %v1875_v20  ;;  %v5158_v0 = vpop.f32.mrb[76].mxu0 }
 0x18e   :  { %3186 = vst [vmem:[%s5602_s3] sm:$0xff] %v3185_v4   ;;  %v2372_v57 = vadd.f32 0.5, %v2172_v25  ;;  %v4002_v24 = vpop.eup %4001  ;;  %v2623_v53 = vadd.f32 %v2573_v35, %v2473_v26  ;;  %v2274_v58 = vmul.f32 0.5, %v4000_v32  ;;  %v1556_v56 = vadd.f32 %v4868_v44, %v4972_v23  ;;  %v5160_v15 = vpop.f32.mrb[76].mxu1 }
 0x18f   :  { %v2621_v4 = vadd.f32 %v2571_v17, %v2471_v1  ;;  %v2574_v8 = vadd.f32 %v2524_v42, %v4601_v31  ;;  %v2272_v2 = vmul.f32 0.5, %v4002_v24  ;;  %v5164_v33 = vpop.f32.mrb[77].mxu0  ;;  %v5166_v3 = vpop.f32.mrb[77].mxu1  ;;  %v1776_v59 = vmul.f32 0.5, %v1148_v61 }
 0x190   :  { %v2522_v10 = vadd.f32 %v2372_v57, %v4560_v9  ;;  %v4004_v14 = vpop.eup %4003  ;;  %v2673_v62 = vmul.f32 0.25, %v2623_v53  ;;  %v2474_v55 = vadd.f32 0.5, %v2274_v58  ;;  %v1878_v32 = vmul.f32 0.5, %v1556_v56  ;;  %v5168_v23 = vpop.f32.mrb[78].mxu0 }
 0x191   :  { %v5170_v7 = vpop.f32.mrb[78].mxu1  ;;  %v4006_v46 = vpop.eup %4005  ;;  %v2671_v26 = vmul.f32 0.25, %v2621_v4  ;;  %v2472_v25 = vadd.f32 0.5, %v2272_v2  ;;  %v2177_v31 = vmul.f32 0.5, %v4004_v14  ;;  %4013 = vtanh.f32 %v1776_v59 }
 0x192   :  { %v2572_v9 = vadd.f32 %v2522_v10, %v4570_v36  ;;  %v5173_v35 = vpop.f32.mrb[79].mxu0  ;;  %v5175_v1 = vpop.f32.mrb[79].mxu1  ;;  %v2624_v20 = vadd.f32 %v2574_v8, %v2474_v55  ;;  %v2175_v42 = vmul.f32 0.5, %v4006_v46  ;;  %v1548_v17 = vadd.f32 %v4868_v44, %v4978_v39 }
 0x193   :  { %v4008_v57 = vpop.eup %4007  ;;  %v2377_v24 = vadd.f32 0.5, %v2177_v31  ;;  %4015 = vtanh.f32 %v1878_v32  ;;  %v1169_v53 = vadd.f32 %v4868_v44, %v5002_v43  ;;  %v1161_v14 = vadd.f32 %v4868_v44, %v5008_v13 }
 0x194   :  { %v2622_v61 = vadd.f32 %v2572_v9, %v2472_v25  ;;  %v2674_v58 = vmul.f32 0.25, %v2624_v20  ;;  %v2375_v36 = vadd.f32 0.5, %v2175_v42  ;;  %v2277_v56 = vmul.f32 0.5, %v4008_v57  ;;  %v5694_v9 = vld [vmem:[#allocation8_spill] sm:$0xff] }
 0x195   :  { %v1876_v4 = vmul.f32 0.5, %v1548_v17  ;;  %v2527_v2 = vadd.f32 %v2377_v24, %v4608_v45  ;;  %v1781_v8 = vmul.f32 0.5, %v1169_v53  ;;  %v4010_v55 = vpop.eup %4009  ;;  %v5185_v32 = vpop.f32.mrb[80].mxu0  ;;  %v1779_v17 = vmul.f32 0.5, %v1161_v14  ;;  %v5696_v14 = vld [vmem:[#allocation9_spill] sm:$0xff] }
 0x196   :  { %v2672_v10 = vmul.f32 0.25, %v2622_v61  ;;  %v3195_v39 = vpack.c.bf16 %v2674_v58, %v2673_v62  ;;  %v2525_v59 = vadd.f32 %v2375_v36, %v4574_v38  ;;  %v2477_v46 = vadd.f32 0.5, %v2277_v56  ;;  %v5187_v43 = vpop.f32.mrb[80].mxu1  ;;  %v5190_v45 = vpop.f32.mrb[81].mxu0  ;;  %v5695_v38 = vld [vmem:[#allocation2_spill] sm:$0xff] }
 0x197   :  { %4017 = vtanh.f32 %v1876_v4  ;;  %v2577_v31 = vadd.f32 %v2527_v2, %v5694_v9  ;;  %v2178_v20 = vmul.f32 0.5, %v4010_v55  ;;  %v5192_v42 = vpop.f32.mrb[81].mxu1  ;;  %v4012_v13 = vpop.eup %4011  ;;  %v1569_v57 = vadd.f32 %v4868_v44, %v5004_v49 }
 0x198   :  { %v3190_v25 = vpack.c.bf16 %v2672_v10, %v2671_v26  ;;  %4019 = vtanh.f32 %v1781_v8  ;;  %3308 = vst [vmem:[%s5602_s3 + $0x10] sm:$0xff] %v3195_v39   ;;  %v2575_v62 = vadd.f32 %v2525_v59, %v5695_v38  ;;  %v1172_v26 = vadd.f32 %v4868_v44, %v5014_v12  ;;  %v5202_v61 = vpop.f32.mrb[82].mxu0  ;;  %v5204_v24 = vpop.f32.mrb[82].mxu1 }
 0x199   :  { %v2627_v53 = vadd.f32 %v2577_v31, %v2477_v46  ;;  %v2378_v58 = vadd.f32 0.5, %v2178_v20  ;;  %v2275_v36 = vmul.f32 0.5, %v4012_v13  ;;  %v1561_v56 = vadd.f32 %v4868_v44, %v5010_v6  ;;  %v5211_v4 = vpop.f32.mrb[83].mxu0  ;;  %v5213_v49 = vpop.f32.mrb[83].mxu1  ;;  %v5697_v6 = vld [vmem:[#allocation69_spill] sm:$0xff]  ;;  %v5698_v31 = vld [vmem:[#allocation70_spill] sm:$0xff] }
 0x19a   :  { %3307 = vst [vmem:[%s5602_s3 + $0x8] sm:$0xff] %v3190_v25   ;;  %4021 = vtanh.f32 %v1779_v17  ;;  %v1881_v12 = vmul.f32 0.5, %v1569_v57  ;;  %v1782_v10 = vmul.f32 0.5, %v1172_v26  ;;  %v1164_v2 = vadd.f32 %v4868_v44, %v5020_v19  ;;  %v5699_v57 = vld [vmem:[#allocation11_spill] sm:$0xff] }
 0x19b   :  { %v5217_v8 = vmul.f32 0.25, %v2627_v53  ;;  %v2528_v55 = vadd.f32 %v2378_v58, %v5696_v14  ;;  %v2475_v39 = vadd.f32 0.5, %v2275_v36  ;;  %v1879_v59 = vmul.f32 0.5, %v1561_v56  ;;  %v4014_v46 = vpop.eup %4013 }
 0x19c   :  { %4023 = vtanh.f32 %v1881_v12  ;;  %v1780_v25 = vmul.f32 0.5, %v1164_v2  ;;  %v1572_v9 = vadd.f32 %v4868_v44, %v5697_v6  ;;  %v1564_v20 = vadd.f32 %v4868_v44, %v5698_v31  ;;  %v5703_v31 = vld [vmem:[#allocation3_spill] sm:$0xff] }
 0x19d   :  { %v4016_v13 = vpop.eup %4015  ;;  %v2625_v38 = vadd.f32 %v2575_v62, %v2475_v39  ;;  %v2176_v17 = vmul.f32 0.5, %v4014_v46  ;;  %v2578_v19 = vadd.f32 %v2528_v55, %v5699_v57  ;;  %4025 = vtanh.f32 %v1782_v10  ;;  %v5225_v36 = vpop.f32.mrb[84].mxu0 }
 0x19e   :  { %v2278_v26 = vmul.f32 0.5, %v4016_v13  ;;  %4027 = vtanh.f32 %v1879_v59  ;;  %v1882_v53 = vmul.f32 0.5, %v1572_v9  ;;  %v1880_v58 = vmul.f32 0.5, %v1564_v20  ;;  %v5227_v56 = vpop.f32.mrb[84].mxu1  ;;  %v5233_v62 = vpop.f32.mrb[85].mxu0 }
 0x19f   :  { %v5229_v12 = vmul.f32 0.25, %v2625_v38  ;;  %v2376_v2 = vadd.f32 0.5, %v2176_v17  ;;  %4029 = vtanh.f32 %v1780_v25  ;;  %v1185_v14 = vadd.f32 %v4868_v44, %v5038_v54  ;;  %v5235_v39 = vpop.f32.mrb[85].mxu1  ;;  %v5241_v6 = vpop.f32.mrb[86].mxu0 }
 0x1a0   :  { %5700 = vst [vmem:[#allocation8_spill] sm:$0xff] %v5235_v39  ;;  %v2478_v55 = vadd.f32 0.5, %v2278_v26  ;;  %4031 = vtanh.f32 %v1882_v53  ;;  %v1177_v59 = vadd.f32 %v4868_v44, %v5050_v40  ;;  %v1585_v46 = vadd.f32 %v4868_v44, %v5040_v11  ;;  %5701 = vst [vmem:[#allocation2_spill] sm:$0xff] %v5241_v6  ;;  %v5243_v9 = vpop.f32.mrb[86].mxu1  ;;  %v5246_v38 = vpop.f32.mrb[87].mxu0  ;;  %v5705_v11 = vld [vmem:[#allocation4_spill] sm:$0xff] }
 0x1a1   :  { %v4018_v10 = vpop.eup %4017  ;;  %5702 = vst [vmem:[#allocation9_spill] sm:$0xff] %v5243_v9  ;;  %v2526_v54 = vadd.f32 %v2376_v2, %v5703_v31  ;;  %4033 = vtanh.f32 %v1880_v58  ;;  %v1785_v13 = vmul.f32 0.5, %v1185_v14  ;;  %v5248_v17 = vpop.f32.mrb[87].mxu1  ;;  %v1188_v9 = vadd.f32 %v4868_v44, %v5060_v47 }
 0x1a2   :  { %v4020_v25 = vpop.eup %4019  ;;  %v2276_v20 = vmul.f32 0.5, %v4018_v10  ;;  %5704 = vst [vmem:[#allocation69_spill] sm:$0xff] %v5248_v17  ;;  %v2628_v57 = vadd.f32 %v2578_v19, %v2478_v55  ;;  %v1783_v40 = vmul.f32 0.5, %v1177_v59  ;;  %v1885_v53 = vmul.f32 0.5, %v1585_v46  ;;  %v5706_v46 = vld [vmem:[#allocation13_spill] sm:$0xff] }
 0x1a3   :  { %v2181_v26 = vmul.f32 0.5, %v4020_v25  ;;  %v2576_v39 = vadd.f32 %v2526_v54, %v5705_v11  ;;  %4035 = vtanh.f32 %v1785_v13  ;;  %v1577_v58 = vadd.f32 %v4868_v44, %v5052_v21 }
 0x1a4   :  { %v2476_v28 = vadd.f32 0.5, %v2276_v20  ;;  %v4022_v6 = vpop.eup %4021  ;;  %v2678_v2 = vmul.f32 0.25, %v2628_v57  ;;  %4037 = vtanh.f32 %v1783_v40  ;;  %v1786_v19 = vmul.f32 0.5, %v1188_v9  ;;  %v5711_v9 = vld [vmem:[#allocation16_spill] sm:$0xff] }
 0x1a5   :  { %v2381_v10 = vadd.f32 0.5, %v2181_v26  ;;  %v2179_v31 = vmul.f32 0.5, %v4022_v6  ;;  %4039 = vtanh.f32 %v1885_v53  ;;  %v1883_v54 = vmul.f32 0.5, %v1577_v58  ;;  %v5259_v20 = vpop.f32.mrb[88].mxu0  ;;  %v5261_v13 = vpop.f32.mrb[88].mxu1 }
 0x1a6   :  { %v2626_v14 = vadd.f32 %v2576_v39, %v2476_v28  ;;  %v4024_v55 = vpop.eup %4023  ;;  %v3205_v59 = vpack.c.bf16 %v2678_v2, %v5217_v8  ;;  %v1180_v47 = vadd.f32 %v4868_v44, %v5070_v5  ;;  %5707 = vst [vmem:[#allocation70_spill] sm:$0xff] %v5259_v20  ;;  %5708 = vst [vmem:[#allocation11_spill] sm:$0xff] %v5261_v13  ;;  %4041 = vtanh.f32 %v1786_v19  ;;  %v5263_v39 = vpop.f32.mrb[89].mxu0 }
 0x1a7   :  { %v2531_v25 = vadd.f32 %v2381_v10, %v5706_v46  ;;  %v4026_v57 = vpop.eup %4025  ;;  %v2379_v21 = vadd.f32 0.5, %v2179_v31  ;;  %v2281_v28 = vmul.f32 0.5, %v4024_v55  ;;  %5709 = vst [vmem:[#allocation3_spill] sm:$0xff] %v5263_v39  ;;  %v5265_v6 = vpop.f32.mrb[89].mxu1  ;;  %4043 = vtanh.f32 %v1883_v54  ;;  %v5719_v39 = vld [vmem:[#allocation7_spill] sm:$0xff] }
 0x1a8   :  { %v2676_v26 = vmul.f32 0.25, %v2626_v14  ;;  %5710 = vst [vmem:[#allocation4_spill] sm:$0xff] %v5265_v6  ;;  %v4028_v8 = vpop.eup %4027  ;;  %3310 = vst [vmem:[%s5602_s3 + $0x20] sm:$0xff] %v3205_v59   ;;  %v2182_v40 = vmul.f32 0.5, %v4026_v57  ;;  %v1784_v53 = vmul.f32 0.5, %v1180_v47  ;;  %v5271_v11 = vpop.f32.mrb[90].mxu0  ;;  %v1588_v54 = vadd.f32 %v4868_v44, %v5062_v63 }
 0x1a9   :  { %v2581_v5 = vadd.f32 %v2531_v25, %v5711_v9  ;;  %5712 = vst [vmem:[#allocation13_spill] sm:$0xff] %v5271_v11  ;;  %v5273_v2 = vpop.f32.mrb[90].mxu1  ;;  %v4030_v10 = vpop.eup %4029  ;;  %v5714_v14 = vld [vmem:[#allocation5_spill] sm:$0xff]  ;;  %v2481_v19 = vadd.f32 0.5, %v2281_v28  ;;  %v2279_v55 = vmul.f32 0.5, %v4028_v8  ;;  %v1580_v63 = vadd.f32 %v4868_v44, %v5072_v50  ;;  %v5725_v50 = vld [vmem:[#allocation10_spill] sm:$0xff] }
 0x1aa   :  { %5713 = vst [vmem:[#allocation16_spill] sm:$0xff] %v5273_v2  ;;  %v3200_v58 = vpack.c.bf16 %v2676_v26, %v5229_v12  ;;  %v2529_v31 = vadd.f32 %v2379_v21, %v5714_v14  ;;  %v5277_v46 = vpop.f32.mrb[91].mxu0  ;;  %v5279_v6 = vpop.f32.mrb[91].mxu1  ;;  %v2382_v25 = vadd.f32 0.5, %v2182_v40  ;;  %v2180_v57 = vmul.f32 0.5, %v4030_v10  ;;  %v5717_v21 = vld [vmem:[#allocation6_spill] sm:$0xff] }
 0x1ab   :  { %5715 = vst [vmem:[#allocation5_spill] sm:$0xff] %v5277_v46  ;;  %5716 = vst [vmem:[#allocation93_spill] sm:$0xff] %v5279_v6  ;;  %v4032_v59 = vpop.eup %4031  ;;  %4045 = vtanh.f32 %v1784_v53  ;;  %v2631_v12 = vadd.f32 %v2581_v5, %v2481_v19  ;;  %v2479_v26 = vadd.f32 0.5, %v2279_v55  ;;  %v5718_v9 = vld [vmem:[#allocation17_spill] sm:$0xff]  ;;  %v1886_v40 = vmul.f32 0.5, %v1588_v54  ;;  %v5720_v5 = vld [vmem:[#allocation19_spill] sm:$0xff] }
 0x1ac   :  { %v4034_v47 = vpop.eup %4033  ;;  %3309 = vst [vmem:[%s5602_s3 + $0x18] sm:$0xff] %v3200_v58   ;;  %v2579_v28 = vadd.f32 %v2529_v31, %v5717_v21  ;;  %v2282_v8 = vmul.f32 0.5, %v4032_v59  ;;  %v2532_v14 = vadd.f32 %v2382_v25, %v5718_v9  ;;  %v2380_v6 = vadd.f32 0.5, %v2180_v57 }
 0x1ad   :  { %v2280_v2 = vmul.f32 0.5, %v4034_v47  ;;  %v4036_v10 = vpop.eup %4035  ;;  %v2681_v53 = vmul.f32 0.25, %v2631_v12  ;;  %v5292_v59 = vpop.f32.mrb[92].mxu0  ;;  %4047 = vtanh.f32 %v1886_v40  ;;  %v1884_v12 = vmul.f32 0.5, %v1580_v63 }
 0x1ae   :  { %v2629_v46 = vadd.f32 %v2579_v28, %v2479_v26  ;;  %v2482_v11 = vadd.f32 0.5, %v2282_v8  ;;  %v4038_v13 = vpop.eup %4037  ;;  %v2530_v58 = vadd.f32 %v2380_v6, %v5719_v39  ;;  %v2582_v19 = vadd.f32 %v2532_v14, %v5720_v5  ;;  %5721 = vst [vmem:[#allocation6_spill] sm:$0xff] %v5292_v59  ;;  %v5294_v25 = vpop.f32.mrb[92].mxu1 }
 0x1af   :  { %v2480_v55 = vadd.f32 0.5, %v2280_v2  ;;  %v2185_v31 = vmul.f32 0.5, %v4036_v10  ;;  %5722 = vst [vmem:[#allocation17_spill] sm:$0xff] %v5294_v25  ;;  %v4040_v57 = vpop.eup %4039  ;;  %v2183_v47 = vmul.f32 0.5, %v4038_v13  ;;  %v5296_v26 = vpop.f32.mrb[93].mxu0  ;;  %4049 = vtanh.f32 %v1884_v12 }
 0x1b0   :  { %v2679_v54 = vmul.f32 0.25, %v2629_v46  ;;  %5723 = vst [vmem:[#allocation7_spill] sm:$0xff] %v5296_v26  ;;  %v5298_v21 = vpop.f32.mrb[93].mxu1  ;;  %v2632_v44 = vadd.f32 %v2582_v19, %v2482_v11  ;;  %v2580_v39 = vadd.f32 %v2530_v58, %v5725_v50  ;;  %v2285_v28 = vmul.f32 0.5, %v4040_v57  ;;  %v5301_v2 = vpop.f32.mrb[94].mxu0  ;;  %v5730_v19 = vld [vmem:[#allocation21_spill] sm:$0xff] }
 0x1b1   :  { %5724 = vst [vmem:[#allocation19_spill] sm:$0xff] %v5298_v21  ;;  %v2385_v6 = vadd.f32 0.5, %v2185_v31  ;;  %5726 = vst [vmem:[#allocation10_spill] sm:$0xff] %v5301_v2  ;;  %v5303_v8 = vpop.f32.mrb[94].mxu1  ;;  %v4042_v9 = vpop.eup %4041  ;;  %v2383_v14 = vadd.f32 0.5, %v2183_v47  ;;  %v5731_v47 = vld [vmem:[#allocation12_spill] sm:$0xff] }
 0x1b2   :  { %5727 = vst [vmem:[#allocation94_spill] sm:$0xff] %v5303_v8  ;;  %v5308_v13 = vld [vmem:[%s5601_s2] ss:$0 sm:$0xff]  ;;  %v5314_v40 = vpop.f32.mrb[95].mxu0  ;;  %v5316_v10 = vpop.f32.mrb[95].mxu1  ;;  %v2682_v58 = vmul.f32 0.25, %v2632_v44  ;;  %v2630_v5 = vadd.f32 %v2580_v39, %v2480_v55 }
 0x1b3   :  { %v1201_v46 = vadd.f32 %v5308_v13, %v5086_v52  ;;  %v1193_v11 = vadd.f32 %v5308_v13, %v5092_v16  ;;  %5728 = vst [vmem:[#allocation95_spill] sm:$0xff] %v5314_v40  ;;  %5729 = vst [vmem:[#allocation96_spill] sm:$0xff] %v5316_v10  ;;  %v4044_v63 = vpop.eup %4043  ;;  %v2535_v31 = vadd.f32 %v2385_v6, %v5730_v19  ;;  %v2485_v57 = vadd.f32 0.5, %v2285_v28  ;;  %v5732_v26 = vld [vmem:[#allocation24_spill] sm:$0xff]  ;;  %v5733_v10 = vld [vmem:[#allocation14_spill] sm:$0xff] }
 0x1b4   :  { %v2533_v12 = vadd.f32 %v2383_v14, %v5731_v47  ;;  %v2186_v50 = vmul.f32 0.5, %v4042_v9  ;;  %v2283_v8 = vmul.f32 0.5, %v4044_v63  ;;  %v3215_v52 = vpack.c.bf16 %v2682_v58, %v2681_v53  ;;  %v5736_v63 = vld [vmem:[#allocation27_spill] sm:$0xff] }
 0x1b5   :  { %v1789_v21 = vmul.f32 0.5, %v1201_v46  ;;  %v4046_v2 = vpop.eup %4045  ;;  %v2680_v25 = vmul.f32 0.25, %v2630_v5  ;;  %v2585_v16 = vadd.f32 %v2535_v31, %v5732_v26  ;;  %v1787_v59 = vmul.f32 0.5, %v1193_v11  ;;  %v5327_v53 = vpop.f32.mrb[96].mxu0  ;;  %v5734_v26 = vld [vmem:[#allocation25_spill] sm:$0xff] }
 0x1b6   :  { %v2386_v40 = vadd.f32 0.5, %v2186_v50  ;;  %v2483_v20 = vadd.f32 0.5, %v2283_v8  ;;  %v2583_v17 = vadd.f32 %v2533_v12, %v5733_v10  ;;  %v2184_v44 = vmul.f32 0.5, %v4046_v2  ;;  %3312 = vst [vmem:[%s5602_s3 + $0x30] sm:$0xff] %v3215_v52   ;;  %v5329_v28 = vpop.f32.mrb[96].mxu1  ;;  %v5332_v2 = vpop.f32.mrb[97].mxu0 }
 0x1b7   :  { %v3210_v55 = vpack.c.bf16 %v2680_v25, %v2679_v54  ;;  %v2635_v39 = vadd.f32 %v2585_v16, %v2485_v57  ;;  %4051 = vtanh.f32 %v1789_v21  ;;  %v1601_v6 = vadd.f32 %v5308_v13, %v5088_v18  ;;  %v5334_v46 = vpop.f32.mrb[97].mxu1  ;;  %v5343_v11 = vpop.f32.mrb[98].mxu0  ;;  %v5737_v12 = vld [vmem:[#allocation18_spill] sm:$0xff] }
 0x1b8   :  { %v2536_v9 = vadd.f32 %v2386_v40, %v5734_v26  ;;  %v2633_v8 = vadd.f32 %v2583_v17, %v2483_v20  ;;  %v2384_v14 = vadd.f32 0.5, %v2184_v44  ;;  %4053 = vtanh.f32 %v1787_v59  ;;  %v5345_v17 = vpop.f32.mrb[98].mxu1  ;;  %v4048_v20 = vpop.eup %4047  ;;  %v5735_v40 = vld [vmem:[#allocation15_spill] sm:$0xff] }
 0x1b9   :  { %3311 = vst [vmem:[%s5602_s3 + $0x28] sm:$0xff] %v3210_v55   ;;  %v2685_v25 = vmul.f32 0.25, %v2635_v39  ;;  %v1889_v54 = vmul.f32 0.5, %v1601_v6  ;;  %v1204_v18 = vadd.f32 %v5308_v13, %v5099_v27  ;;  %v1593_v21 = vadd.f32 %v5308_v13, %v5094_v22  ;;  %v5351_v19 = vpop.f32.mrb[99].mxu0  ;;  %v5353_v31 = vpop.f32.mrb[99].mxu1 }
 0x1ba   :  { %v2683_v59 = vmul.f32 0.25, %v2633_v8  ;;  %v2534_v10 = vadd.f32 %v2384_v14, %v5735_v40  ;;  %v2586_v58 = vadd.f32 %v2536_v9, %v5736_v63  ;;  %v1196_v5 = vadd.f32 %v5308_v13, %v5103_v29  ;;  %v4050_v47 = vpop.eup %4049  ;;  %v5738_v40 = vld [vmem:[#allocation89_spill] sm:$0xff] }
 0x1bb   :  { %v2286_v27 = vmul.f32 0.5, %v4048_v20  ;;  %4055 = vtanh.f32 %v1889_v54  ;;  %v1790_v22 = vmul.f32 0.5, %v1204_v18  ;;  %v1887_v57 = vmul.f32 0.5, %v1593_v21 }
 0x1bc   :  { %v2584_v50 = vadd.f32 %v2534_v10, %v5737_v12  ;;  %v1788_v52 = vmul.f32 0.5, %v1196_v5  ;;  %v1604_v16 = vadd.f32 %v5308_v13, %v5101_v34  ;;  %v1596_v44 = vadd.f32 %v5308_v13, %v5105_v51 }
 0x1bd   :  { %v2486_v55 = vadd.f32 0.5, %v2286_v27  ;;  %v2284_v29 = vmul.f32 0.5, %v4050_v47  ;;  %4057 = vtanh.f32 %v1790_v22  ;;  %v1217_v39 = vadd.f32 %v5308_v13, %v5124_v41 }
 0x1be   :  { %4059 = vtanh.f32 %v1887_v57  ;;  %v1890_v6 = vmul.f32 0.5, %v1604_v16  ;;  %v1888_v26 = vmul.f32 0.5, %v1596_v44  ;;  %v1209_v9 = vadd.f32 %v5308_v13, %v5128_v37  ;;  %v5740_v44 = vld [vmem:[#allocation90_spill] sm:$0xff] }
 0x1bf   :  { %v2636_v8 = vadd.f32 %v2586_v58, %v2486_v55  ;;  %v2484_v14 = vadd.f32 0.5, %v2284_v29  ;;  %4061 = vtanh.f32 %v1788_v52  ;;  %v1793_v54 = vmul.f32 0.5, %v1217_v39  ;;  %v5741_v55 = vld [vmem:[#allocation29_spill] sm:$0xff] }
 0x1c0   :  { %4063 = vtanh.f32 %v1890_v6  ;;  %v1791_v34 = vmul.f32 0.5, %v1209_v9  ;;  %v1617_v51 = vadd.f32 %v5308_v13, %v5126_v48  ;;  %v1220_v18 = vadd.f32 %v5308_v13, %v5136_v30  ;;  %v5739_v30 = vld [vmem:[#allocation91_spill] sm:$0xff]  ;;  %v5742_v9 = vld [vmem:[#allocation20_spill] sm:$0xff] }
 0x1c1   :  { %v4052_v21 = vpop.eup %4051  ;;  %v2686_v41 = vmul.f32 0.25, %v2636_v8  ;;  %v2634_v20 = vadd.f32 %v2584_v50, %v2484_v14  ;;  %4065 = vtanh.f32 %v1888_v26  ;;  %v1609_v10 = vadd.f32 %v5308_v13, %v5738_v40 }
 0x1c2   :  { %v4054_v37 = vpop.eup %4053  ;;  %v2189_v63 = vmul.f32 0.5, %v4052_v21  ;;  %4067 = vtanh.f32 %v1793_v54  ;;  %v1893_v58 = vmul.f32 0.5, %v1617_v51  ;;  %v1794_v5 = vmul.f32 0.5, %v1220_v18  ;;  %v5743_v18 = vld [vmem:[#allocation32_spill] sm:$0xff] }
 0x1c3   :  { %v3225_v27 = vpack.c.bf16 %v2686_v41, %v2685_v25  ;;  %v2684_v22 = vmul.f32 0.25, %v2634_v20  ;;  %v2187_v57 = vmul.f32 0.5, %v4054_v37  ;;  %4069 = vtanh.f32 %v1791_v34 }
 0x1c4   :  { %v2389_v48 = vadd.f32 0.5, %v2189_v63  ;;  %4071 = vtanh.f32 %v1893_v58  ;;  %v1891_v47 = vmul.f32 0.5, %v1609_v10  ;;  %v1212_v12 = vadd.f32 %v5308_v13, %v5739_v30  ;;  %v5744_v10 = vld [vmem:[#allocation22_spill] sm:$0xff] }
 0x1c5   :  { %v4056_v50 = vpop.eup %4055  ;;  %3314 = vst [vmem:[%s5602_s3 + $0x40] sm:$0xff] %v3225_v27   ;;  %v3220_v52 = vpack.c.bf16 %v2684_v22, %v2683_v59  ;;  %v2387_v16 = vadd.f32 0.5, %v2187_v57  ;;  %4073 = vtanh.f32 %v1794_v5  ;;  %v1620_v25 = vadd.f32 %v5308_v13, %v5740_v44 }
 0x1c6   :  { %v2539_v29 = vadd.f32 %v2389_v48, %v5741_v55  ;;  %v2289_v39 = vmul.f32 0.5, %v4056_v50  ;;  %4075 = vtanh.f32 %v1891_v47  ;;  %v1792_v6 = vmul.f32 0.5, %v1212_v12  ;;  %v5745_v50 = vld [vmem:[#allocation33_spill] sm:$0xff] }
 0x1c7   :  { %v4058_v26 = vpop.eup %4057  ;;  %3313 = vst [vmem:[%s5602_s3 + $0x38] sm:$0xff] %v3220_v52   ;;  %v2537_v8 = vadd.f32 %v2387_v16, %v5742_v9  ;;  %v1894_v14 = vmul.f32 0.5, %v1620_v25  ;;  %v1612_v59 = vadd.f32 %v5308_v13, %v5142_v60  ;;  %v1233_v54 = vadd.f32 %v5308_v13, %v5158_v0 }
 0x1c8   :  { %v4060_v34 = vpop.eup %4059  ;;  %v2489_v51 = vadd.f32 0.5, %v2289_v39  ;;  %v2589_v21 = vadd.f32 %v2539_v29, %v5743_v18  ;;  %v2190_v41 = vmul.f32 0.5, %v4058_v26  ;;  %4077 = vtanh.f32 %v1792_v6  ;;  %v5746_v26 = vld [vmem:[#allocation23_spill] sm:$0xff] }
 0x1c9   :  { %v4062_v20 = vpop.eup %4061  ;;  %v2287_v40 = vmul.f32 0.5, %v4060_v34  ;;  %v2587_v37 = vadd.f32 %v2537_v8, %v5744_v10  ;;  %4079 = vtanh.f32 %v1894_v14  ;;  %v1892_v63 = vmul.f32 0.5, %v1612_v59  ;;  %v5747_v8 = vld [vmem:[#allocation35_spill] sm:$0xff] }
 0x1ca   :  { %v4064_v58 = vpop.eup %4063  ;;  %v2639_v5 = vadd.f32 %v2589_v21, %v2489_v51  ;;  %v2390_v27 = vadd.f32 0.5, %v2190_v41  ;;  %v2188_v22 = vmul.f32 0.5, %v4062_v20  ;;  %v1797_v60 = vmul.f32 0.5, %v1233_v54 }
 0x1cb   :  { %v4066_v57 = vpop.eup %4065  ;;  %v2487_v48 = vadd.f32 0.5, %v2287_v40  ;;  %v2290_v0 = vmul.f32 0.5, %v4064_v58  ;;  %4081 = vtanh.f32 %v1892_v63  ;;  %v1225_v47 = vadd.f32 %v5308_v13, %v5164_v33  ;;  %v5748_v40 = vld [vmem:[#allocation26_spill] sm:$0xff]  ;;  %v5749_v58 = vld [vmem:[#allocation37_spill] sm:$0xff] }
 0x1cc   :  { %v4068_v30 = vpop.eup %4067  ;;  %v2689_v12 = vmul.f32 0.25, %v2639_v5  ;;  %v2540_v52 = vadd.f32 %v2390_v27, %v5745_v50  ;;  %v2388_v16 = vadd.f32 0.5, %v2188_v22  ;;  %v2288_v44 = vmul.f32 0.5, %v4066_v57 }
 0x1cd   :  { %v4070_v25 = vpop.eup %4069  ;;  %v2637_v55 = vadd.f32 %v2587_v37, %v2487_v48  ;;  %v2490_v29 = vadd.f32 0.5, %v2290_v0  ;;  %v2193_v39 = vmul.f32 0.5, %v4068_v30  ;;  %4083 = vtanh.f32 %v1797_v60  ;;  %v5750_v0 = vld [vmem:[#allocation28_spill] sm:$0xff] }
 0x1ce   :  { %v4072_v6 = vpop.eup %4071  ;;  %v2538_v9 = vadd.f32 %v2388_v16, %v5746_v26  ;;  %v2590_v14 = vadd.f32 %v2540_v52, %v5747_v8  ;;  %v2488_v59 = vadd.f32 0.5, %v2288_v44  ;;  %v2191_v54 = vmul.f32 0.5, %v4070_v25  ;;  %v5751_v16 = vld [vmem:[#allocation40_spill] sm:$0xff] }
 0x1cf   :  { %v4074_v34 = vpop.eup %4073  ;;  %v2687_v33 = vmul.f32 0.25, %v2637_v55  ;;  %v2393_v51 = vadd.f32 0.5, %v2193_v39  ;;  %v2293_v18 = vmul.f32 0.5, %v4072_v6  ;;  %v1795_v21 = vmul.f32 0.5, %v1225_v47  ;;  %v5752_v6 = vld [vmem:[#allocation41_spill] sm:$0xff] }
 0x1d0   :  { %v4076_v41 = vpop.eup %4075  ;;  %v2640_v20 = vadd.f32 %v2590_v14, %v2490_v29  ;;  %v2588_v10 = vadd.f32 %v2538_v9, %v5748_v40  ;;  %v2391_v37 = vadd.f32 0.5, %v2191_v54  ;;  %v2194_v63 = vmul.f32 0.5, %v4074_v34  ;;  %v5753_v9 = vld [vmem:[#allocation30_spill] sm:$0xff] }
 0x1d1   :  { %v2543_v5 = vadd.f32 %v2393_v51, %v5749_v58  ;;  %v2493_v27 = vadd.f32 0.5, %v2293_v18  ;;  %v2291_v22 = vmul.f32 0.5, %v4076_v41  ;;  %4085 = vtanh.f32 %v1795_v21  ;;  %v5754_v41 = vld [vmem:[#allocation43_spill] sm:$0xff] }
 0x1d2   :  { %v4078_v60 = vpop.eup %4077  ;;  %v2690_v57 = vmul.f32 0.25, %v2640_v20  ;;  %v2638_v48 = vadd.f32 %v2588_v10, %v2488_v59  ;;  %v2541_v30 = vadd.f32 %v2391_v37, %v5750_v0  ;;  %v2394_v50 = vadd.f32 0.5, %v2194_v63  ;;  %v5755_v10 = vld [vmem:[#allocation31_spill] sm:$0xff] }
 0x1d3   :  { %v4080_v52 = vpop.eup %4079  ;;  %v2593_v47 = vadd.f32 %v2543_v5, %v5751_v16  ;;  %v2491_v44 = vadd.f32 0.5, %v2291_v22  ;;  %v2192_v25 = vmul.f32 0.5, %v4078_v60  ;;  %v1633_v55 = vadd.f32 %v5308_v13, %v5160_v15  ;;  %v5756_v60 = vld [vmem:[#allocation34_spill] sm:$0xff] }
 0x1d4   :  { %v3235_v29 = vpack.c.bf16 %v2690_v57, %v2689_v12  ;;  %v2688_v39 = vmul.f32 0.25, %v2638_v48  ;;  %v2544_v26 = vadd.f32 %v2394_v50, %v5752_v6  ;;  %v2591_v8 = vadd.f32 %v2541_v30, %v5753_v9 }
 0x1d5   :  { %v4082_v14 = vpop.eup %4081  ;;  %v2643_v54 = vadd.f32 %v2593_v47, %v2493_v27  ;;  %v2392_v59 = vadd.f32 0.5, %v2192_v25  ;;  %v2294_v34 = vmul.f32 0.5, %v4080_v52  ;;  %v1897_v51 = vmul.f32 0.5, %v1633_v55 }
 0x1d6   :  { %3316 = vst [vmem:[%s5602_s3 + $0x50] sm:$0xff] %v3235_v29   ;;  %v3230_v18 = vpack.c.bf16 %v2688_v39, %v2687_v33  ;;  %v2641_v21 = vadd.f32 %v2591_v8, %v2491_v44  ;;  %v2594_v20 = vadd.f32 %v2544_v26, %v5754_v41  ;;  %v2292_v15 = vmul.f32 0.5, %v4082_v14  ;;  %v5757_v29 = vld [vmem:[#allocation45_spill] sm:$0xff]  ;;  %v5758_v14 = vld [vmem:[#allocation48_spill] sm:$0xff] }
 0x1d7   :  { %v4084_v12 = vpop.eup %4083  ;;  %v2693_v40 = vmul.f32 0.25, %v2643_v54  ;;  %v2542_v37 = vadd.f32 %v2392_v59, %v5755_v10  ;;  %v2494_v63 = vadd.f32 0.5, %v2294_v34  ;;  %4087 = vtanh.f32 %v1897_v51  ;;  %v5759_v51 = vld [vmem:[#allocation36_spill] sm:$0xff] }
 0x1d8   :  { %3315 = vst [vmem:[%s5602_s3 + $0x48] sm:$0xff] %v3230_v18   ;;  %v2691_v58 = vmul.f32 0.25, %v2641_v21  ;;  %v2492_v5 = vadd.f32 0.5, %v2292_v15  ;;  %v2197_v27 = vmul.f32 0.5, %v4084_v12  ;;  %v1236_v33 = vadd.f32 %v5308_v13, %v5168_v23 }
 0x1d9   :  { %v2644_v22 = vadd.f32 %v2594_v20, %v2494_v63  ;;  %v2592_v57 = vadd.f32 %v2542_v37, %v5756_v60  ;;  %v1625_v48 = vadd.f32 %v5308_v13, %v5166_v3  ;;  %v1228_v0 = vadd.f32 %v5308_v13, %v5173_v35 }
 0x1da   :  { %v2397_v30 = vadd.f32 0.5, %v2197_v27  ;;  %v1798_v50 = vmul.f32 0.5, %v1236_v33  ;;  %v1636_v52 = vadd.f32 %v5308_v13, %v5170_v7  ;;  %v1628_v16 = vadd.f32 %v5308_v13, %v5175_v1 }
 0x1db   :  { %v4086_v47 = vpop.eup %4085  ;;  %v2694_v44 = vmul.f32 0.25, %v2644_v22  ;;  %v2642_v23 = vadd.f32 %v2592_v57, %v2492_v5  ;;  %v1895_v25 = vmul.f32 0.5, %v1625_v48  ;;  %v1796_v55 = vmul.f32 0.5, %v1228_v0 }
 0x1dc   :  { %v2547_v39 = vadd.f32 %v2397_v30, %v5757_v29  ;;  %v2195_v6 = vmul.f32 0.5, %v4086_v47  ;;  %4089 = vtanh.f32 %v1798_v50  ;;  %v1898_v3 = vmul.f32 0.5, %v1636_v52  ;;  %v5761_v47 = vld [vmem:[#allocation2_spill] sm:$0xff] }
 0x1dd   :  { %v3245_v26 = vpack.c.bf16 %v2694_v44, %v2693_v40  ;;  %v2692_v35 = vmul.f32 0.25, %v2642_v23  ;;  %4091 = vtanh.f32 %v1895_v25  ;;  %v1896_v9 = vmul.f32 0.5, %v1628_v16  ;;  %v5760_v40 = vld [vmem:[#allocation38_spill] sm:$0xff]  ;;  %v5762_v25 = vld [vmem:[#allocation8_spill] sm:$0xff] }
 0x1de   :  { %v2395_v8 = vadd.f32 0.5, %v2195_v6  ;;  %v2597_v7 = vadd.f32 %v2547_v39, %v5758_v14  ;;  %4093 = vtanh.f32 %v1796_v55  ;;  %v1249_v1 = vadd.f32 %v5308_v13, %v5185_v32 }
 0x1df   :  { %3318 = vst [vmem:[%s5602_s3 + $0x60] sm:$0xff] %v3245_v26   ;;  %v3240_v54 = vpack.c.bf16 %v2692_v35, %v2691_v58  ;;  %4095 = vtanh.f32 %v1898_v3  ;;  %v1241_v59 = vadd.f32 %v5308_v13, %v5190_v45  ;;  %v1649_v34 = vadd.f32 %v5308_v13, %v5187_v43  ;;  %v5763_v26 = vld [vmem:[#allocation49_spill] sm:$0xff] }
 0x1e0   :  { %v2545_v18 = vadd.f32 %v2395_v8, %v5759_v51  ;;  %4097 = vtanh.f32 %v1896_v9  ;;  %v1801_v21 = vmul.f32 0.5, %v1249_v1  ;;  %v1252_v41 = vadd.f32 %v5308_v13, %v5202_v61 }
 0x1e1   :  { %v4088_v32 = vpop.eup %4087  ;;  %3317 = vst [vmem:[%s5602_s3 + $0x58] sm:$0xff] %v3240_v54   ;;  %v1799_v20 = vmul.f32 0.5, %v1241_v59  ;;  %v1901_v15 = vmul.f32 0.5, %v1649_v34  ;;  %v1641_v45 = vadd.f32 %v5308_v13, %v5192_v42  ;;  %v1244_v43 = vadd.f32 %v5308_v13, %v5211_v4  ;;  %v5764_v34 = vld [vmem:[#allocation39_spill] sm:$0xff] }
 0x1e2   :  { %v2297_v12 = vmul.f32 0.5, %v4088_v32  ;;  %v2595_v10 = vadd.f32 %v2545_v18, %v5760_v40  ;;  %4099 = vtanh.f32 %v1801_v21  ;;  %v1802_v37 = vmul.f32 0.5, %v1252_v41  ;;  %v5765_v18 = vld [vmem:[#allocation51_spill] sm:$0xff] }
 0x1e3   :  { %4101 = vtanh.f32 %v1799_v20  ;;  %v1899_v61 = vmul.f32 0.5, %v1641_v45  ;;  %v1800_v63 = vmul.f32 0.5, %v1244_v43  ;;  %v1652_v58 = vadd.f32 %v5308_v13, %v5204_v24 }
 0x1e4   :  { %v2497_v5 = vadd.f32 0.5, %v2297_v12  ;;  %4103 = vtanh.f32 %v1901_v15  ;;  %v1644_v27 = vadd.f32 %v5308_v13, %v5213_v49  ;;  %v1265_v42 = vadd.f32 %v5308_v13, %v5225_v36 }
 0x1e5   :  { %4105 = vtanh.f32 %v1802_v37  ;;  %v1902_v4 = vmul.f32 0.5, %v1652_v58  ;;  %v1257_v33 = vadd.f32 %v5308_v13, %v5233_v62  ;;  %v1665_v22 = vadd.f32 %v5308_v13, %v5227_v56 }
 0x1e6   :  { %v4090_v60 = vpop.eup %4089  ;;  %v2647_v57 = vadd.f32 %v2597_v7, %v2497_v5  ;;  %4107 = vtanh.f32 %v1899_v61  ;;  %v1900_v24 = vmul.f32 0.5, %v1644_v27  ;;  %v1805_v48 = vmul.f32 0.5, %v1265_v42 }
 0x1e7   :  { %v4092_v0 = vpop.eup %4091  ;;  %v2198_v30 = vmul.f32 0.5, %v4090_v60  ;;  %4109 = vtanh.f32 %v1800_v63  ;;  %v1803_v49 = vmul.f32 0.5, %v1257_v33  ;;  %v1905_v50 = vmul.f32 0.5, %v1665_v22  ;;  %v5767_v60 = vld [vmem:[#allocation53_spill] sm:$0xff] }
 0x1e8   :  { %v4094_v52 = vpop.eup %4093  ;;  %v5452_v36 = vmul.f32 0.25, %v2647_v57  ;;  %v2295_v16 = vmul.f32 0.5, %v4092_v0  ;;  %4111 = vtanh.f32 %v1902_v4  ;;  %v1268_v62 = vadd.f32 %v5308_v13, %v5761_v47  ;;  %v5768_v0 = vld [vmem:[#allocation44_spill] sm:$0xff] }
 0x1e9   :  { %v4096_v44 = vpop.eup %4095  ;;  %v2398_v56 = vadd.f32 0.5, %v2198_v30  ;;  %v2196_v23 = vmul.f32 0.5, %v4094_v52  ;;  %4113 = vtanh.f32 %v1900_v24  ;;  %v1657_v55 = vadd.f32 %v5308_v13, %v5762_v25  ;;  %v5770_v25 = vld [vmem:[#allocation57_spill] sm:$0xff] }
 0x1ea   :  { %v4098_v29 = vpop.eup %4097  ;;  %v2495_v39 = vadd.f32 0.5, %v2295_v16  ;;  %v2298_v6 = vmul.f32 0.5, %v4096_v44  ;;  %4115 = vtanh.f32 %v1805_v48  ;;  %v1806_v3 = vmul.f32 0.5, %v1268_v62  ;;  %v5769_v62 = vld [vmem:[#allocation56_spill] sm:$0xff] }
 0x1eb   :  { %v2548_v35 = vadd.f32 %v2398_v56, %v5763_v26  ;;  %v2396_v9 = vadd.f32 0.5, %v2196_v23  ;;  %v2296_v8 = vmul.f32 0.5, %v4098_v29  ;;  %4117 = vtanh.f32 %v1803_v49 }
 0x1ec   :  { %v4100_v14 = vpop.eup %4099  ;;  %v2645_v7 = vadd.f32 %v2595_v10, %v2495_v39  ;;  %v2498_v1 = vadd.f32 0.5, %v2298_v6  ;;  %4119 = vtanh.f32 %v1905_v50  ;;  %v1903_v54 = vmul.f32 0.5, %v1657_v55  ;;  %v5766_v10 = vld [vmem:[#allocation42_spill] sm:$0xff] }
 0x1ed   :  { %v4102_v59 = vpop.eup %4101  ;;  %v2546_v51 = vadd.f32 %v2396_v9, %v5764_v34  ;;  %v2598_v21 = vadd.f32 %v2548_v35, %v5765_v18  ;;  %v2496_v41 = vadd.f32 0.5, %v2296_v8  ;;  %v2201_v32 = vmul.f32 0.5, %v4100_v14  ;;  %v5771_v39 = vld [vmem:[#allocation46_spill] sm:$0xff] }
 0x1ee   :  { %v4104_v20 = vpop.eup %4103  ;;  %v2695_v15 = vmul.f32 0.25, %v2645_v7  ;;  %v2199_v45 = vmul.f32 0.5, %v4102_v59  ;;  %4121 = vtanh.f32 %v1806_v3  ;;  %v1260_v43 = vadd.f32 %v5308_v13, %v5246_v38  ;;  %v5773_v59 = vld [vmem:[#allocation59_spill] sm:$0xff] }
 0x1ef   :  { %v4106_v12 = vpop.eup %4105  ;;  %v2648_v40 = vadd.f32 %v2598_v21, %v2498_v1  ;;  %v2596_v37 = vadd.f32 %v2546_v51, %v5766_v10  ;;  %v2401_v61 = vadd.f32 0.5, %v2201_v32  ;;  %v2301_v63 = vmul.f32 0.5, %v4104_v20  ;;  %v5772_v1 = vld [vmem:[#allocation47_spill] sm:$0xff] }
 0x1f0   :  { %v4108_v58 = vpop.eup %4107  ;;  %v2399_v5 = vadd.f32 0.5, %v2199_v45  ;;  %v2202_v27 = vmul.f32 0.5, %v4106_v12  ;;  %4123 = vtanh.f32 %v1903_v54  ;;  %v1804_v42 = vmul.f32 0.5, %v1260_v43  ;;  %v5774_v43 = vld [vmem:[#allocation50_spill] sm:$0xff] }
 0x1f1   :  { %v4110_v4 = vpop.eup %4109  ;;  %v2698_v33 = vmul.f32 0.25, %v2648_v40  ;;  %v2646_v22 = vadd.f32 %v2596_v37, %v2496_v41  ;;  %v2551_v57 = vadd.f32 %v2401_v61, %v5767_v60  ;;  %v2501_v24 = vadd.f32 0.5, %v2301_v63  ;;  %v5777_v60 = vld [vmem:[#allocation52_spill] sm:$0xff] }
 0x1f2   :  { %v4112_v48 = vpop.eup %4111  ;;  %v2549_v38 = vadd.f32 %v2399_v5, %v5768_v0  ;;  %v2402_v30 = vadd.f32 0.5, %v2202_v27  ;;  %v2299_v49 = vmul.f32 0.5, %v4108_v58  ;;  %v2200_v50 = vmul.f32 0.5, %v4110_v4  ;;  %v5775_v27 = vld [vmem:[#allocation61_spill] sm:$0xff] }
 0x1f3   :  { %v4114_v52 = vpop.eup %4113  ;;  %v3255_v16 = vpack.c.bf16 %v2698_v33, %v5452_v36  ;;  %v2696_v47 = vmul.f32 0.25, %v2646_v22  ;;  %v2601_v44 = vadd.f32 %v2551_v57, %v5769_v62  ;;  %v2302_v56 = vmul.f32 0.5, %v4112_v48  ;;  %v5776_v33 = vld [vmem:[#allocation9_spill] sm:$0xff] }
 0x1f4   :  { %v4116_v23 = vpop.eup %4115  ;;  %v2552_v55 = vadd.f32 %v2402_v30, %v5770_v25  ;;  %v2499_v29 = vadd.f32 0.5, %v2299_v49  ;;  %v2599_v6 = vadd.f32 %v2549_v38, %v5771_v39  ;;  %v2400_v3 = vadd.f32 0.5, %v2200_v50  ;;  %v5778_v0 = vld [vmem:[#allocation69_spill] sm:$0xff]  ;;  %v5779_v50 = vld [vmem:[#allocation64_spill] sm:$0xff] }
 0x1f5   :  { %v4118_v26 = vpop.eup %4117  ;;  %3320 = vst [vmem:[%s5602_s3 + $0x70] sm:$0xff] %v3255_v16   ;;  %v3250_v35 = vpack.c.bf16 %v2696_v47, %v2695_v15  ;;  %v2651_v9 = vadd.f32 %v2601_v44, %v2501_v24  ;;  %v2502_v8 = vadd.f32 0.5, %v2302_v56  ;;  %v2300_v36 = vmul.f32 0.5, %v4114_v52  ;;  %v5780_v16 = vld [vmem:[#allocation65_spill] sm:$0xff]  ;;  %v5781_v44 = vld [vmem:[#allocation54_spill] sm:$0xff] }
 0x1f6   :  { %v4120_v14 = vpop.eup %4119  ;;  %v2649_v7 = vadd.f32 %v2599_v6, %v2499_v29  ;;  %v2550_v54 = vadd.f32 %v2400_v3, %v5772_v1  ;;  %v2602_v34 = vadd.f32 %v2552_v55, %v5773_v59  ;;  %v2205_v51 = vmul.f32 0.5, %v4116_v23  ;;  %v5782_v29 = vld [vmem:[#allocation70_spill] sm:$0xff]  ;;  %v5783_v3 = vld [vmem:[#allocation67_spill] sm:$0xff]  ;;  %v5786_v1 = vld [vmem:[#allocation13_spill] sm:$0xff] }
 0x1f7   :  { %3319 = vst [vmem:[%s5602_s3 + $0x68] sm:$0xff] %v3250_v35   ;;  %v2701_v18 = vmul.f32 0.25, %v2651_v9  ;;  %v2500_v21 = vadd.f32 0.5, %v2300_v36  ;;  %v2203_v41 = vmul.f32 0.5, %v4118_v26  ;;  %v2305_v32 = vmul.f32 0.5, %v4120_v14  ;;  %v5784_v35 = vld [vmem:[#allocation3_spill] sm:$0xff] }
 0x1f8   :  { %v4122_v20 = vpop.eup %4121  ;;  %v2699_v15 = vmul.f32 0.25, %v2649_v7  ;;  %v2652_v45 = vadd.f32 %v2602_v34, %v2502_v8  ;;  %v2600_v12 = vadd.f32 %v2550_v54, %v5774_v43  ;;  %v2405_v40 = vadd.f32 0.5, %v2205_v51  ;;  %v5785_v14 = vld [vmem:[#allocation11_spill] sm:$0xff]  ;;  %v5787_v51 = vld [vmem:[#allocation4_spill] sm:$0xff] }
 0x1f9   :  { %v2403_v10 = vadd.f32 0.5, %v2203_v41  ;;  %v2505_v37 = vadd.f32 0.5, %v2305_v32  ;;  %v2206_v61 = vmul.f32 0.5, %v4122_v20  ;;  %4125 = vtanh.f32 %v1804_v42 }
 0x1fa   :  { %v4124_v63 = vpop.eup %4123  ;;  %v2702_v58 = vmul.f32 0.25, %v2652_v45  ;;  %v2650_v5 = vadd.f32 %v2600_v12, %v2500_v21  ;;  %v2555_v4 = vadd.f32 %v2405_v40, %v5775_v27  ;;  %v1668_v22 = vadd.f32 %v5308_v13, %v5776_v33  ;;  %v5788_v21 = vld [vmem:[#allocation5_spill] sm:$0xff] }
 0x1fb   :  { %v2553_v57 = vadd.f32 %v2403_v10, %v5777_v60  ;;  %v2406_v24 = vadd.f32 0.5, %v2206_v61  ;;  %v2303_v48 = vmul.f32 0.5, %v4124_v63  ;;  %v1660_v38 = vadd.f32 %v5308_v13, %v5778_v0  ;;  %v5790_v10 = vld [vmem:[#allocation93_spill] sm:$0xff] }
 0x1fc   :  { %v3265_v30 = vpack.c.bf16 %v2702_v58, %v2701_v18  ;;  %v2700_v49 = vmul.f32 0.25, %v2650_v5  ;;  %v2605_v52 = vadd.f32 %v2555_v4, %v5779_v50  ;;  %v1906_v42 = vmul.f32 0.5, %v1668_v22  ;;  %v5791_v58 = vld [vmem:[#allocation6_spill] sm:$0xff]  ;;  %v5792_v4 = vld [vmem:[#allocation7_spill] sm:$0xff]  ;;  %v5793_v22 = vld [vmem:[#allocation17_spill] sm:$0xff] }
 0x1fd   :  { %v2556_v47 = vadd.f32 %v2406_v24, %v5780_v16  ;;  %v2503_v62 = vadd.f32 0.5, %v2303_v48  ;;  %v2603_v56 = vadd.f32 %v2553_v57, %v5781_v44  ;;  %v1904_v23 = vmul.f32 0.5, %v1660_v38  ;;  %v5794_v48 = vld [vmem:[#allocation10_spill] sm:$0xff] }
 0x1fe   :  { %3322 = vst [vmem:[%s5602_s3 + $0x80] sm:$0xff] %v3265_v30   ;;  %v3260_v25 = vpack.c.bf16 %v2700_v49, %v2699_v15  ;;  %v2655_v55 = vadd.f32 %v2605_v52, %v2505_v37  ;;  %4127 = vtanh.f32 %v1906_v42  ;;  %v1281_v39 = vadd.f32 %v5308_v13, %v5782_v29  ;;  %v5789_v15 = vld [vmem:[#allocation16_spill] sm:$0xff]  ;;  %v5795_v49 = vld [vmem:[#allocation19_spill] sm:$0xff] }
 0x1ff   :  { %v2653_v6 = vadd.f32 %v2603_v56, %v2503_v62  ;;  %v2606_v26 = vadd.f32 %v2556_v47, %v5783_v3  ;;  %4129 = vtanh.f32 %v1904_v23  ;;  %v1273_v9 = vadd.f32 %v5308_v13, %v5784_v35  ;;  %v5796_v42 = vld [vmem:[#allocation55_spill] sm:$0xff] }
 0x200   :  { %3321 = vst [vmem:[%s5602_s3 + $0x78] sm:$0xff] %v3260_v25   ;;  %v5499_v8 = vmul.f32 0.25, %v2655_v55  ;;  %v1809_v36 = vmul.f32 0.5, %v1281_v39  ;;  %v1681_v7 = vadd.f32 %v5308_v13, %v5785_v14  ;;  %v1284_v54 = vadd.f32 %v5308_v13, %v5786_v1  ;;  %v5797_v62 = vld [vmem:[#allocation95_spill] sm:$0xff]  ;;  %v5798_v55 = vld [vmem:[#allocation94_spill] sm:$0xff]  ;;  %v5800_v14 = vld [vmem:[#allocation96_spill] sm:$0xff] }
 0x201   :  { %v5505_v59 = vmul.f32 0.25, %v2653_v6  ;;  %v1807_v34 = vmul.f32 0.5, %v1273_v9  ;;  %v1673_v18 = vadd.f32 %v5308_v13, %v5787_v51  ;;  %v1276_v41 = vadd.f32 %v5308_v13, %v5788_v21  ;;  %v5799_v6 = vld [vmem:[#allocation58_spill] sm:$0xff] }
 0x202   :  { %4131 = vtanh.f32 %v1809_v36  ;;  %v1909_v32 = vmul.f32 0.5, %v1681_v7  ;;  %v1810_v20 = vmul.f32 0.5, %v1284_v54  ;;  %v1684_v45 = vadd.f32 %v5308_v13, %v5789_v15 }
 0x203   :  { %v4126_v43 = vpop.eup %4125  ;;  %4133 = vtanh.f32 %v1807_v34  ;;  %v1907_v12 = vmul.f32 0.5, %v1673_v18  ;;  %v1808_v40 = vmul.f32 0.5, %v1276_v41  ;;  %v1676_v37 = vadd.f32 %v5308_v13, %v5790_v10 }
 0x204   :  { %v2204_v61 = vmul.f32 0.5, %v4126_v43  ;;  %4135 = vtanh.f32 %v1909_v32  ;;  %v1910_v63 = vmul.f32 0.5, %v1684_v45  ;;  %v1297_v5 = vadd.f32 %v5308_v13, %v5791_v58  ;;  %v5801_v58 = vld [vmem:[#allocation72_spill] sm:$0xff] }
 0x205   :  { %4137 = vtanh.f32 %v1810_v20  ;;  %v1908_v27 = vmul.f32 0.5, %v1676_v37  ;;  %v1289_v33 = vadd.f32 %v5308_v13, %v5792_v4  ;;  %v1697_v60 = vadd.f32 %v5308_v13, %v5793_v22 }
 0x206   :  { %v2404_v57 = vadd.f32 0.5, %v2204_v61  ;;  %4139 = vtanh.f32 %v1907_v12  ;;  %v1813_v24 = vmul.f32 0.5, %v1297_v5  ;;  %v1300_v0 = vadd.f32 %v5308_v13, %v5794_v48 }
 0x207   :  { %4141 = vtanh.f32 %v1808_v40  ;;  %v1811_v38 = vmul.f32 0.5, %v1289_v33  ;;  %v1913_v30 = vmul.f32 0.5, %v1697_v60  ;;  %v1689_v50 = vadd.f32 %v5308_v13, %v5795_v49  ;;  %v5802_v60 = vld [vmem:[#allocation60_spill] sm:$0xff] }
 0x208   :  { %v4128_v52 = vpop.eup %4127  ;;  %v2554_v16 = vadd.f32 %v2404_v57, %v5796_v42  ;;  %4143 = vtanh.f32 %v1910_v63  ;;  %v1814_v47 = vmul.f32 0.5, %v1300_v0  ;;  %v1292_v44 = vadd.f32 %v5308_v13, %v5797_v62  ;;  %v5805_v42 = vld [vmem:[#allocation62_spill] sm:$0xff] }
 0x209   :  { %v4130_v56 = vpop.eup %4129  ;;  %v2306_v23 = vmul.f32 0.5, %v4128_v52  ;;  %4145 = vtanh.f32 %v1908_v27  ;;  %v1911_v25 = vmul.f32 0.5, %v1689_v50  ;;  %v1700_v29 = vadd.f32 %v5308_v13, %v5798_v55 }
 0x20a   :  { %v2304_v39 = vmul.f32 0.5, %v4130_v56  ;;  %v2604_v3 = vadd.f32 %v2554_v16, %v5799_v6  ;;  %4147 = vtanh.f32 %v1813_v24  ;;  %v1812_v35 = vmul.f32 0.5, %v1292_v44 }
 0x20b   :  { %v2506_v9 = vadd.f32 0.5, %v2306_v23  ;;  %4149 = vtanh.f32 %v1811_v38  ;;  %v1914_v36 = vmul.f32 0.5, %v1700_v29  ;;  %v1692_v7 = vadd.f32 %v5308_v13, %v5800_v14  ;;  %v5803_v38 = vld [vmem:[#allocation75_spill] sm:$0xff] }
 0x20c   :  { %v4132_v1 = vpop.eup %4131  ;;  %v2504_v54 = vadd.f32 0.5, %v2304_v39  ;;  %4151 = vtanh.f32 %v1913_v30  ;;  %v1313_v34 = vadd.f32 %v5308_v13, %v5327_v53  ;;  %v5537_v51 = vadd.f32 %v5308_v13, %v5332_v2  ;;  %v5806_v39 = vld [vmem:[#allocation63_spill] sm:$0xff] }
 0x20d   :  { %v4134_v18 = vpop.eup %4133  ;;  %v2656_v21 = vadd.f32 %v2606_v26, %v2506_v9  ;;  %v2209_v41 = vmul.f32 0.5, %v4132_v1  ;;  %4153 = vtanh.f32 %v1814_v47  ;;  %v1912_v32 = vmul.f32 0.5, %v1692_v7 }
 0x20e   :  { %v4136_v20 = vpop.eup %4135  ;;  %v2654_v15 = vadd.f32 %v2604_v3, %v2504_v54  ;;  %v2207_v45 = vmul.f32 0.5, %v4134_v18  ;;  %4155 = vtanh.f32 %v1911_v25  ;;  %v1817_v43 = vmul.f32 0.5, %v1313_v34  ;;  %v5807_v3 = vld [vmem:[#allocation80_spill] sm:$0xff] }
 0x20f   :  { %v4138_v12 = vpop.eup %4137  ;;  %v2706_v40 = vmul.f32 0.25, %v2656_v21  ;;  %v2409_v10 = vadd.f32 0.5, %v2209_v41  ;;  %v2309_v37 = vmul.f32 0.5, %v4136_v20  ;;  %4157 = vtanh.f32 %v1812_v35  ;;  %v5808_v41 = vld [vmem:[#allocation66_spill] sm:$0xff] }
 0x210   :  { %v4140_v53 = vpop.eup %4139  ;;  %v2704_v61 = vmul.f32 0.25, %v2654_v15  ;;  %v2407_v63 = vadd.f32 0.5, %v2207_v45  ;;  %v2210_v13 = vmul.f32 0.5, %v4138_v12  ;;  %4159 = vtanh.f32 %v1914_v36  ;;  %v5809_v45 = vld [vmem:[#allocation81_spill] sm:$0xff] }
 0x211   :  { %v4142_v2 = vpop.eup %4141  ;;  %v3275_v26 = vpack.c.bf16 %v2706_v40, %v5499_v8  ;;  %v2559_v5 = vadd.f32 %v2409_v10, %v5801_v58  ;;  %v2509_v27 = vadd.f32 0.5, %v2309_v37  ;;  %v2307_v4 = vmul.f32 0.5, %v4140_v53  ;;  %v5811_v58 = vld [vmem:[#allocation82_spill] sm:$0xff] }
 0x212   :  { %v4144_v33 = vpop.eup %4143  ;;  %v3270_v22 = vpack.c.bf16 %v2704_v61, %v5505_v59  ;;  %v2557_v57 = vadd.f32 %v2407_v63, %v5802_v60  ;;  %v2410_v24 = vadd.f32 0.5, %v2210_v13  ;;  %v2208_v48 = vmul.f32 0.5, %v4142_v2  ;;  %v5804_v59 = vld [vmem:[#allocation76_spill] sm:$0xff]  ;;  %v5812_v60 = vld [vmem:[#allocation83_spill] sm:$0xff] }
 0x213   :  { %v4146_v0 = vpop.eup %4145  ;;  %3324 = vst [vmem:[%s5602_s3 + $0x90] sm:$0xff] %v3275_v26   ;;  %v2609_v30 = vadd.f32 %v2559_v5, %v5803_v38  ;;  %v2507_v49 = vadd.f32 0.5, %v2307_v4  ;;  %v2310_v8 = vmul.f32 0.5, %v4144_v33  ;;  %4161 = vtanh.f32 %v1912_v32  ;;  %v5810_v2 = vld [vmem:[#allocation68_spill] sm:$0xff]  ;;  %v5813_v38 = vld [vmem:[#allocation73_spill] sm:$0xff] }
 0x214   :  { %v4148_v50 = vpop.eup %4147  ;;  %3323 = vst [vmem:[%s5602_s3 + $0x88] sm:$0xff] %v3270_v22   ;;  %v2560_v52 = vadd.f32 %v2410_v24, %v5804_v59  ;;  %v2607_v16 = vadd.f32 %v2557_v57, %v5805_v42  ;;  %v2408_v47 = vadd.f32 0.5, %v2208_v48  ;;  %v2308_v62 = vmul.f32 0.5, %v4146_v0  ;;  %v5814_v59 = vld [vmem:[#allocation74_spill] sm:$0xff]  ;;  %v5815_v42 = vld [vmem:[#allocation85_spill] sm:$0xff] }
 0x215   :  { %v4150_v44 = vpop.eup %4149  ;;  %v2659_v56 = vadd.f32 %v2609_v30, %v2509_v27  ;;  %v2510_v23 = vadd.f32 0.5, %v2310_v8  ;;  %v2213_v25 = vmul.f32 0.5, %v4148_v50  ;;  %4163 = vtanh.f32 %v1817_v43 }
 0x216   :  { %v4152_v55 = vpop.eup %4151  ;;  %v2657_v29 = vadd.f32 %v2607_v16, %v2507_v49  ;;  %v2558_v6 = vadd.f32 %v2408_v47, %v5806_v39  ;;  %v2610_v35 = vadd.f32 %v2560_v52, %v5807_v3  ;;  %v2508_v9 = vadd.f32 0.5, %v2308_v62 }
 0x217   :  { %v4154_v36 = vpop.eup %4153  ;;  %v2709_v14 = vmul.f32 0.25, %v2659_v56  ;;  %v2413_v7 = vadd.f32 0.5, %v2213_v25  ;;  %v2211_v1 = vmul.f32 0.5, %v4150_v44  ;;  %v2313_v54 = vmul.f32 0.5, %v4152_v55 }
 0x218   :  { %v4156_v34 = vpop.eup %4155  ;;  %v2707_v18 = vmul.f32 0.25, %v2657_v29  ;;  %v2660_v21 = vadd.f32 %v2610_v35, %v2510_v23  ;;  %v2608_v32 = vadd.f32 %v2558_v6, %v5808_v41  ;;  %v2214_v20 = vmul.f32 0.5, %v4154_v36  ;;  %v4181_v23 = vld [vmem:[%s5601_s2] ss:$0 sm:$0xff]  ;;  %v5816_v29 = vld [vmem:[#allocation77_spill] sm:$0xff] }
 0x219   :  { %v4158_v15 = vpop.eup %4157  ;;  %v2563_v43 = vadd.f32 %v2413_v7, %v5809_v45  ;;  %v2411_v12 = vadd.f32 0.5, %v2211_v1  ;;  %v2513_v40 = vadd.f32 0.5, %v2313_v54  ;;  %v2311_v10 = vmul.f32 0.5, %v4156_v34 }
 0x21a   :  { %v4160_v37 = vpop.eup %4159  ;;  %v2710_v53 = vmul.f32 0.25, %v2660_v21  ;;  %v2658_v61 = vadd.f32 %v2608_v32, %v2508_v9  ;;  %v2414_v63 = vadd.f32 0.5, %v2214_v20  ;;  %v2212_v13 = vmul.f32 0.5, %v4158_v15  ;;  %v5817_v32 = vld [vmem:[#allocation87_spill] sm:$0xff] }
 0x21b   :  { %v2561_v26 = vadd.f32 %v2411_v12, %v5810_v2  ;;  %v2613_v5 = vadd.f32 %v2563_v43, %v5811_v58  ;;  %v2511_v27 = vadd.f32 0.5, %v2311_v10  ;;  %v2314_v4 = vmul.f32 0.5, %v4160_v37 }
 0x21c   :  { %v3285_v33 = vpack.c.bf16 %v2710_v53, %v2709_v14  ;;  %v2708_v22 = vmul.f32 0.25, %v2658_v61  ;;  %v2564_v57 = vadd.f32 %v2414_v63, %v5812_v60  ;;  %v2412_v24 = vadd.f32 0.5, %v2212_v13 }
 0x21d   :  { %v4162_v48 = vpop.eup %4161  ;;  %v2663_v0 = vadd.f32 %v2613_v5, %v2513_v40  ;;  %v2611_v30 = vadd.f32 %v2561_v26, %v5813_v38  ;;  %v2514_v49 = vadd.f32 0.5, %v2314_v4  ;;  %v1815_v8 = vmul.f32 0.5, %v5537_v51  ;;  %v5821_v26 = vld [vmem:[#allocation86_spill] sm:$0xff] }
 0x21e   :  { %3326 = vst [vmem:[%s5602_s3 + $0xa0] sm:$0xff] %v3285_v33   ;;  %v3280_v50 = vpack.c.bf16 %v2708_v22, %v2707_v18  ;;  %v2562_v52 = vadd.f32 %v2412_v24, %v5814_v59  ;;  %v2614_v16 = vadd.f32 %v2564_v57, %v5815_v42  ;;  %v2312_v47 = vmul.f32 0.5, %v4162_v48  ;;  %v5822_v33 = vld [vmem:[#allocation79_spill] sm:$0xff]  ;;  %v5823_v57 = vld [vmem:[#allocation92_spill] sm:$0xff] }
 0x21f   :  { %v4164_v62 = vpop.eup %4163  ;;  %v2713_v44 = vmul.f32 0.25, %v2663_v0  ;;  %v2661_v56 = vadd.f32 %v2611_v30, %v2511_v27  ;;  %4165 = vtanh.f32 %v1815_v8  ;;  %v1713_v51 = vadd.f32 %v4181_v23, %v5329_v28 }
 0x220   :  { %3325 = vst [vmem:[%s5602_s3 + $0x98] sm:$0xff] %v3280_v50   ;;  %v2664_v25 = vadd.f32 %v2614_v16, %v2514_v49  ;;  %v2512_v55 = vadd.f32 0.5, %v2312_v47  ;;  %v2612_v39 = vadd.f32 %v2562_v52, %v5816_v29  ;;  %v2217_v6 = vmul.f32 0.5, %v4164_v62  ;;  %v5824_v49 = vld [vmem:[#allocation84_spill] sm:$0xff] }
 0x221   :  { %v2711_v3 = vmul.f32 0.25, %v2661_v56  ;;  %v1917_v35 = vmul.f32 0.5, %v1713_v51  ;;  %v1316_v9 = vadd.f32 %v4181_v23, %v5343_v11  ;;  %v1705_v36 = vadd.f32 %v4181_v23, %v5334_v46 }
 0x222   :  { %v2714_v14 = vmul.f32 0.25, %v2664_v25  ;;  %v2662_v7 = vadd.f32 %v2612_v39, %v2512_v55  ;;  %v2417_v1 = vadd.f32 0.5, %v2217_v6  ;;  %v1308_v28 = vadd.f32 %v4181_v23, %v5351_v19  ;;  %v5818_v19 = vld [vmem:[#allocation88_spill] sm:$0xff] }
 0x223   :  { %4167 = vtanh.f32 %v1917_v35  ;;  %v1818_v54 = vmul.f32 0.5, %v1316_v9  ;;  %v1915_v34 = vmul.f32 0.5, %v1705_v36  ;;  %v1716_v18 = vadd.f32 %v4181_v23, %v5345_v17  ;;  %v5819_v17 = vld [vmem:[#allocation71_spill] sm:$0xff] }
 0x224   :  { %v3295_v21 = vpack.c.bf16 %v2714_v14, %v2713_v44  ;;  %v2712_v41 = vmul.f32 0.25, %v2662_v7  ;;  %v2567_v20 = vadd.f32 %v2417_v1, %v5817_v32  ;;  %v1816_v15 = vmul.f32 0.5, %v1308_v28 }
 0x225   :  { %4169 = vtanh.f32 %v1818_v54  ;;  %v1918_v45 = vmul.f32 0.5, %v1716_v18  ;;  %v1708_v11 = vadd.f32 %v4181_v23, %v5353_v31  ;;  %v2165_v40 = vmul.f32 0.5, %v5819_v17  ;;  %v5820_v31 = vld [vmem:[#allocation78_spill] sm:$0xff] }
 0x226   :  { %3328 = vst [vmem:[%s5602_s3 + $0xb0] sm:$0xff] %v3295_v21   ;;  %v3290_v46 = vpack.c.bf16 %v2712_v41, %v2711_v3  ;;  %v2617_v43 = vadd.f32 %v2567_v20, %v5818_v19  ;;  %4171 = vtanh.f32 %v1915_v34  ;;  %v2265_v37 = vmul.f32 0.5, %v5820_v31 }
 0x227   :  { %4173 = vtanh.f32 %v1816_v15  ;;  %v1916_v12 = vmul.f32 0.5, %v1708_v11  ;;  %v2365_v61 = vadd.f32 0.5, %v2165_v40  ;;  %v2168_v58 = vmul.f32 0.5, %v5821_v26 }
 0x228   :  { %3327 = vst [vmem:[%s5602_s3 + $0xa8] sm:$0xff] %v3290_v46   ;;  %4175 = vtanh.f32 %v1918_v45  ;;  %v2465_v2 = vadd.f32 0.5, %v2265_v37  ;;  %v2166_v22 = vmul.f32 0.5, %v5822_v33  ;;  %v2268_v24 = vmul.f32 0.5, %v5823_v57 }
 0x229   :  { %v4166_v10 = vpop.eup %4165  ;;  %4177 = vtanh.f32 %v1916_v12  ;;  %v2266_v8 = vmul.f32 0.5, %v5824_v49  ;;  %v2368_v52 = vadd.f32 0.5, %v2168_v58 }
 0x22a   :  { %v2215_v53 = vmul.f32 0.5, %v4166_v10  ;;  %v2366_v44 = vadd.f32 0.5, %v2166_v22  ;;  %v2468_v51 = vadd.f32 0.5, %v2268_v24 }
 0x22b   :  { %v2466_v6 = vadd.f32 0.5, %v2266_v8 }
 0x22c   :  { %v2415_v63 = vadd.f32 0.5, %v2215_v53 }
 0x22d   :  { %v4168_v13 = vpop.eup %4167 }
 0x22e   :  { %v2565_v5 = vadd.f32 %v2415_v63, %v2365_v61  ;;  %v2317_v27 = vmul.f32 0.5, %v4168_v13 }
 0x22f   :  { %v4170_v4 = vpop.eup %4169 }
 0x230   :  { %v4172_v60 = vpop.eup %4171  ;;  %v2517_v48 = vadd.f32 0.5, %v2317_v27  ;;  %v2218_v0 = vmul.f32 0.5, %v4170_v4  ;;  %v2615_v38 = vadd.f32 %v2565_v5, %v2465_v2 }
 0x231   :  { %v4174_v30 = vpop.eup %4173  ;;  %v2315_v50 = vmul.f32 0.5, %v4172_v60 }
 0x232   :  { %v4176_v59 = vpop.eup %4175  ;;  %v2667_v42 = vadd.f32 %v2617_v43, %v2517_v48  ;;  %v2418_v16 = vadd.f32 0.5, %v2218_v0  ;;  %v2216_v47 = vmul.f32 0.5, %v4174_v30 }
 0x233   :  { %v4178_v62 = vpop.eup %4177  ;;  %v2515_v56 = vadd.f32 0.5, %v2315_v50  ;;  %v2318_v23 = vmul.f32 0.5, %v4176_v59 }
 0x234   :  { %v2568_v25 = vadd.f32 %v2418_v16, %v2368_v52  ;;  %v2416_v55 = vadd.f32 0.5, %v2216_v47  ;;  %v2316_v29 = vmul.f32 0.5, %v4178_v62  ;;  %v2717_v1 = vmul.f32 0.25, %v2667_v42 }
 0x235   :  { %v2665_v39 = vadd.f32 %v2615_v38, %v2515_v56  ;;  %v2518_v35 = vadd.f32 0.5, %v2318_v23 }
 0x236   :  { %v2566_v3 = vadd.f32 %v2416_v55, %v2366_v44  ;;  %v2618_v9 = vadd.f32 %v2568_v25, %v2468_v51  ;;  %v2516_v14 = vadd.f32 0.5, %v2316_v29 }
 0x237   :  { %v2715_v34 = vmul.f32 0.25, %v2665_v39 }
 0x238   :  { %v2668_v36 = vadd.f32 %v2618_v9, %v2518_v35  ;;  %v2616_v7 = vadd.f32 %v2566_v3, %v2466_v6 }
 0x23a   :  { %v2718_v28 = vmul.f32 0.25, %v2668_v36  ;;  %v2666_v54 = vadd.f32 %v2616_v7, %v2516_v14 }
 0x23c   :  { %v3305_v18 = vpack.c.bf16 %v2718_v28, %v2717_v1  ;;  %v2716_v21 = vmul.f32 0.25, %v2666_v54 }
 0x23e   :  { %3330 = vst [vmem:[%s5602_s3 + $0xc0] sm:$0xff] %v3305_v18   ;;  %v3300_v41 = vpack.c.bf16 %v2716_v21, %v2715_v34 }
 0x240   :  { %3329 = vst [vmem:[%s5602_s3 + $0xb8] sm:$0xff] %v3300_v41  }

// kernel: lenet_forward.4
= control target key start
LH: loop header
LB: loop body
LE: loop exit
PB: predicated region body
PF: predicated region fallthrough
CT: control target
= control target key end

     0   :  { %s1297_s1 = inlined_call_operand.vmem [shape: bf16[256,128], index: 1, kind: input, shape index: {}]   ;;  %s1298_s0 = inlined_call_operand.vmem [shape: bf16[4,64,256], index: 0, kind: input, shape index: {}]   ;;  %s1299_s2 = inlined_call_operand.vmem [shape: f32[1,128], index: 2, kind: input, shape index: {}]   ;;  %s1300_s3 = inlined_call_operand.vmem [shape: bf16[64,128], index: 3, kind: output, shape index: {}]  }
   0x1   :  { %v923_v0 = vld [vmem:[%s1297_s1 + $0x40] sm:$0xff]   ;;  %v925_v2 = vld [vmem:[%s1297_s1 + $0x48] sm:$0xff]   ;;  %v927_v4 = vld [vmem:[%s1297_s1 + $0x50] sm:$0xff]  }
   0x2   :  { %v924_v1 = vld [vmem:[%s1297_s1] sm:$0xff]   ;;  %795 = vmatprep.subr.bf16.mxu0 %v923_v0  ;;  %907 = vmatprep.subr.bf16.mxu1 %v923_v0  ;;  %v926_v3 = vld [vmem:[%s1297_s1 + $0x8] sm:$0xff]   ;;  %v928_v5 = vld [vmem:[%s1297_s1 + $0x10] sm:$0xff]  }
   0x3   :  { %796 = vmatpush3.bf16.msra.mxu0 %v924_v1  ;;  %915 = vmatpush3.bf16.msra.mxu1 %v924_v1  ;;  %v929_v6 = vld [vmem:[%s1297_s1 + $0x58] sm:$0xff]   ;;  %v931_v8 = vld [vmem:[%s1297_s1 + $0x60] sm:$0xff]   ;;  %v933_v10 = vld [vmem:[%s1297_s1 + $0x68] sm:$0xff]  }
   0x4   :  { %797 = vmatprep.subr.bf16.mxu0 %v925_v2  ;;  %908 = vmatprep.subr.bf16.mxu1 %v925_v2  ;;  %v930_v7 = vld [vmem:[%s1297_s1 + $0x18] sm:$0xff]   ;;  %v932_v9 = vld [vmem:[%s1297_s1 + $0x20] sm:$0xff]   ;;  %v934_v13 = vld [vmem:[%s1297_s1 + $0x28] sm:$0xff]  }
   0x5   :  { %v941_v11 = vld [vmem:[%s1298_s0 + $0x4] ss:$8 sps:$4 sm:$0xff]   ;;  %v935_v14 = vld [vmem:[%s1297_s1 + $0x70] sm:$0xff]   ;;  %v937_v16 = vld [vmem:[%s1297_s1 + $0x78] sm:$0xff]  }
   0x6   :  { %v944_v12 = vld [vmem:[%s1298_s0 + $0x84] ss:$8 sps:$4 sm:$0xff]   ;;  %374 = vmatprep.mubr.bf16.mxu0 %v941_v11  ;;  %v936_v15 = vld [vmem:[%s1297_s1 + $0x30] sm:$0xff]   ;;  %v938_v17 = vld [vmem:[%s1297_s1 + $0x38] sm:$0xff]  }
   0x7   :  { %798 = vmatpush3.bf16.msra.mxu0 %v926_v3  ;;  %916 = vmatpush3.bf16.msra.mxu1 %v926_v3  ;;  %v939_v18 = vld [vmem:[%s1298_s0] ss:$8 sps:$4 sm:$0xff]   ;;  %v945_v20 = vld [vmem:[%s1298_s0 + $0x14] ss:$8 sps:$4 sm:$0xff]   ;;  %v947_v22 = vld [vmem:[%s1298_s0 + $0x10] ss:$8 sps:$4 sm:$0xff]  }
   0x8   :  { %799 = vmatprep.subr.bf16.mxu0 %v927_v4  ;;  %909 = vmatprep.subr.bf16.mxu1 %v927_v4  ;;  %v942_v19 = vld [vmem:[%s1298_s0 + $0x80] ss:$8 sps:$4 sm:$0xff]   ;;  %v948_v21 = vld [vmem:[%s1298_s0 + $0x94] ss:$8 sps:$4 sm:$0xff]   ;;  %v950_v23 = vld [vmem:[%s1298_s0 + $0x90] ss:$8 sps:$4 sm:$0xff]  }
   0x9   :  { %438 = vmatprep.mubr.bf16.mxu1 %v944_v12  ;;  %v951_v24 = vld [vmem:[%s1298_s0 + $0x24] ss:$8 sps:$4 sm:$0xff]   ;;  %v953_v26 = vld [vmem:[%s1298_s0 + $0x20] ss:$8 sps:$4 sm:$0xff]   ;;  %v957_v28 = vld [vmem:[%s1298_s0 + $0x34] ss:$8 sps:$4 sm:$0xff]  }
   0xa   :  { %v954_v25 = vld [vmem:[%s1298_s0 + $0xa4] ss:$8 sps:$4 sm:$0xff]   ;;  %v956_v27 = vld [vmem:[%s1298_s0 + $0xa0] ss:$8 sps:$4 sm:$0xff]   ;;  %v960_v29 = vld [vmem:[%s1298_s0 + $0xb4] ss:$8 sps:$4 sm:$0xff]  }
   0xb   :  { %800 = vmatpush3.bf16.msra.mxu0 %v928_v5  ;;  %917 = vmatpush3.bf16.msra.mxu1 %v928_v5  ;;  %v959_v30 = vld [vmem:[%s1298_s0 + $0x30] ss:$8 sps:$4 sm:$0xff]   ;;  %v963_v32 = vld [vmem:[%s1298_s0 + $0x44] ss:$8 sps:$4 sm:$0xff]   ;;  %v965_v34 = vld [vmem:[%s1298_s0 + $0x40] ss:$8 sps:$4 sm:$0xff]  }
   0xc   :  { %801 = vmatprep.subr.bf16.mxu0 %v929_v6  ;;  %910 = vmatprep.subr.bf16.mxu1 %v929_v6  ;;  %v962_v31 = vld [vmem:[%s1298_s0 + $0xb0] ss:$8 sps:$4 sm:$0xff]   ;;  %v966_v33 = vld [vmem:[%s1298_s0 + $0xc4] ss:$8 sps:$4 sm:$0xff]   ;;  %v968_v35 = vld [vmem:[%s1298_s0 + $0xc0] ss:$8 sps:$4 sm:$0xff]  }
   0xd   :  { %v969_v36 = vld [vmem:[%s1298_s0 + $0x54] ss:$8 sps:$4 sm:$0xff]   ;;  %v971_v38 = vld [vmem:[%s1298_s0 + $0x50] ss:$8 sps:$4 sm:$0xff]   ;;  %v975_v40 = vld [vmem:[%s1298_s0 + $0x64] ss:$8 sps:$4 sm:$0xff]  }
   0xe   :  { %v972_v37 = vld [vmem:[%s1298_s0 + $0xd4] ss:$8 sps:$4 sm:$0xff]   ;;  %v974_v39 = vld [vmem:[%s1298_s0 + $0xd0] ss:$8 sps:$4 sm:$0xff]   ;;  %v978_v41 = vld [vmem:[%s1298_s0 + $0xe4] ss:$8 sps:$4 sm:$0xff]  }
   0xf   :  { %802 = vmatpush3.bf16.msra.mxu0 %v930_v7  ;;  %918 = vmatpush3.bf16.msra.mxu1 %v930_v7  ;;  %v977_v42 = vld [vmem:[%s1298_s0 + $0x60] ss:$8 sps:$4 sm:$0xff]   ;;  %v981_v44 = vld [vmem:[%s1298_s0 + $0x74] ss:$8 sps:$4 sm:$0xff]   ;;  %v983_v46 = vld [vmem:[%s1298_s0 + $0x70] ss:$8 sps:$4 sm:$0xff]  }
  0x10   :  { %803 = vmatprep.subr.bf16.mxu0 %v931_v8  ;;  %911 = vmatprep.subr.bf16.mxu1 %v931_v8  ;;  %v980_v43 = vld [vmem:[%s1298_s0 + $0xe0] ss:$8 sps:$4 sm:$0xff]   ;;  %v984_v45 = vld [vmem:[%s1298_s0 + $0xf4] ss:$8 sps:$4 sm:$0xff]   ;;  %v986_v47 = vld [vmem:[%s1298_s0 + $0xf0] ss:$8 sps:$4 sm:$0xff]  }
  0x11   :  { %v1218_v6 = vld [vmem:[%s1299_s2] ss:$0 sm:$0xff] }
  0x13   :  { %804 = vmatpush3.bf16.msra.mxu0 %v932_v9  ;;  %919 = vmatpush3.bf16.msra.mxu1 %v932_v9 }
  0x14   :  { %805 = vmatprep.subr.bf16.mxu0 %v933_v10  ;;  %912 = vmatprep.subr.bf16.mxu1 %v933_v10 }
  0x17   :  { %806 = vmatpush3.bf16.msra.mxu0 %v934_v13  ;;  %920 = vmatpush3.bf16.msra.mxu1 %v934_v13 }
  0x18   :  { %807 = vmatprep.subr.bf16.mxu0 %v935_v14  ;;  %913 = vmatprep.subr.bf16.mxu1 %v935_v14 }
  0x1b   :  { %808 = vmatpush3.bf16.msra.mxu0 %v936_v15  ;;  %921 = vmatpush3.bf16.msra.mxu1 %v936_v15 }
  0x1c   :  { %809 = vmatprep.subr.bf16.mxu0 %v937_v16  ;;  %914 = vmatprep.subr.bf16.mxu1 %v937_v16 }
  0x1f   :  { %810 = vmatpush3.bf16.msra.mxu0 %v938_v17  ;;  %922 = vmatpush3.bf16.msra.mxu1 %v938_v17 }
  0x22   :  { %375 = vmatmul.mubr.bf16.vlgmr.msra.gmra.mrb[0].mxu0 %v939_v18  ;;  %439 = vmatmul.mubr.bf16.vlgmr.msra.gmra.mrb[0].mxu1 %v942_v19 }
  0x23   :  { %382 = vmatprep.mubr.bf16.mxu0 %v945_v20  ;;  %446 = vmatprep.mubr.bf16.mxu1 %v948_v21 }
  0x2a   :  { %383 = vmatmul.mubr.bf16.gmra.mrb[4].mxu0 %v947_v22  ;;  %447 = vmatmul.mubr.bf16.gmra.mrb[4].mxu1 %v950_v23 }
  0x2b   :  { %390 = vmatprep.mubr.bf16.mxu0 %v951_v24  ;;  %454 = vmatprep.mubr.bf16.mxu1 %v954_v25 }
  0x32   :  { %391 = vmatmul.mubr.bf16.gmra.mrb[8].mxu0 %v953_v26  ;;  %455 = vmatmul.mubr.bf16.gmra.mrb[8].mxu1 %v956_v27 }
  0x33   :  { %398 = vmatprep.mubr.bf16.mxu0 %v957_v28  ;;  %462 = vmatprep.mubr.bf16.mxu1 %v960_v29 }
  0x3a   :  { %399 = vmatmul.mubr.bf16.gmra.mrb[12].mxu0 %v959_v30  ;;  %463 = vmatmul.mubr.bf16.gmra.mrb[12].mxu1 %v962_v31 }
  0x3b   :  { %406 = vmatprep.mubr.bf16.mxu0 %v963_v32  ;;  %470 = vmatprep.mubr.bf16.mxu1 %v966_v33 }
  0x42   :  { %407 = vmatmul.mubr.bf16.gmra.mrb[16].mxu0 %v965_v34  ;;  %471 = vmatmul.mubr.bf16.gmra.mrb[16].mxu1 %v968_v35 }
  0x43   :  { %414 = vmatprep.mubr.bf16.mxu0 %v969_v36  ;;  %478 = vmatprep.mubr.bf16.mxu1 %v972_v37 }
  0x4a   :  { %415 = vmatmul.mubr.bf16.gmra.mrb[20].mxu0 %v971_v38  ;;  %479 = vmatmul.mubr.bf16.gmra.mrb[20].mxu1 %v974_v39 }
  0x4b   :  { %422 = vmatprep.mubr.bf16.mxu0 %v975_v40  ;;  %486 = vmatprep.mubr.bf16.mxu1 %v978_v41 }
  0x52   :  { %423 = vmatmul.mubr.bf16.gmra.mrb[24].mxu0 %v977_v42  ;;  %487 = vmatmul.mubr.bf16.gmra.mrb[24].mxu1 %v980_v43 }
  0x53   :  { %430 = vmatprep.mubr.bf16.mxu0 %v981_v44  ;;  %494 = vmatprep.mubr.bf16.mxu1 %v984_v45 }
  0x5a   :  { %431 = vmatmul.mubr.bf16.gmra.mrb[28].mxu0 %v983_v46  ;;  %495 = vmatmul.mubr.bf16.gmra.mrb[28].mxu1 %v986_v47 }
  0xf5   :  { %v811_v48 = vpop.f32.mrb[0].mxu0  ;;  %v859_v49 = vpop.f32.mrb[0].mxu1 }
  0xf6   :  { %v812_v50 = vpop.f32.mrb[1].mxu0  ;;  %v860_v51 = vpop.f32.mrb[1].mxu1 }
  0xf7   :  { %v813_v52 = vadd.f32 %v812_v50, %v811_v48  ;;  %v814_v53 = vpop.f32.mrb[2].mxu0  ;;  %v861_v54 = vadd.f32 %v860_v51, %v859_v49  ;;  %v862_v55 = vpop.f32.mrb[2].mxu1 }
  0xf8   :  { %v815_v56 = vpop.f32.mrb[3].mxu0  ;;  %v863_v57 = vpop.f32.mrb[3].mxu1 }
  0xf9   :  { %v816_v58 = vadd.f32 %v815_v56, %v814_v53  ;;  %v864_v59 = vadd.f32 %v863_v57, %v862_v55  ;;  %v377_v9 = vadd.f32 %v813_v52, %v1218_v6  ;;  %v441_v19 = vadd.f32 %v861_v54, %v1218_v6 }
  0xfb   :  { %v503_v18 = vmul.f32 0.5, %v377_v9  ;;  %v380_v23 = vadd.f32 %v816_v58, %v1218_v6  ;;  %v444_v25 = vadd.f32 %v864_v59, %v1218_v6  ;;  %v519_v26 = vmul.f32 0.5, %v441_v19 }
  0xfd   :  { %v817_v60 = vpop.f32.mrb[4].mxu0  ;;  %v865_v61 = vpop.f32.mrb[4].mxu1  ;;  %987 = vtanh.f32 %v503_v18  ;;  %v504_v30 = vmul.f32 0.5, %v380_v23  ;;  %v520_v33 = vmul.f32 0.5, %v444_v25 }
  0xfe   :  { %v818_v62 = vpop.f32.mrb[5].mxu0  ;;  %v866_v63 = vpop.f32.mrb[5].mxu1  ;;  %989 = vtanh.f32 %v519_v26 }
  0xff   :  { %v819_v0 = vadd.f32 %v818_v62, %v817_v60  ;;  %v820_v1 = vpop.f32.mrb[6].mxu0  ;;  %v867_v2 = vadd.f32 %v866_v63, %v865_v61  ;;  %v868_v3 = vpop.f32.mrb[6].mxu1  ;;  %991 = vtanh.f32 %v504_v30 }
 0x100   :  { %v821_v4 = vpop.f32.mrb[7].mxu0  ;;  %v869_v5 = vpop.f32.mrb[7].mxu1  ;;  %993 = vtanh.f32 %v520_v33 }
 0x101   :  { %v822_v7 = vadd.f32 %v821_v4, %v820_v1  ;;  %v870_v8 = vadd.f32 %v869_v5, %v868_v3  ;;  %v385_v27 = vadd.f32 %v819_v0, %v1218_v6  ;;  %v449_v34 = vadd.f32 %v867_v2, %v1218_v6 }
 0x103   :  { %v505_v39 = vmul.f32 0.5, %v385_v27  ;;  %v388_v40 = vadd.f32 %v822_v7, %v1218_v6  ;;  %v452_v43 = vadd.f32 %v870_v8, %v1218_v6  ;;  %v521_v47 = vmul.f32 0.5, %v449_v34 }
 0x105   :  { %v823_v10 = vpop.f32.mrb[8].mxu0  ;;  %v871_v11 = vpop.f32.mrb[8].mxu1  ;;  %995 = vtanh.f32 %v505_v39  ;;  %v506_v49 = vmul.f32 0.5, %v388_v40  ;;  %v522_v51 = vmul.f32 0.5, %v452_v43 }
 0x106   :  { %v824_v12 = vpop.f32.mrb[9].mxu0  ;;  %v872_v13 = vpop.f32.mrb[9].mxu1  ;;  %997 = vtanh.f32 %v521_v47 }
 0x107   :  { %v825_v14 = vadd.f32 %v824_v12, %v823_v10  ;;  %v826_v15 = vpop.f32.mrb[10].mxu0  ;;  %v873_v16 = vadd.f32 %v872_v13, %v871_v11  ;;  %v874_v17 = vpop.f32.mrb[10].mxu1  ;;  %999 = vtanh.f32 %v506_v49 }
 0x108   :  { %v827_v20 = vpop.f32.mrb[11].mxu0  ;;  %v875_v21 = vpop.f32.mrb[11].mxu1  ;;  %1001 = vtanh.f32 %v522_v51 }
 0x109   :  { %v828_v22 = vadd.f32 %v827_v20, %v826_v15  ;;  %v876_v24 = vadd.f32 %v875_v21, %v874_v17  ;;  %v393_v44 = vadd.f32 %v825_v14, %v1218_v6  ;;  %v457_v48 = vadd.f32 %v873_v16, %v1218_v6  ;;  %v988_v54 = vpop.eup %987 }
 0x10a   :  { %v567_v2 = vmul.f32 0.5, %v988_v54  ;;  %v990_v5 = vpop.eup %989 }
 0x10b   :  { %v396_v50 = vadd.f32 %v828_v22, %v1218_v6  ;;  %v507_v55 = vmul.f32 0.5, %v393_v44  ;;  %v523_v58 = vmul.f32 0.5, %v457_v48  ;;  %v460_v7 = vadd.f32 %v876_v24, %v1218_v6  ;;  %v992_v13 = vpop.eup %991 }
 0x10c   :  { %v994_v17 = vpop.eup %993  ;;  %v1240_v18 = vadd.f32 0.5, %v567_v2  ;;  %v583_v19 = vmul.f32 0.5, %v990_v5  ;;  %v568_v34 = vmul.f32 0.5, %v992_v13 }
 0x10d   :  { %v829_v28 = vpop.f32.mrb[12].mxu0  ;;  %v877_v29 = vpop.f32.mrb[12].mxu1  ;;  %v508_v63 = vmul.f32 0.5, %v396_v50  ;;  %1003 = vtanh.f32 %v507_v55  ;;  %v524_v23 = vmul.f32 0.5, %v460_v7 }
 0x10e   :  { %v830_v31 = vpop.f32.mrb[13].mxu0  ;;  %v878_v32 = vpop.f32.mrb[13].mxu1  ;;  %1005 = vtanh.f32 %v523_v58 }
 0x10f   :  { %v831_v35 = vadd.f32 %v830_v31, %v829_v28  ;;  %v832_v36 = vpop.f32.mrb[14].mxu0  ;;  %v879_v37 = vadd.f32 %v878_v32, %v877_v29  ;;  %v880_v38 = vpop.f32.mrb[14].mxu1  ;;  %1007 = vtanh.f32 %v508_v63 }
 0x110   :  { %v833_v41 = vpop.f32.mrb[15].mxu0  ;;  %v881_v42 = vpop.f32.mrb[15].mxu1 }
 0x111   :  { %v834_v45 = vadd.f32 %v833_v41, %v832_v36  ;;  %v1229_v46 = vadd.f32 %v881_v42, %v880_v38  ;;  %v401_v10 = vadd.f32 %v831_v35, %v1218_v6  ;;  %v465_v14 = vadd.f32 %v879_v37, %v1218_v6  ;;  %v996_v22 = vpop.eup %995 }
 0x112   :  { %v584_v35 = vmul.f32 0.5, %v994_v17  ;;  %v998_v39 = vpop.eup %997  ;;  %v569_v40 = vmul.f32 0.5, %v996_v22 }
 0x113   :  { %v509_v28 = vmul.f32 0.5, %v401_v10  ;;  %v404_v29 = vadd.f32 %v834_v45, %v1218_v6  ;;  %v525_v36 = vmul.f32 0.5, %v465_v14  ;;  %v1000_v43 = vpop.eup %999  ;;  %v468_v44 = vadd.f32 %v1229_v46, %v1218_v6 }
 0x114   :  { %v1002_v48 = vpop.eup %1001  ;;  %v1253_v58 = vadd.f32 0.5, %v584_v35  ;;  %v585_v46 = vmul.f32 0.5, %v998_v39 }
 0x115   :  { %v835_v52 = vpop.f32.mrb[16].mxu0  ;;  %v883_v53 = vpop.f32.mrb[16].mxu1  ;;  %v510_v49 = vmul.f32 0.5, %v404_v29 }
 0x116   :  { %v836_v56 = vpop.f32.mrb[17].mxu0  ;;  %v884_v57 = vpop.f32.mrb[17].mxu1  ;;  %v617_v35 = vadd.f32 0.5, %v585_v46 }
 0x117   :  { %v837_v59 = vadd.f32 %v836_v56, %v835_v52  ;;  %v838_v60 = vpop.f32.mrb[18].mxu0  ;;  %v885_v61 = vadd.f32 %v884_v57, %v883_v53  ;;  %v886_v62 = vpop.f32.mrb[18].mxu1  ;;  %v615_v53 = vadd.f32 0.5, %v583_v19  ;;  %v600_v57 = vadd.f32 0.5, %v568_v34 }
 0x118   :  { %v839_v0 = vpop.f32.mrb[19].mxu0  ;;  %v887_v1 = vpop.f32.mrb[19].mxu1 }
 0x119   :  { %v409_v3 = vadd.f32 %v837_v59, %v1218_v6  ;;  %v473_v4 = vadd.f32 %v885_v61, %v1218_v6  ;;  %v840_v8 = vadd.f32 %v839_v0, %v838_v60  ;;  %v888_v9 = vadd.f32 %v887_v1, %v886_v62  ;;  %v1247_v52 = vpop.eup %1003 }
 0x11a   :  { %v1251_v56 = vpop.eup %1005  ;;  %v526_v62 = vmul.f32 0.5, %v468_v44 }
 0x11b   :  { %v511_v11 = vmul.f32 0.5, %v409_v3  ;;  %v527_v12 = vmul.f32 0.5, %v473_v4  ;;  %v412_v15 = vadd.f32 %v840_v8, %v1218_v6  ;;  %v476_v16 = vadd.f32 %v888_v9, %v1218_v6  ;;  %v1255_v61 = vpop.eup %1007 }
 0x11c   :  { %v1257_v4 = vadd.f32 0.5, %v569_v40 }
 0x11d   :  { %1009 = vtanh.f32 %v511_v11  ;;  %v841_v20 = vpop.f32.mrb[20].mxu0  ;;  %v889_v21 = vpop.f32.mrb[20].mxu1  ;;  %v512_v24 = vmul.f32 0.5, %v412_v15  ;;  %v528_v25 = vmul.f32 0.5, %v476_v16  ;;  %v570_v11 = vmul.f32 0.5, %v1000_v43 }
 0x11e   :  { %1011 = vtanh.f32 %v527_v12  ;;  %v842_v26 = vpop.f32.mrb[21].mxu0  ;;  %v890_v27 = vpop.f32.mrb[21].mxu1  ;;  %v586_v12 = vmul.f32 0.5, %v1002_v48 }
 0x11f   :  { %v843_v30 = vadd.f32 %v842_v26, %v841_v20  ;;  %v844_v31 = vpop.f32.mrb[22].mxu0  ;;  %v891_v32 = vadd.f32 %v890_v27, %v889_v21  ;;  %v892_v33 = vpop.f32.mrb[22].mxu1  ;;  %1013 = vtanh.f32 %v512_v24 }
 0x120   :  { %v845_v37 = vpop.f32.mrb[23].mxu0  ;;  %v893_v38 = vpop.f32.mrb[23].mxu1  ;;  %1015 = vtanh.f32 %v528_v25 }
 0x121   :  { %v417_v41 = vadd.f32 %v843_v30, %v1218_v6  ;;  %v481_v42 = vadd.f32 %v891_v32, %v1218_v6  ;;  %1017 = vtanh.f32 %v524_v23  ;;  %v846_v45 = vadd.f32 %v845_v37, %v844_v31 }
 0x122   :  { %v894_v47 = vadd.f32 %v893_v38, %v892_v33  ;;  %1019 = vtanh.f32 %v509_v28 }
 0x123   :  { %v513_v50 = vmul.f32 0.5, %v417_v41  ;;  %v529_v51 = vmul.f32 0.5, %v481_v42  ;;  %1021 = vtanh.f32 %v525_v36  ;;  %v420_v54 = vadd.f32 %v846_v45, %v1218_v6 }
 0x124   :  { %v484_v55 = vadd.f32 %v894_v47, %v1218_v6  ;;  %v602_v36 = vadd.f32 0.5, %v570_v11  ;;  %v618_v41 = vadd.f32 0.5, %v586_v12 }
 0x125   :  { %1023 = vtanh.f32 %v513_v50  ;;  %v847_v59 = vpop.f32.mrb[24].mxu0  ;;  %v895_v60 = vpop.f32.mrb[24].mxu1  ;;  %v514_v63 = vmul.f32 0.5, %v420_v54 }
 0x126   :  { %1025 = vtanh.f32 %v529_v51  ;;  %v530_v0 = vmul.f32 0.5, %v484_v55  ;;  %v848_v1 = vpop.f32.mrb[25].mxu0  ;;  %v896_v2 = vpop.f32.mrb[25].mxu1 }
 0x127   :  { %v1010_v3 = vpop.eup %1009  ;;  %1027 = vtanh.f32 %v510_v49  ;;  %v849_v5 = vadd.f32 %v848_v1, %v847_v59  ;;  %v850_v7 = vpop.f32.mrb[26].mxu0  ;;  %v897_v8 = vadd.f32 %v896_v2, %v895_v60 }
 0x128   :  { %v898_v9 = vpop.f32.mrb[26].mxu1  ;;  %v1012_v10 = vpop.eup %1011  ;;  %v575_v13 = vmul.f32 0.5, %v1010_v3  ;;  %1029 = vtanh.f32 %v514_v63 }
 0x129   :  { %v851_v14 = vpop.f32.mrb[27].mxu0  ;;  %v899_v15 = vpop.f32.mrb[27].mxu1  ;;  %v591_v16 = vmul.f32 0.5, %v1012_v10  ;;  %1031 = vtanh.f32 %v530_v0  ;;  %v425_v17 = vadd.f32 %v849_v5, %v1218_v6  ;;  %v489_v19 = vadd.f32 %v897_v8, %v1218_v6 }
 0x12a   :  { %v1014_v20 = vpop.eup %1013  ;;  %1033 = vtanh.f32 %v526_v62  ;;  %v607_v21 = vadd.f32 0.5, %v575_v13  ;;  %v852_v22 = vadd.f32 %v851_v14, %v850_v7  ;;  %v900_v23 = vadd.f32 %v899_v15, %v898_v9 }
 0x12b   :  { %v1016_v24 = vpop.eup %1015  ;;  %v623_v25 = vadd.f32 0.5, %v591_v16  ;;  %v576_v26 = vmul.f32 0.5, %v1014_v20  ;;  %v515_v27 = vmul.f32 0.5, %v425_v17  ;;  %v531_v28 = vmul.f32 0.5, %v489_v19 }
 0x12c   :  { %v1261_v29 = vpop.eup %1017  ;;  %v631_v30 = vadd.f32 %v607_v21, %v1240_v18  ;;  %v592_v31 = vmul.f32 0.5, %v1016_v24  ;;  %v428_v32 = vadd.f32 %v852_v22, %v1218_v6  ;;  %v492_v33 = vadd.f32 %v900_v23, %v1218_v6 }
 0x12d   :  { %v1266_v34 = vpop.eup %1019  ;;  %v608_v37 = vadd.f32 0.5, %v576_v26  ;;  %1035 = vtanh.f32 %v515_v27  ;;  %v853_v38 = vpop.f32.mrb[28].mxu0  ;;  %v571_v22 = vmul.f32 0.5, %v1247_v52  ;;  %v587_v26 = vmul.f32 0.5, %v1251_v56 }
 0x12e   :  { %v901_v39 = vpop.f32.mrb[28].mxu1  ;;  %v1268_v40 = vpop.eup %1021  ;;  %v639_v42 = vadd.f32 %v631_v30, %v615_v53  ;;  %1037 = vtanh.f32 %v531_v28  ;;  %v516_v43 = vmul.f32 0.5, %v428_v32  ;;  %v532_v48 = vmul.f32 0.5, %v492_v33 }
 0x12f   :  { %v854_v18 = vpop.f32.mrb[29].mxu0  ;;  %v902_v44 = vpop.f32.mrb[29].mxu1  ;;  %v632_v47 = vadd.f32 %v608_v37, %v600_v57  ;;  %v624_v59 = vadd.f32 0.5, %v592_v31  ;;  %v572_v31 = vmul.f32 0.5, %v1255_v61  ;;  %v603_v56 = vadd.f32 0.5, %v571_v22 }
 0x130   :  { %v1024_v45 = vpop.eup %1023  ;;  %v855_v49 = vadd.f32 %v854_v18, %v853_v38  ;;  %v856_v50 = vpop.f32.mrb[30].mxu0  ;;  %v903_v51 = vadd.f32 %v902_v44, %v901_v39  ;;  %v647_v46 = vadd.f32 %v639_v42, %v623_v25  ;;  %1039 = vtanh.f32 %v516_v43 }
 0x131   :  { %v904_v54 = vpop.f32.mrb[30].mxu1  ;;  %v1026_v55 = vpop.eup %1025  ;;  %v577_v60 = vmul.f32 0.5, %v1024_v45  ;;  %v640_v53 = vadd.f32 %v632_v47, %v1253_v58  ;;  %1041 = vtanh.f32 %v532_v48  ;;  %v619_v61 = vadd.f32 0.5, %v587_v26 }
 0x132   :  { %v857_v62 = vpop.f32.mrb[31].mxu0  ;;  %v905_v63 = vpop.f32.mrb[31].mxu1  ;;  %v593_v1 = vmul.f32 0.5, %v1026_v55  ;;  %v433_v57 = vadd.f32 %v855_v49, %v1218_v6  ;;  %v655_v3 = vmul.f32 0.25, %v647_v46  ;;  %v497_v7 = vadd.f32 %v903_v51, %v1218_v6 }
 0x133   :  { %v1270_v0 = vpop.eup %1027  ;;  %v609_v5 = vadd.f32 0.5, %v577_v60  ;;  %v858_v8 = vadd.f32 %v857_v62, %v856_v50  ;;  %v648_v10 = vadd.f32 %v640_v53, %v624_v59  ;;  %v906_v21 = vadd.f32 %v905_v63, %v904_v54 }
 0x134   :  { %v1030_v2 = vpop.eup %1029  ;;  %v625_v11 = vadd.f32 0.5, %v593_v1  ;;  %v517_v13 = vmul.f32 0.5, %v433_v57  ;;  %v533_v58 = vmul.f32 0.5, %v497_v7  ;;  %v604_v44 = vadd.f32 0.5, %v572_v31 }
 0x135   :  { %v1032_v9 = vpop.eup %1031  ;;  %v578_v12 = vmul.f32 0.5, %v1030_v2  ;;  %v633_v15 = vadd.f32 %v609_v5, %v1257_v4  ;;  %v436_v17 = vadd.f32 %v858_v8, %v1218_v6  ;;  %v656_v19 = vmul.f32 0.25, %v648_v10 }
 0x136   :  { %v1034_v14 = vpop.eup %1033  ;;  %v594_v16 = vmul.f32 0.5, %v1032_v9  ;;  %1043 = vtanh.f32 %v517_v13  ;;  %v500_v4 = vadd.f32 %v906_v21, %v1218_v6  ;;  %v588_v6 = vmul.f32 0.5, %v1261_v29 }
 0x137   :  { %v610_v20 = vadd.f32 0.5, %v578_v12  ;;  %v641_v23 = vadd.f32 %v633_v15, %v617_v35  ;;  %1045 = vtanh.f32 %v533_v58  ;;  %v518_v24 = vmul.f32 0.5, %v436_v17  ;;  %v1036_v25 = vpop.eup %1035 }
 0x138   :  { %v775_v27 = vpack.c.bf16 %v656_v19, %v655_v3  ;;  %v1038_v30 = vpop.eup %1037  ;;  %v579_v33 = vmul.f32 0.5, %v1036_v25  ;;  %v626_v52 = vadd.f32 0.5, %v594_v16  ;;  %v534_v38 = vmul.f32 0.5, %v500_v4 }
 0x139   :  { %v634_v28 = vadd.f32 %v610_v20, %v602_v36  ;;  %v649_v32 = vadd.f32 %v641_v23, %v625_v11  ;;  %1047 = vtanh.f32 %v518_v24  ;;  %v595_v37 = vmul.f32 0.5, %v1038_v30 }
 0x13a   :  { %776 = vst [vmem:[%s1300_s3] sm:$0xff] %v775_v27   ;;  %v1040_v39 = vpop.eup %1039  ;;  %v611_v42 = vadd.f32 0.5, %v579_v33  ;;  %1049 = vtanh.f32 %v534_v38  ;;  %v620_v46 = vadd.f32 0.5, %v588_v6  ;;  %v589_v29 = vmul.f32 0.5, %v1268_v40 }
 0x13b   :  { %v642_v35 = vadd.f32 %v634_v28, %v618_v41  ;;  %v1042_v36 = vpop.eup %1041  ;;  %v580_v18 = vmul.f32 0.5, %v1040_v39  ;;  %v627_v47 = vadd.f32 0.5, %v595_v37  ;;  %v657_v48 = vmul.f32 0.25, %v649_v32 }
 0x13c   :  { %v635_v45 = vadd.f32 %v611_v42, %v603_v56  ;;  %v596_v51 = vmul.f32 0.5, %v1042_v36  ;;  %v573_v41 = vmul.f32 0.5, %v1266_v34  ;;  %v574_v1 = vmul.f32 0.5, %v1270_v0 }
 0x13d   :  { %v650_v43 = vadd.f32 %v642_v35, %v626_v52  ;;  %v612_v50 = vadd.f32 0.5, %v580_v18  ;;  %v590_v8 = vmul.f32 0.5, %v1034_v14  ;;  %v621_v11 = vadd.f32 0.5, %v589_v29 }
 0x13e   :  { %v643_v54 = vadd.f32 %v635_v45, %v619_v61  ;;  %v628_v57 = vadd.f32 0.5, %v596_v51  ;;  %v605_v5 = vadd.f32 0.5, %v573_v41  ;;  %v606_v15 = vadd.f32 0.5, %v574_v1 }
 0x13f   :  { %v658_v49 = vmul.f32 0.25, %v650_v43  ;;  %v636_v60 = vadd.f32 %v612_v50, %v604_v44  ;;  %v622_v20 = vadd.f32 0.5, %v590_v8 }
 0x140   :  { %v1044_v55 = vpop.eup %1043  ;;  %v651_v63 = vadd.f32 %v643_v54, %v627_v47 }
 0x141   :  { %v780_v59 = vpack.c.bf16 %v658_v49, %v657_v48  ;;  %v1046_v62 = vpop.eup %1045  ;;  %v581_v53 = vmul.f32 0.5, %v1044_v55  ;;  %v644_v2 = vadd.f32 %v636_v60, %v620_v46 }
 0x142   :  { %v597_v3 = vmul.f32 0.5, %v1046_v62  ;;  %v659_v16 = vmul.f32 0.25, %v651_v63 }
 0x143   :  { %792 = vst [vmem:[%s1300_s3 + $0x8] sm:$0xff] %v780_v59   ;;  %v1048_v34 = vpop.eup %1047  ;;  %v613_v7 = vadd.f32 0.5, %v581_v53  ;;  %v652_v9 = vadd.f32 %v644_v2, %v628_v57 }
 0x144   :  { %v582_v10 = vmul.f32 0.5, %v1048_v34  ;;  %v629_v40 = vadd.f32 0.5, %v597_v3  ;;  %v1050_v13 = vpop.eup %1049 }
 0x145   :  { %v637_v12 = vadd.f32 %v613_v7, %v605_v5  ;;  %v660_v0 = vmul.f32 0.25, %v652_v9  ;;  %v598_v19 = vmul.f32 0.5, %v1050_v13 }
 0x146   :  { %v614_v58 = vadd.f32 0.5, %v582_v10 }
 0x147   :  { %v645_v17 = vadd.f32 %v637_v12, %v621_v11  ;;  %v785_v21 = vpack.c.bf16 %v660_v0, %v659_v16  ;;  %v630_v14 = vadd.f32 0.5, %v598_v19 }
 0x148   :  { %v638_v22 = vadd.f32 %v614_v58, %v606_v15 }
 0x149   :  { %v653_v23 = vadd.f32 %v645_v17, %v629_v40  ;;  %793 = vst [vmem:[%s1300_s3 + $0x10] sm:$0xff] %v785_v21  }
 0x14a   :  { %v646_v24 = vadd.f32 %v638_v22, %v622_v20 }
 0x14b   :  { %v661_v26 = vmul.f32 0.25, %v653_v23 }
 0x14c   :  { %v654_v25 = vadd.f32 %v646_v24, %v630_v14 }
 0x14e   :  { %v662_v27 = vmul.f32 0.25, %v654_v25 }
 0x150   :  { %v790_v28 = vpack.c.bf16 %v662_v27, %v661_v26 }
 0x152   :  { %794 = vst [vmem:[%s1300_s3 + $0x18] sm:$0xff] %v790_v28  }

// kernel: lenet_forward.5
= control target key start
LH: loop header
LB: loop body
LE: loop exit
PB: predicated region body
PF: predicated region fallthrough
CT: control target
= control target key end

     0   :  { %s646_s1 = inlined_call_operand.vmem [shape: bf16[512,128], index: 1, kind: input, shape index: {}]   ;;  %s647_s0 = inlined_call_operand.vmem [shape: bf16[16,512], index: 0, kind: input, shape index: {}]   ;;  %s648_s2 = inlined_call_operand.vmem [shape: f32[1,128], index: 2, kind: input, shape index: {}]   ;;  %s649_s3 = inlined_call_operand.vmem [shape: f32[16,128], index: 3, kind: output, shape index: {}]  }
   0x1   :  { %v471_v0 = vld [vmem:[%s646_s1 + $0x40] sm:$0xff]   ;;  %v475_v4 = vld [vmem:[%s646_s1 + $0x48] sm:$0xff]   ;;  %v479_v8 = vld [vmem:[%s646_s1 + $0x50] sm:$0xff]  }
   0x2   :  { %v472_v1 = vld [vmem:[%s646_s1 + $0xc0] sm:$0xff]   ;;  %427 = vmatprep.subr.bf16.mxu0 %v471_v0  ;;  %v476_v5 = vld [vmem:[%s646_s1 + $0xc8] sm:$0xff]   ;;  %v480_v9 = vld [vmem:[%s646_s1 + $0xd0] sm:$0xff]  }
   0x3   :  { %v473_v2 = vld [vmem:[%s646_s1] sm:$0xff]   ;;  %449 = vmatprep.subr.bf16.mxu1 %v472_v1  ;;  %v477_v6 = vld [vmem:[%s646_s1 + $0x8] sm:$0xff]   ;;  %v481_v10 = vld [vmem:[%s646_s1 + $0x10] sm:$0xff]  }
   0x4   :  { %v474_v3 = vld [vmem:[%s646_s1 + $0x80] sm:$0xff]   ;;  %428 = vmatpush3.bf16.msra.mxu0 %v473_v2  ;;  %v478_v7 = vld [vmem:[%s646_s1 + $0x88] sm:$0xff]   ;;  %v482_v11 = vld [vmem:[%s646_s1 + $0x90] sm:$0xff]  }
   0x5   :  { %450 = vmatpush3.bf16.msra.mxu1 %v474_v3  ;;  %429 = vmatprep.subr.bf16.mxu0 %v475_v4  ;;  %v483_v12 = vld [vmem:[%s646_s1 + $0x58] sm:$0xff]   ;;  %v487_v16 = vld [vmem:[%s646_s1 + $0x60] sm:$0xff]   ;;  %v491_v20 = vld [vmem:[%s646_s1 + $0x68] sm:$0xff]  }
   0x6   :  { %451 = vmatprep.subr.bf16.mxu1 %v476_v5  ;;  %v484_v13 = vld [vmem:[%s646_s1 + $0xd8] sm:$0xff]   ;;  %v488_v17 = vld [vmem:[%s646_s1 + $0xe0] sm:$0xff]   ;;  %v492_v21 = vld [vmem:[%s646_s1 + $0xe8] sm:$0xff]  }
   0x7   :  { %v485_v14 = vld [vmem:[%s646_s1 + $0x18] sm:$0xff]   ;;  %v489_v18 = vld [vmem:[%s646_s1 + $0x20] sm:$0xff]   ;;  %v493_v22 = vld [vmem:[%s646_s1 + $0x28] sm:$0xff]  }
   0x8   :  { %430 = vmatpush3.bf16.msra.mxu0 %v477_v6  ;;  %v486_v15 = vld [vmem:[%s646_s1 + $0x98] sm:$0xff]   ;;  %v490_v19 = vld [vmem:[%s646_s1 + $0xa0] sm:$0xff]   ;;  %v494_v23 = vld [vmem:[%s646_s1 + $0xa8] sm:$0xff]  }
   0x9   :  { %452 = vmatpush3.bf16.msra.mxu1 %v478_v7  ;;  %431 = vmatprep.subr.bf16.mxu0 %v479_v8  ;;  %v495_v24 = vld [vmem:[%s646_s1 + $0x70] sm:$0xff]   ;;  %v499_v28 = vld [vmem:[%s646_s1 + $0x78] sm:$0xff]   ;;  %v390_v38 = vld [vmem:[%s648_s2] ss:$0 sm:$0xff] }
   0xa   :  { %453 = vmatprep.subr.bf16.mxu1 %v480_v9  ;;  %v496_v25 = vld [vmem:[%s646_s1 + $0xf0] sm:$0xff]   ;;  %v500_v29 = vld [vmem:[%s646_s1 + $0xf8] sm:$0xff]  }
   0xb   :  { %v497_v26 = vld [vmem:[%s646_s1 + $0x30] sm:$0xff]   ;;  %v501_v30 = vld [vmem:[%s646_s1 + $0x38] sm:$0xff]  }
   0xc   :  { %432 = vmatpush3.bf16.msra.mxu0 %v481_v10  ;;  %v498_v27 = vld [vmem:[%s646_s1 + $0xb0] sm:$0xff]   ;;  %v502_v31 = vld [vmem:[%s646_s1 + $0xb8] sm:$0xff]  }
   0xd   :  { %454 = vmatpush3.bf16.msra.mxu1 %v482_v11  ;;  %433 = vmatprep.subr.bf16.mxu0 %v483_v12  ;;  %v503_v32 = vld [vmem:[%s647_s0] ss:$16 sps:$4 sm:$0xff]   ;;  %v505_v33 = vld [vmem:[%s647_s0 + $0x4] ss:$16 sps:$4 sm:$0xff]   ;;  %v506_v34 = vld [vmem:[%s647_s0 + $0x8] ss:$16 sps:$4 sm:$0xff]  }
   0xe   :  { %455 = vmatprep.subr.bf16.mxu1 %v484_v13  ;;  %v508_v35 = vld [vmem:[%s647_s0 + $0xc] ss:$16 sps:$4 sm:$0xff]   ;;  %334 = vmatprep.mubr.bf16.mxu0 %v505_v33 }
   0xf   :  { %375 = vmatprep.mubr.bf16.mxu1 %v508_v35 }
  0x10   :  { %434 = vmatpush3.bf16.msra.mxu0 %v485_v14 }
  0x11   :  { %456 = vmatpush3.bf16.msra.mxu1 %v486_v15  ;;  %435 = vmatprep.subr.bf16.mxu0 %v487_v16 }
  0x12   :  { %457 = vmatprep.subr.bf16.mxu1 %v488_v17 }
  0x14   :  { %436 = vmatpush3.bf16.msra.mxu0 %v489_v18 }
  0x15   :  { %458 = vmatpush3.bf16.msra.mxu1 %v490_v19  ;;  %437 = vmatprep.subr.bf16.mxu0 %v491_v20 }
  0x16   :  { %459 = vmatprep.subr.bf16.mxu1 %v492_v21 }
  0x18   :  { %438 = vmatpush3.bf16.msra.mxu0 %v493_v22 }
  0x19   :  { %460 = vmatpush3.bf16.msra.mxu1 %v494_v23  ;;  %439 = vmatprep.subr.bf16.mxu0 %v495_v24 }
  0x1a   :  { %461 = vmatprep.subr.bf16.mxu1 %v496_v25 }
  0x1c   :  { %440 = vmatpush3.bf16.msra.mxu0 %v497_v26 }
  0x1d   :  { %462 = vmatpush3.bf16.msra.mxu1 %v498_v27  ;;  %441 = vmatprep.subr.bf16.mxu0 %v499_v28 }
  0x1e   :  { %463 = vmatprep.subr.bf16.mxu1 %v500_v29 }
  0x20   :  { %442 = vmatpush3.bf16.msra.mxu0 %v501_v30 }
  0x21   :  { %464 = vmatpush3.bf16.msra.mxu1 %v502_v31 }
  0x23   :  { %335 = vmatmul.mubr.bf16.vlgmr.msra.gmra.mrb[0].mxu0 %v503_v32 }
  0x24   :  { %376 = vmatmul.mubr.bf16.vlgmr.msra.gmra.mrb[0].mxu1 %v506_v34 }
  0xf6   :  { %v443_v36 = vpop.f32.mrb[0].mxu0 }
  0xf7   :  { %v465_v37 = vpop.f32.mrb[0].mxu1  ;;  %v444_v39 = vpop.f32.mrb[1].mxu0 }
  0xf8   :  { %v445_v40 = vadd.f32 %v444_v39, %v443_v36  ;;  %v466_v41 = vpop.f32.mrb[1].mxu1  ;;  %v446_v42 = vpop.f32.mrb[2].mxu0 }
  0xf9   :  { %v467_v43 = vadd.f32 %v466_v41, %v465_v37  ;;  %v468_v44 = vpop.f32.mrb[2].mxu1  ;;  %v447_v45 = vpop.f32.mrb[3].mxu0 }
  0xfa   :  { %v337_v46 = vadd.f32 %v445_v40, %v390_v38  ;;  %v448_v47 = vadd.f32 %v447_v45, %v446_v42  ;;  %v469_v48 = vpop.f32.mrb[3].mxu1 }
  0xfb   :  { %v470_v49 = vadd.f32 %v469_v48, %v468_v44 }
  0xfc   :  { %v378_v50 = vadd.f32 %v467_v43, %v337_v46  ;;  %v340_v51 = vadd.f32 %v448_v47, %v390_v38 }
  0xfe   :  { %384 = vst [vmem:[%s649_s3] sm:$0xff] %v378_v50  ;;  %v381_v52 = vadd.f32 %v470_v49, %v340_v51 }
 0x100   :  { %385 = vst [vmem:[%s649_s3 + $0x8] sm:$0xff] %v381_v52 }

</bundles_post_ra>
